<compile_context>
chip_gen: v7x
topology: tpu7x:2x2x1
jax: 0.10.0
libtpu: 0.0.40
codegen_flags: <defaults>
</compile_context>

<pallas_src>
import functools

import jax
import jax.numpy as jnp
import numpy as np
from jax.experimental import pallas as pl
from jax.experimental.pallas import tpu as pltpu

# ----------------------------- dimensions ----------------------------------
EMB_DIM = 300      # semantic embedding width
LANG_H, LANG_O = 512, 256
LOC_IN, LOC_H, LOC_O = 4, 32, 256
VIS_IN, VIS_H, VIS_O = 1024, 512, 256
FUSE_O = 256
TM = 128           # row tile: matches the 128-wide MXU (v5e) and gives good
                    # M-occupancy on the 256-wide MXU (v6e/v7x)


# ------------------------------- kernel ------------------------------------
def _instance_head_kernel(
    emb_ref, loc_ref, vis_ref,
    wl1_ref, bl1_ref, wl2_ref, bl2_ref,
    wo1_ref, bo1_ref, wo2_ref, bo2_ref,
    wv1_ref, bv1_ref, wv2_ref, bv2_ref,
    wi1a_ref, wi1b_ref, wi1c_ref, bi1_ref,
    feat_ref,
):
    dot = lambda a, b: jnp.dot(a, b, preferred_element_type=jnp.float32)
    # bias add + ReLU in f32 (VPU), then narrow activations to bf16 for the
    # next MXU pass.
    act = lambda x, b: jnp.maximum(x + b, 0.0).astype(jnp.bfloat16)

    # language branch: 300 -> 512 -> 256  (bf16 x bf16, f32 accumulation)
    lang = act(dot(emb_ref[...], wl1_ref[...]), bl1_ref[...])
    lang = act(dot(lang, wl2_ref[...]), bl2_ref[...])

    # location branch: 4 -> 32 -> 256 (first layer is tiny; kept in f32)
    loc = act(dot(loc_ref[...], wo1_ref[...]), bo1_ref[...])
    loc = act(dot(loc, wo2_ref[...]), bo2_ref[...])

    # visual branch: 1024 -> 512 -> 256
    vis = act(dot(vis_ref[...], wv1_ref[...]), bv1_ref[...])
    vis = act(dot(vis, wv2_ref[...]), bv2_ref[...])

    # fusion (instance_fc1 + ReLU): equivalent to concat([lang, loc, vis]) @ wi1
    # but without materializing a (TM, 768) copy in VMEM — wi1 is split into
    # three 256x256 blocks and the partial products accumulate in f32.
    acc = (dot(lang, wi1a_ref[...])
           + dot(loc, wi1b_ref[...])
           + dot(vis, wi1c_ref[...]))
    feat_ref[...] = jnp.maximum(acc + bi1_ref[...], 0.0)


def _row_spec(d):
    return pl.BlockSpec((TM, d), lambda i: (i, 0))


def _full_spec(shape):
    # whole-array block, replicated across the row grid (constant index map)
    return pl.BlockSpec(shape, lambda i: tuple(0 for _ in shape))


@jax.jit
def instance_head_pallas(emb, loc, vis, params):
    """emb:(Np,300) loc:(Np,4) vis:(Np,1024), Np a multiple of TM.

    Returns the 256-wide fused instance features (f32).  The final 256->1
    scoring layer + sigmoid is intentionally done outside the kernel.
    """
    n_pad = emb.shape[0]
    grid = (n_pad // TM,)

    bf = lambda w: w.astype(jnp.bfloat16)
    wi1 = params["wi1"]                       # (768, 256) — split on 256 rows
    wi1a = wi1[:LANG_O]
    wi1b = wi1[LANG_O:LANG_O + LOC_O]
    wi1c = wi1[LANG_O + LOC_O:]

    in_specs = [
        _row_spec(EMB_DIM), _row_spec(LOC_IN), _row_spec(VIS_IN),
        _full_spec((EMB_DIM, LANG_H)), _full_spec((1, LANG_H)),
        _full_spec((LANG_H, LANG_O)), _full_spec((1, LANG_O)),
        _full_spec((LOC_IN, LOC_H)), _full_spec((1, LOC_H)),
        _full_spec((LOC_H, LOC_O)), _full_spec((1, LOC_O)),
        _full_spec((VIS_IN, VIS_H)), _full_spec((1, VIS_H)),
        _full_spec((VIS_H, VIS_O)), _full_spec((1, VIS_O)),
        _full_spec((LANG_O, FUSE_O)), _full_spec((LOC_O, FUSE_O)),
        _full_spec((VIS_O, FUSE_O)), _full_spec((1, FUSE_O)),
    ]
    out_specs = _row_spec(FUSE_O)
    out_shape = jax.ShapeDtypeStruct((n_pad, FUSE_O), jnp.float32)

    feat256 = pl.pallas_call(
        _instance_head_kernel,
        grid=grid,
        in_specs=in_specs,
        out_specs=out_specs,
        out_shape=out_shape,
        compiler_params=pltpu.CompilerParams(
            dimension_semantics=("parallel",)),
    )(
        emb.astype(jnp.bfloat16), loc.astype(jnp.float32), vis.astype(jnp.bfloat16),
        bf(params["wl1"]), params["bl1"], bf(params["wl2"]), params["bl2"],
        params["wo1"], params["bo1"], bf(params["wo2"]), params["bo2"],
        bf(params["wv1"]), params["bv1"], bf(params["wv2"]), params["bv2"],
        bf(wi1a), bf(wi1b), bf(wi1c), params["bi1"],
    )
    return feat256


# --------------------------- module-level glue ------------------------------
def init_params(key, instance_num):
    """Deterministic synthetic parameters (shapes from InstanceHead17.__init__)."""
    ks = jax.random.split(key, 20)
    init = lambda k, shape, fan_in: (
        jax.random.uniform(k, shape, jnp.float32, -1.0, 1.0) / np.sqrt(fan_in))
    p = {}
    # TODO(synk): real weights come from 'semantic_embedding.pth'; synthesized here.
    p["embed"] = jax.random.normal(ks[0], (instance_num - 1, EMB_DIM), jnp.float32)
    p["wl1"] = init(ks[1], (EMB_DIM, LANG_H), EMB_DIM)
    p["bl1"] = init(ks[2], (1, LANG_H), EMB_DIM)
    p["wl2"] = init(ks[3], (LANG_H, LANG_O), LANG_H)
    p["bl2"] = init(ks[4], (1, LANG_O), LANG_H)
    p["wo1"] = init(ks[5], (LOC_IN, LOC_H), LOC_IN)
    p["bo1"] = init(ks[6], (1, LOC_H), LOC_IN)
    p["wo2"] = init(ks[7], (LOC_H, LOC_O), LOC_H)
    p["bo2"] = init(ks[8], (1, LOC_O), LOC_H)
    p["wv1"] = init(ks[9], (VIS_IN, VIS_H), VIS_IN)
    p["bv1"] = init(ks[10], (1, VIS_H), VIS_IN)
    p["wv2"] = init(ks[11], (VIS_H, VIS_O), VIS_H)
    p["bv2"] = init(ks[12], (1, VIS_O), VIS_H)
    p["wi1"] = init(ks[13], (LANG_O + LOC_O + VIS_O, FUSE_O), LANG_O + LOC_O + VIS_O)
    p["bi1"] = init(ks[14], (1, FUSE_O), LANG_O + LOC_O + VIS_O)
    p["wi2"] = init(ks[15], (FUSE_O, 1), FUSE_O)
    p["bi2"] = init(ks[16], (1, 1), FUSE_O)
    return p


def instance_head17_forward(instance_features, pred_locations, pred_classes,
                            params, training=False):
    """Inference-path forward of InstanceHead17.

    instance_features: list of (n_i, 1024) arrays (one per image)
    pred_locations:    list of (n_i, 4) arrays
    pred_classes:      list of (n_i,) int arrays (1-based classes)
    Returns (instance_interest_preds, instance_features_256s, losses, metrics).
    """
    # TODO(synk): training=True path (BCE loss, top-k precision/recall metrics,
    # host-side prints) is not reproduced; only the inference split is done.
    nums = [int(f.shape[0]) for f in instance_features]
    n_total = sum(nums)

    vis_mix = jnp.concatenate(instance_features, axis=0).astype(jnp.float32)
    loc_mix = jnp.concatenate(pred_locations, axis=0).astype(jnp.float32)
    cls_mix = jnp.concatenate(pred_classes, axis=0).astype(jnp.int32) - 1
    emb_mix = jnp.take(params["embed"], cls_mix, axis=0)  # semantic_embed lookup

    # pad rows to a multiple of TM for the kernel, slice back afterwards
    n_pad = ((n_total + TM - 1) // TM) * TM
    pad = n_pad - n_total
    if pad:
        emb_mix = jnp.pad(emb_mix, ((0, pad), (0, 0)))
        loc_mix = jnp.pad(loc_mix, ((0, pad), (0, 0)))
        vis_mix = jnp.pad(vis_mix, ((0, pad), (0, 0)))

    feat256 = instance_head_pallas(emb_mix, loc_mix, vis_mix, params)
    feat256 = feat256[:n_total]

    # final scoring (instance_fc2 + sigmoid) in plain JAX: a 1-lane output in
    # the kernel would force masked stores and an N=1 MXU pass (perf review).
    pred = jax.nn.sigmoid(feat256 @ params["wi2"] + params["bi2"])[:, 0]

    # split per-image (compute_instance_result_bce, training=False path)
    offsets = np.cumsum([0] + nums)
    instance_interest_preds = [pred[offsets[i]:offsets[i + 1]] for i in range(len(nums))]
    instance_features_256s = [feat256[offsets[i]:offsets[i + 1]] for i in range(len(nums))]
    losses, metrics = {}, {}
    return instance_interest_preds, instance_features_256s, losses, metrics


# ------------------------------ reference ----------------------------------
def _ref_forward(emb, loc, vis, p):
    relu = lambda x: jnp.maximum(x, 0.0)
    lang = relu(relu(emb @ p["wl1"] + p["bl1"]) @ p["wl2"] + p["bl2"])
    locf = relu(relu(loc @ p["wo1"] + p["bo1"]) @ p["wo2"] + p["bo2"])
    visf = relu(relu(vis @ p["wv1"] + p["bv1"]) @ p["wv2"] + p["bv2"])
    mix = jnp.concatenate([lang, locf, visf], axis=1)
    f256 = relu(mix @ p["wi1"] + p["bi1"])
    pred = jax.nn.sigmoid(f256 @ p["wi2"] + p["bi2"])[:, 0]
    return f256, pred


if __name__ == "__main__":
    key = jax.random.PRNGKey(0)
    instance_num = 9          # cfg.MODEL.RELATION_HEADS.INSTANCE_NUM (synthetic)
    params = init_params(key, instance_num)

    # two images with 3 and 5 detected instances
    k1, k2, k3, k4, k5, k6 = jax.random.split(jax.random.PRNGKey(1), 6)
    nums = [3, 5]
    instance_features = [
        jax.random.normal(k1, (nums[0], VIS_IN), jnp.float32),
        jax.random.normal(k2, (nums[1], VIS_IN), jnp.float32),
    ]
    pred_locations = [
        jax.random.uniform(k3, (nums[0], LOC_IN), jnp.float32),
        jax.random.uniform(k4, (nums[1], LOC_IN), jnp.float32),
    ]
    pred_classes = [
        jax.random.randint(k5, (nums[0],), 1, instance_num),
        jax.random.randint(k6, (nums[1],), 1, instance_num),
    ]

    preds, feats, losses, metrics = instance_head17_forward(
        instance_features, pred_locations, pred_classes, params, training=False)
    jax.block_until_ready(preds)
    jax.block_until_ready(feats)

    # numerical sanity check against a plain-JAX f32 reference (kernel runs the
    # matmuls with bf16 weights/activations + f32 accumulation, so tolerances
    # leave room for the ~1e-3 quantization error).
    vis_mix = jnp.concatenate(instance_features, 0)
    loc_mix = jnp.concatenate(pred_locations, 0)
    cls_mix = jnp.concatenate(pred_classes, 0).astype(jnp.int32) - 1
    emb_mix = jnp.take(params["embed"], cls_mix, axis=0)
    f_ref, p_ref = _ref_forward(emb_mix, loc_mix, vis_mix, params)
    assert np.allclose(np.concatenate([np.asarray(x) for x in preds]),
                       np.asarray(p_ref), atol=2e-2, rtol=2e-2)
    assert np.allclose(np.concatenate([np.asarray(x) for x in feats]),
                       np.asarray(f_ref), atol=2e-2, rtol=2e-2)
    assert preds[0].shape == (3,) and preds[1].shape == (5,)
    assert feats[0].shape == (3, 256) and feats[1].shape == (5, 256)

    print("KERNEL_OK")
</pallas_src>

<mosaic_0001>
module attributes {stable_mosaic.version = 11 : i64} {
  func.func @_instance_head_kernel(%arg0: i32, %arg1: memref<128x300xbf16, #tpu.memory_space<vmem>>, %arg2: memref<128x4xf32, #tpu.memory_space<vmem>>, %arg3: memref<128x1024xbf16, #tpu.memory_space<vmem>>, %arg4: memref<300x512xbf16, #tpu.memory_space<vmem>>, %arg5: memref<1x512xf32, #tpu.memory_space<vmem>>, %arg6: memref<512x256xbf16, #tpu.memory_space<vmem>>, %arg7: memref<1x256xf32, #tpu.memory_space<vmem>>, %arg8: memref<4x32xf32, #tpu.memory_space<vmem>>, %arg9: memref<1x32xf32, #tpu.memory_space<vmem>>, %arg10: memref<32x256xbf16, #tpu.memory_space<vmem>>, %arg11: memref<1x256xf32, #tpu.memory_space<vmem>>, %arg12: memref<1024x512xbf16, #tpu.memory_space<vmem>>, %arg13: memref<1x512xf32, #tpu.memory_space<vmem>>, %arg14: memref<512x256xbf16, #tpu.memory_space<vmem>>, %arg15: memref<1x256xf32, #tpu.memory_space<vmem>>, %arg16: memref<256x256xbf16, #tpu.memory_space<vmem>>, %arg17: memref<256x256xbf16, #tpu.memory_space<vmem>>, %arg18: memref<256x256xbf16, #tpu.memory_space<vmem>>, %arg19: memref<1x256xf32, #tpu.memory_space<vmem>>, %arg20: memref<128x256xf32, #tpu.memory_space<vmem>>) attributes {dimension_semantics = [#tpu.dimension_semantics<parallel>], iteration_bounds = array<i64: 1>, scalar_prefetch = 0 : i64, scratch_operands = 0 : i64, tpu.core_type = #tpu.core_type<tc>, window_params = [{transform_indices = @transform_0, window_bounds = array<i64: 128, 300>}, {transform_indices = @transform_1, window_bounds = array<i64: 128, 4>}, {transform_indices = @transform_2, window_bounds = array<i64: 128, 1024>}, {pipeline_mode = #tpu.pipeline_mode<synchronous>, transform_indices = @transform_3, window_bounds = array<i64: 300, 512>}, {pipeline_mode = #tpu.pipeline_mode<synchronous>, transform_indices = @transform_4, window_bounds = array<i64: 1, 512>}, {pipeline_mode = #tpu.pipeline_mode<synchronous>, transform_indices = @transform_5, window_bounds = array<i64: 512, 256>}, {pipeline_mode = #tpu.pipeline_mode<synchronous>, transform_indices = @transform_6, window_bounds = array<i64: 1, 256>}, {pipeline_mode = #tpu.pipeline_mode<synchronous>, transform_indices = @transform_7, window_bounds = array<i64: 4, 32>}, {pipeline_mode = #tpu.pipeline_mode<synchronous>, transform_indices = @transform_8, window_bounds = array<i64: 1, 32>}, {pipeline_mode = #tpu.pipeline_mode<synchronous>, transform_indices = @transform_9, window_bounds = array<i64: 32, 256>}, {pipeline_mode = #tpu.pipeline_mode<synchronous>, transform_indices = @transform_10, window_bounds = array<i64: 1, 256>}, {pipeline_mode = #tpu.pipeline_mode<synchronous>, transform_indices = @transform_11, window_bounds = array<i64: 1024, 512>}, {pipeline_mode = #tpu.pipeline_mode<synchronous>, transform_indices = @transform_12, window_bounds = array<i64: 1, 512>}, {pipeline_mode = #tpu.pipeline_mode<synchronous>, transform_indices = @transform_13, window_bounds = array<i64: 512, 256>}, {pipeline_mode = #tpu.pipeline_mode<synchronous>, transform_indices = @transform_14, window_bounds = array<i64: 1, 256>}, {pipeline_mode = #tpu.pipeline_mode<synchronous>, transform_indices = @transform_15, window_bounds = array<i64: 256, 256>}, {pipeline_mode = #tpu.pipeline_mode<synchronous>, transform_indices = @transform_16, window_bounds = array<i64: 256, 256>}, {pipeline_mode = #tpu.pipeline_mode<synchronous>, transform_indices = @transform_17, window_bounds = array<i64: 256, 256>}, {pipeline_mode = #tpu.pipeline_mode<synchronous>, transform_indices = @transform_18, window_bounds = array<i64: 1, 256>}, {transform_indices = @transform_19, window_bounds = array<i64: 128, 256>}]} {
    %c0 = arith.constant 0 : index
    %c0_0 = arith.constant 0 : index
    %0 = vector.load %arg1[%c0, %c0_0] : memref<128x300xbf16, #tpu.memory_space<vmem>>, vector<128x300xbf16>
    %c0_1 = arith.constant 0 : index
    %c0_2 = arith.constant 0 : index
    %1 = vector.load %arg4[%c0_1, %c0_2] : memref<300x512xbf16, #tpu.memory_space<vmem>>, vector<300x512xbf16>
    %cst = arith.constant dense<0.000000e+00> : vector<128x512xf32>
    %2 = tpu.matmul %0, %1, %cst {dimension_numbers = #tpu.dot_dimension_numbers<[1], [0], [0], [1], [0, 0, 1, 1], [], []>} : vector<128x300xbf16>, vector<300x512xbf16>, vector<128x512xf32> -> vector<128x512xf32>
    %c0_3 = arith.constant 0 : index
    %c0_4 = arith.constant 0 : index
    %3 = vector.load %arg5[%c0_3, %c0_4] : memref<1x512xf32, #tpu.memory_space<vmem>>, vector<1x512xf32>
    %4 = vector.broadcast %3 : vector<1x512xf32> to vector<128x512xf32>
    %5 = arith.addf %2, %4 : vector<128x512xf32>
    %cst_5 = arith.constant 0.000000e+00 : f32
    %6 = vector.broadcast %cst_5 : f32 to vector<128x512xf32>
    %7 = arith.maximumf %5, %6 : vector<128x512xf32>
    %8 = arith.truncf %7 : vector<128x512xf32> to vector<128x512xbf16>
    %c0_6 = arith.constant 0 : index
    %c0_7 = arith.constant 0 : index
    %9 = vector.load %arg6[%c0_6, %c0_7] : memref<512x256xbf16, #tpu.memory_space<vmem>>, vector<512x256xbf16>
    %cst_8 = arith.constant dense<0.000000e+00> : vector<128x256xf32>
    %10 = tpu.matmul %8, %9, %cst_8 {dimension_numbers = #tpu.dot_dimension_numbers<[1], [0], [0], [1], [0, 0, 1, 1], [], []>} : vector<128x512xbf16>, vector<512x256xbf16>, vector<128x256xf32> -> vector<128x256xf32>
    %c0_9 = arith.constant 0 : index
    %c0_10 = arith.constant 0 : index
    %11 = vector.load %arg7[%c0_9, %c0_10] : memref<1x256xf32, #tpu.memory_space<vmem>>, vector<1x256xf32>
    %12 = vector.broadcast %11 : vector<1x256xf32> to vector<128x256xf32>
    %13 = arith.addf %10, %12 : vector<128x256xf32>
    %cst_11 = arith.constant 0.000000e+00 : f32
    %14 = vector.broadcast %cst_11 : f32 to vector<128x256xf32>
    %15 = arith.maximumf %13, %14 : vector<128x256xf32>
    %16 = arith.truncf %15 : vector<128x256xf32> to vector<128x256xbf16>
    %c0_12 = arith.constant 0 : index
    %c0_13 = arith.constant 0 : index
    %17 = vector.load %arg2[%c0_12, %c0_13] : memref<128x4xf32, #tpu.memory_space<vmem>>, vector<128x4xf32>
    %c0_14 = arith.constant 0 : index
    %c0_15 = arith.constant 0 : index
    %18 = vector.load %arg8[%c0_14, %c0_15] : memref<4x32xf32, #tpu.memory_space<vmem>>, vector<4x32xf32>
    %cst_16 = arith.constant dense<0.000000e+00> : vector<128x32xf32>
    %19 = tpu.matmul %17, %18, %cst_16 {dimension_numbers = #tpu.dot_dimension_numbers<[1], [0], [0], [1], [0, 0, 1, 1], [], []>} : vector<128x4xf32>, vector<4x32xf32>, vector<128x32xf32> -> vector<128x32xf32>
    %c0_17 = arith.constant 0 : index
    %c0_18 = arith.constant 0 : index
    %20 = vector.load %arg9[%c0_17, %c0_18] : memref<1x32xf32, #tpu.memory_space<vmem>>, vector<1x32xf32>
    %21 = vector.broadcast %20 : vector<1x32xf32> to vector<128x32xf32>
    %22 = arith.addf %19, %21 : vector<128x32xf32>
    %cst_19 = arith.constant 0.000000e+00 : f32
    %23 = vector.broadcast %cst_19 : f32 to vector<128x32xf32>
    %24 = arith.maximumf %22, %23 : vector<128x32xf32>
    %25 = arith.truncf %24 : vector<128x32xf32> to vector<128x32xbf16>
    %c0_20 = arith.constant 0 : index
    %c0_21 = arith.constant 0 : index
    %26 = vector.load %arg10[%c0_20, %c0_21] : memref<32x256xbf16, #tpu.memory_space<vmem>>, vector<32x256xbf16>
    %cst_22 = arith.constant dense<0.000000e+00> : vector<128x256xf32>
    %27 = tpu.matmul %25, %26, %cst_22 {dimension_numbers = #tpu.dot_dimension_numbers<[1], [0], [0], [1], [0, 0, 1, 1], [], []>} : vector<128x32xbf16>, vector<32x256xbf16>, vector<128x256xf32> -> vector<128x256xf32>
    %c0_23 = arith.constant 0 : index
    %c0_24 = arith.constant 0 : index
    %28 = vector.load %arg11[%c0_23, %c0_24] : memref<1x256xf32, #tpu.memory_space<vmem>>, vector<1x256xf32>
    %29 = vector.broadcast %28 : vector<1x256xf32> to vector<128x256xf32>
    %30 = arith.addf %27, %29 : vector<128x256xf32>
    %cst_25 = arith.constant 0.000000e+00 : f32
    %31 = vector.broadcast %cst_25 : f32 to vector<128x256xf32>
    %32 = arith.maximumf %30, %31 : vector<128x256xf32>
    %33 = arith.truncf %32 : vector<128x256xf32> to vector<128x256xbf16>
    %c0_26 = arith.constant 0 : index
    %c0_27 = arith.constant 0 : index
    %34 = vector.load %arg3[%c0_26, %c0_27] : memref<128x1024xbf16, #tpu.memory_space<vmem>>, vector<128x1024xbf16>
    %c0_28 = arith.constant 0 : index
    %c0_29 = arith.constant 0 : index
    %35 = vector.load %arg12[%c0_28, %c0_29] : memref<1024x512xbf16, #tpu.memory_space<vmem>>, vector<1024x512xbf16>
    %cst_30 = arith.constant dense<0.000000e+00> : vector<128x512xf32>
    %36 = tpu.matmul %34, %35, %cst_30 {dimension_numbers = #tpu.dot_dimension_numbers<[1], [0], [0], [1], [0, 0, 1, 1], [], []>} : vector<128x1024xbf16>, vector<1024x512xbf16>, vector<128x512xf32> -> vector<128x512xf32>
    %c0_31 = arith.constant 0 : index
    %c0_32 = arith.constant 0 : index
    %37 = vector.load %arg13[%c0_31, %c0_32] : memref<1x512xf32, #tpu.memory_space<vmem>>, vector<1x512xf32>
    %38 = vector.broadcast %37 : vector<1x512xf32> to vector<128x512xf32>
    %39 = arith.addf %36, %38 : vector<128x512xf32>
    %cst_33 = arith.constant 0.000000e+00 : f32
    %40 = vector.broadcast %cst_33 : f32 to vector<128x512xf32>
    %41 = arith.maximumf %39, %40 : vector<128x512xf32>
    %42 = arith.truncf %41 : vector<128x512xf32> to vector<128x512xbf16>
    %c0_34 = arith.constant 0 : index
    %c0_35 = arith.constant 0 : index
    %43 = vector.load %arg14[%c0_34, %c0_35] : memref<512x256xbf16, #tpu.memory_space<vmem>>, vector<512x256xbf16>
    %cst_36 = arith.constant dense<0.000000e+00> : vector<128x256xf32>
    %44 = tpu.matmul %42, %43, %cst_36 {dimension_numbers = #tpu.dot_dimension_numbers<[1], [0], [0], [1], [0, 0, 1, 1], [], []>} : vector<128x512xbf16>, vector<512x256xbf16>, vector<128x256xf32> -> vector<128x256xf32>
    %c0_37 = arith.constant 0 : index
    %c0_38 = arith.constant 0 : index
    %45 = vector.load %arg15[%c0_37, %c0_38] : memref<1x256xf32, #tpu.memory_space<vmem>>, vector<1x256xf32>
    %46 = vector.broadcast %45 : vector<1x256xf32> to vector<128x256xf32>
    %47 = arith.addf %44, %46 : vector<128x256xf32>
    %cst_39 = arith.constant 0.000000e+00 : f32
    %48 = vector.broadcast %cst_39 : f32 to vector<128x256xf32>
    %49 = arith.maximumf %47, %48 : vector<128x256xf32>
    %50 = arith.truncf %49 : vector<128x256xf32> to vector<128x256xbf16>
    %c0_40 = arith.constant 0 : index
    %c0_41 = arith.constant 0 : index
    %51 = vector.load %arg16[%c0_40, %c0_41] : memref<256x256xbf16, #tpu.memory_space<vmem>>, vector<256x256xbf16>
    %cst_42 = arith.constant dense<0.000000e+00> : vector<128x256xf32>
    %52 = tpu.matmul %16, %51, %cst_42 {dimension_numbers = #tpu.dot_dimension_numbers<[1], [0], [0], [1], [0, 0, 1, 1], [], []>} : vector<128x256xbf16>, vector<256x256xbf16>, vector<128x256xf32> -> vector<128x256xf32>
    %c0_43 = arith.constant 0 : index
    %c0_44 = arith.constant 0 : index
    %53 = vector.load %arg17[%c0_43, %c0_44] : memref<256x256xbf16, #tpu.memory_space<vmem>>, vector<256x256xbf16>
    %cst_45 = arith.constant dense<0.000000e+00> : vector<128x256xf32>
    %54 = tpu.matmul %33, %53, %cst_45 {dimension_numbers = #tpu.dot_dimension_numbers<[1], [0], [0], [1], [0, 0, 1, 1], [], []>} : vector<128x256xbf16>, vector<256x256xbf16>, vector<128x256xf32> -> vector<128x256xf32>
    %55 = arith.addf %52, %54 : vector<128x256xf32>
    %c0_46 = arith.constant 0 : index
    %c0_47 = arith.constant 0 : index
    %56 = vector.load %arg18[%c0_46, %c0_47] : memref<256x256xbf16, #tpu.memory_space<vmem>>, vector<256x256xbf16>
    %cst_48 = arith.constant dense<0.000000e+00> : vector<128x256xf32>
    %57 = tpu.matmul %50, %56, %cst_48 {dimension_numbers = #tpu.dot_dimension_numbers<[1], [0], [0], [1], [0, 0, 1, 1], [], []>} : vector<128x256xbf16>, vector<256x256xbf16>, vector<128x256xf32> -> vector<128x256xf32>
    %58 = arith.addf %55, %57 : vector<128x256xf32>
    %c0_49 = arith.constant 0 : index
    %c0_50 = arith.constant 0 : index
    %59 = vector.load %arg19[%c0_49, %c0_50] : memref<1x256xf32, #tpu.memory_space<vmem>>, vector<1x256xf32>
    %60 = vector.broadcast %59 : vector<1x256xf32> to vector<128x256xf32>
    %61 = arith.addf %58, %60 : vector<128x256xf32>
    %cst_51 = arith.constant 0.000000e+00 : f32
    %62 = vector.broadcast %cst_51 : f32 to vector<128x256xf32>
    %63 = arith.maximumf %61, %62 : vector<128x256xf32>
    %c0_52 = arith.constant 0 : index
    %c0_53 = arith.constant 0 : index
    %64 = vector.load %arg20[%c0_52, %c0_53] : memref<128x256xf32, #tpu.memory_space<vmem>>, vector<128x256xf32>
    tpu.vector_store %arg20[%c0_52, %c0_53], %63 {strides = array<i32>} : memref<128x256xf32, #tpu.memory_space<vmem>>, vector<128x256xf32>,
    return
  }
  func.func @transform_0(%arg0: i32) -> (i32, i32) {
    %c0_i32 = arith.constant 0 : i32
    %c0_i32_0 = arith.constant 0 : i32
    return %arg0, %c0_i32 : i32, i32
  }
  func.func @transform_1(%arg0: i32) -> (i32, i32) {
    %c0_i32 = arith.constant 0 : i32
    %c0_i32_0 = arith.constant 0 : i32
    return %arg0, %c0_i32 : i32, i32
  }
  func.func @transform_2(%arg0: i32) -> (i32, i32) {
    %c0_i32 = arith.constant 0 : i32
    %c0_i32_0 = arith.constant 0 : i32
    return %arg0, %c0_i32 : i32, i32
  }
  func.func @transform_3(%arg0: i32) -> (i32, i32) {
    %c0_i32 = arith.constant 0 : i32
    %c0_i32_0 = arith.constant 0 : i32
    %c0_i32_1 = arith.constant 0 : i32
    return %c0_i32, %c0_i32_0 : i32, i32
  }
  func.func @transform_4(%arg0: i32) -> (i32, i32) {
    %c0_i32 = arith.constant 0 : i32
    %c0_i32_0 = arith.constant 0 : i32
    %c0_i32_1 = arith.constant 0 : i32
    return %c0_i32, %c0_i32_0 : i32, i32
  }
  func.func @transform_5(%arg0: i32) -> (i32, i32) {
    %c0_i32 = arith.constant 0 : i32
    %c0_i32_0 = arith.constant 0 : i32
    %c0_i32_1 = arith.constant 0 : i32
    return %c0_i32, %c0_i32_0 : i32, i32
  }
  func.func @transform_6(%arg0: i32) -> (i32, i32) {
    %c0_i32 = arith.constant 0 : i32
    %c0_i32_0 = arith.constant 0 : i32
    %c0_i32_1 = arith.constant 0 : i32
    return %c0_i32, %c0_i32_0 : i32, i32
  }
  func.func @transform_7(%arg0: i32) -> (i32, i32) {
    %c0_i32 = arith.constant 0 : i32
    %c0_i32_0 = arith.constant 0 : i32
    %c0_i32_1 = arith.constant 0 : i32
    return %c0_i32, %c0_i32_0 : i32, i32
  }
  func.func @transform_8(%arg0: i32) -> (i32, i32) {
    %c0_i32 = arith.constant 0 : i32
    %c0_i32_0 = arith.constant 0 : i32
    %c0_i32_1 = arith.constant 0 : i32
    return %c0_i32, %c0_i32_0 : i32, i32
  }
  func.func @transform_9(%arg0: i32) -> (i32, i32) {
    %c0_i32 = arith.constant 0 : i32
    %c0_i32_0 = arith.constant 0 : i32
    %c0_i32_1 = arith.constant 0 : i32
    return %c0_i32, %c0_i32_0 : i32, i32
  }
  func.func @transform_10(%arg0: i32) -> (i32, i32) {
    %c0_i32 = arith.constant 0 : i32
    %c0_i32_0 = arith.constant 0 : i32
    %c0_i32_1 = arith.constant 0 : i32
    return %c0_i32, %c0_i32_0 : i32, i32
  }
  func.func @transform_11(%arg0: i32) -> (i32, i32) {
    %c0_i32 = arith.constant 0 : i32
    %c0_i32_0 = arith.constant 0 : i32
    %c0_i32_1 = arith.constant 0 : i32
    return %c0_i32, %c0_i32_0 : i32, i32
  }
  func.func @transform_12(%arg0: i32) -> (i32, i32) {
    %c0_i32 = arith.constant 0 : i32
    %c0_i32_0 = arith.constant 0 : i32
    %c0_i32_1 = arith.constant 0 : i32
    return %c0_i32, %c0_i32_0 : i32, i32
  }
  func.func @transform_13(%arg0: i32) -> (i32, i32) {
    %c0_i32 = arith.constant 0 : i32
    %c0_i32_0 = arith.constant 0 : i32
    %c0_i32_1 = arith.constant 0 : i32
    return %c0_i32, %c0_i32_0 : i32, i32
  }
  func.func @transform_14(%arg0: i32) -> (i32, i32) {
    %c0_i32 = arith.constant 0 : i32
    %c0_i32_0 = arith.constant 0 : i32
    %c0_i32_1 = arith.constant 0 : i32
    return %c0_i32, %c0_i32_0 : i32, i32
  }
  func.func @transform_15(%arg0: i32) -> (i32, i32) {
    %c0_i32 = arith.constant 0 : i32
    %c0_i32_0 = arith.constant 0 : i32
    %c0_i32_1 = arith.constant 0 : i32
    return %c0_i32, %c0_i32_0 : i32, i32
  }
  func.func @transform_16(%arg0: i32) -> (i32, i32) {
    %c0_i32 = arith.constant 0 : i32
    %c0_i32_0 = arith.constant 0 : i32
    %c0_i32_1 = arith.constant 0 : i32
    return %c0_i32, %c0_i32_0 : i32, i32
  }
  func.func @transform_17(%arg0: i32) -> (i32, i32) {
    %c0_i32 = arith.constant 0 : i32
    %c0_i32_0 = arith.constant 0 : i32
    %c0_i32_1 = arith.constant 0 : i32
    return %c0_i32, %c0_i32_0 : i32, i32
  }
  func.func @transform_18(%arg0: i32) -> (i32, i32) {
    %c0_i32 = arith.constant 0 : i32
    %c0_i32_0 = arith.constant 0 : i32
    %c0_i32_1 = arith.constant 0 : i32
    return %c0_i32, %c0_i32_0 : i32, i32
  }
  func.func @transform_19(%arg0: i32) -> (i32, i32) {
    %c0_i32 = arith.constant 0 : i32
    %c0_i32_0 = arith.constant 0 : i32
    return %arg0, %c0_i32 : i32, i32
  }
}

</mosaic_0001>

<bundles_post_ra>
// kernel: instance_head_pallas.1
= control target key start
LH: loop header
LB: loop body
LE: loop exit
PB: predicated region body
PF: predicated region fallthrough
CT: control target
= control target key end

     0   :  { %s12546_s0 = inlined_call_operand.vmem [shape: bf16[128,300], index: 0, kind: input, shape index: {}]   ;;  %s12547_s1 = inlined_call_operand.vmem [shape: f32[128,4], index: 1, kind: input, shape index: {}]   ;;  %s12548_s2 = inlined_call_operand.vmem [shape: bf16[128,1024], index: 2, kind: input, shape index: {}]   ;;  %s12549_s3 = inlined_call_operand.vmem [shape: bf16[300,512], index: 3, kind: input, shape index: {}]   ;;  %s12550_s4 = inlined_call_operand.vmem [shape: f32[1,512], index: 4, kind: input, shape index: {}]   ;;  %s12551_s5 = inlined_call_operand.vmem [shape: bf16[512,256], index: 5, kind: input, shape index: {}]   ;;  %s12552_s6 = inlined_call_operand.vmem [shape: f32[1,256], index: 6, kind: input, shape index: {}]   ;;  %s12553_s7 = inlined_call_operand.vmem [shape: f32[4,32], index: 7, kind: input, shape index: {}]   ;;  %s12554_s8 = inlined_call_operand.vmem [shape: f32[1,32], index: 8, kind: input, shape index: {}]   ;;  %s12555_s9 = inlined_call_operand.vmem [shape: bf16[32,256], index: 9, kind: input, shape index: {}]   ;;  %s12556_s10 = inlined_call_operand.vmem [shape: f32[1,256], index: 10, kind: input, shape index: {}]   ;;  %s12557_s11 = inlined_call_operand.vmem [shape: bf16[1024,512], index: 11, kind: input, shape index: {}]   ;;  %s12558_s12 = inlined_call_operand.vmem [shape: f32[1,512], index: 12, kind: input, shape index: {}]   ;;  %s12559_s13 = inlined_call_operand.vmem [shape: bf16[512,256], index: 13, kind: input, shape index: {}]   ;;  %s12560_s14 = inlined_call_operand.vmem [shape: f32[1,256], index: 14, kind: input, shape index: {}]   ;;  %s12561_s15 = inlined_call_operand.vmem [shape: bf16[256,256], index: 15, kind: input, shape index: {}]   ;;  %s12562_s16 = inlined_call_operand.vmem [shape: bf16[256,256], index: 16, kind: input, shape index: {}]   ;;  %s12563_s17 = inlined_call_operand.vmem [shape: bf16[256,256], index: 17, kind: input, shape index: {}]   ;;  %s12564_s18 = inlined_call_operand.vmem [shape: f32[1,256], index: 18, kind: input, shape index: {}]   ;;  %s12565_s19 = inlined_call_operand.hbm [shape: f32[128,256], index: 19, kind: output, shape index: {}]  }
   0x1   :  { %12571 = sst [smem:[#allocation5_spill]] %s12546_s0 }
   0x2   :  { %12572 = sst [smem:[#allocation6_spill]] %s12547_s1 }
   0x3   :  { %12573 = sst [smem:[#allocation7_spill]] %s12548_s2 }
   0x4   :  { %12574 = sst [smem:[#allocation8_spill]] %s12549_s3 }
   0x5   :  { %s12575_s20 = sld [smem:[#allocation8_spill]]  ;;  %v9344_v2 = vmov 0   ;;  %vm715_vm0 = vcmask 1045504   ;;  %s12576_s0 = sld [smem:[#allocation5_spill]]  ;;  %vm690_vm1 = vcmask 359424   ;;  %vm2019_vm2 = vcmask 1043456  }
   0x6   :  { %873 = vmatprep.mubr.bf16.mxu1 %v9344_v2  ;;  %s12577_s22 = sld [smem:[#allocation6_spill]]  ;;  %vm1970_vm3 = vcmask 31744  }
   0xb   :  { %v8444_v0 = vld [vmem:[%s12575_s20 + $0x4] ss:$16 sps:$4 sm:$0xff]   ;;  %v8448_v3 = vld [vmem:[%s12575_s20] ss:$16 sps:$4 sm:$0xff]   ;;  %v8465_v16 = vld [vmem:[%s12575_s20 + $0x8] ss:$16 sps:$4 sm:$0xff]  }
   0xc   :  { %v8446_v1 = vld [vmem:[%s12575_s20 + $0x204] ss:$16 sps:$4 sm:$0xff]   ;;  %728 = vmatprep.subr.bf16.mxu0 %v8444_v0  ;;  %v8449_v4 = vld [vmem:[%s12575_s20 + $0x200] ss:$16 sps:$4 sm:$0xff]   ;;  %v8467_v17 = vld [vmem:[%s12575_s20 + $0xc] ss:$16 sps:$4 sm:$0xff]  }
   0xd   :  { %841 = vmatprep.subr.bf16.mxu1 %v8446_v1  ;;  %v8450_v5 = vld [vmem:[%s12575_s20 + $0x24] ss:$16 sps:$4 sm:$0xff]   ;;  %729 = vmatpush1.bf16.msra.mxu0 %v8448_v3  ;;  %v8454_v7 = vld [vmem:[%s12575_s20 + $0x20] ss:$16 sps:$4 sm:$0xff]   ;;  %v8473_v20 = vld [vmem:[%s12575_s20 + $0x2c] ss:$16 sps:$4 sm:$0xff]  }
   0xe   :  { %842 = vmatpush1.bf16.msra.mxu1 %v8449_v4  ;;  %v8452_v6 = vld [vmem:[%s12575_s20 + $0x224] ss:$16 sps:$4 sm:$0xff]   ;;  %730 = vmatprep.subr.bf16.mxu0 %v8450_v5  ;;  %v8455_v8 = vld [vmem:[%s12575_s20 + $0x220] ss:$16 sps:$4 sm:$0xff]   ;;  %v8471_v21 = vld [vmem:[%s12575_s20 + $0x28] ss:$16 sps:$4 sm:$0xff]  }
   0xf   :  { %843 = vmatprep.subr.bf16.mxu1 %v8452_v6  ;;  %v8456_v9 = vld [vmem:[%s12575_s20 + $0x44] ss:$16 sps:$4 sm:$0xff]   ;;  %v8460_v11 = vld [vmem:[%s12575_s20 + $0x40] ss:$16 sps:$4 sm:$0xff]   ;;  %v8480_v24 = vld [vmem:[%s12575_s20 + $0x4c] ss:$16 sps:$4 sm:$0xff]  }
  0x10   :  { %v8458_v10 = vld [vmem:[%s12575_s20 + $0x244] ss:$16 sps:$4 sm:$0x3f]   ;;  %v8461_v12 = vld [vmem:[%s12575_s20 + $0x240] ss:$16 sps:$4 sm:$0x3f]  }
  0x11   :  { %731 = vmatpush1.bf16.msra.mxu0 %v8454_v7  ;;  %v8462_v13 = vld [vmem:[%s12575_s20 + $0x64] ss:$16 sps:$4 sm:$0xff]   ;;  %v717_v14 = vsel %vm715_vm0, %v8461_v12, 0  ;;  %v8468_v18 = vld [vmem:[%s12575_s20 + $0x60] ss:$16 sps:$4 sm:$0xff]  }
  0x12   :  { %844 = vmatpush1.bf16.msra.mxu1 %v8455_v8  ;;  %732 = vmatprep.subr.bf16.mxu0 %v8456_v9  ;;  %v8464_v15 = vld [vmem:[%s12576_s0 + $0x8] ss:$12 sps:$4 sm:$0xff]   ;;  %v8474_v22 = vld [vmem:[%s12575_s20 + $0x80] ss:$16 sps:$4 sm:$0xff]   ;;  %v8486_v29 = vld [vmem:[%s12575_s20 + $0x6c] ss:$16 sps:$4 sm:$0xff]  }
  0x13   :  { %7197 = vmatprep.subr.msk.bf16.mxu1 %vm715_vm0, %v8458_v10  ;;  %v8469_v19 = vld [vmem:[%s12575_s20 + $0x84] ss:$16 sps:$4 sm:$0xff]   ;;  %v8477_v25 = vld [vmem:[%s12576_s0 + $0x20] ss:$12 sps:$4 sm:$0xff]   ;;  %v8478_v26 = vld [vmem:[%s12575_s20 + $0x48] ss:$16 sps:$4 sm:$0xff]  }
  0x14   :  { %v8475_v23 = vld [vmem:[%s12575_s20 + $0xa4] ss:$16 sps:$4 sm:$0xff]   ;;  %v8481_v27 = vld [vmem:[%s12575_s20 + $0xa0] ss:$16 sps:$4 sm:$0xff]   ;;  %v8484_v30 = vld [vmem:[%s12575_s20 + $0x68] ss:$16 sps:$4 sm:$0xff]  }
  0x15   :  { %733 = vmatpush1.bf16.msra.mxu0 %v8460_v11  ;;  %v8482_v28 = vld [vmem:[%s12575_s20 + $0xc4] ss:$16 sps:$4 sm:$0xff]   ;;  %v8487_v31 = vld [vmem:[%s12575_s20 + $0xc0] ss:$16 sps:$4 sm:$0xff]   ;;  %v8493_v33 = vld [vmem:[%s12575_s20 + $0x8c] ss:$16 sps:$4 sm:$0xff]  }
  0x16   :  { %846 = vmatpush1.bf16.msra.mxu1 %v717_v14  ;;  %734 = vmatprep.subr.bf16.mxu0 %v8462_v13  ;;  %v8488_v32 = vld [vmem:[%s12575_s20 + $0xe4] ss:$16 sps:$4 sm:$0xff]   ;;  %v8491_v35 = vld [vmem:[%s12575_s20 + $0x88] ss:$16 sps:$4 sm:$0xff]   ;;  %v8494_v36 = vld [vmem:[%s12575_s20 + $0xe0] ss:$16 sps:$4 sm:$0xff]  }
  0x17   :  { %954 = vmatprep.subr.bf16.mxu1 %v8467_v17  ;;  %v8490_v34 = vld [vmem:[%s12576_s0 + $0x38] ss:$12 sps:$4 sm:$0xff]   ;;  %v8499_v38 = vld [vmem:[%s12575_s20 + $0xac] ss:$16 sps:$4 sm:$0xff]   ;;  %v8500_v40 = vld [vmem:[%s12575_s20 + $0x100] ss:$16 sps:$4 sm:$0xff]  }
  0x18   :  { %v8495_v37 = vld [vmem:[%s12575_s20 + $0x104] ss:$16 sps:$4 sm:$0xff]   ;;  %v8497_v39 = vld [vmem:[%s12575_s20 + $0xa8] ss:$16 sps:$4 sm:$0xff]   ;;  %v8506_v42 = vld [vmem:[%s12575_s20 + $0xcc] ss:$16 sps:$4 sm:$0xff]  }
  0x19   :  { %7198 = vmatmul.mubr.msk.bf16.vlgmr.msra.gmra.mrb[0].mxu1 %vm690_vm1, %v8464_v15  ;;  %735 = vmatpush1.bf16.msra.mxu0 %v8468_v18  ;;  %v8501_v41 = vld [vmem:[%s12575_s20 + $0x124] ss:$16 sps:$4 sm:$0xff]   ;;  %v8503_v43 = vld [vmem:[%s12576_s0 + $0x50] ss:$12 sps:$4 sm:$0xff]   ;;  %v8504_v44 = vld [vmem:[%s12575_s20 + $0xc8] ss:$16 sps:$4 sm:$0xff]  }
  0x1a   :  { %955 = vmatpush1.bf16.msra.mxu1 %v8465_v16  ;;  %736 = vmatprep.subr.bf16.mxu0 %v8469_v19  ;;  %v8507_v45 = vld [vmem:[%s12575_s20 + $0x120] ss:$16 sps:$4 sm:$0xff]   ;;  %v8508_v46 = vld [vmem:[%s12575_s20 + $0x144] ss:$16 sps:$4 sm:$0xff]   ;;  %v8512_v47 = vld [vmem:[%s12575_s20 + $0xec] ss:$16 sps:$4 sm:$0xff]  }
  0x1b   :  { %956 = vmatprep.subr.bf16.mxu1 %v8473_v20  ;;  %883 = vmatprep.mubr.bf16.mxu1 %v9344_v2  ;;  %v8510_v48 = vld [vmem:[%s12575_s20 + $0xe8] ss:$16 sps:$4 sm:$0xff]   ;;  %v8513_v49 = vld [vmem:[%s12575_s20 + $0x140] ss:$16 sps:$4 sm:$0xff]   ;;  %v8514_v50 = vld [vmem:[%s12575_s20 + $0x164] ss:$16 sps:$4 sm:$0xff]  }
  0x1c   :  { %v8519_v51 = vld [vmem:[%s12575_s20 + $0x10c] ss:$16 sps:$4 sm:$0xff]   ;;  %v9612_v52 = vld [vmem:[%s12576_s0 + $0x68] ss:$12 sps:$4 sm:$0xff]   ;;  %v8520_v54 = vld [vmem:[%s12575_s20 + $0x160] ss:$16 sps:$4 sm:$0xff]  }
  0x1d   :  { %737 = vmatpush1.bf16.msra.mxu0 %v8474_v22  ;;  %v8517_v53 = vld [vmem:[%s12575_s20 + $0x108] ss:$16 sps:$4 sm:$0xff]   ;;  %v8521_v55 = vld [vmem:[%s12575_s20 + $0x184] ss:$16 sps:$4 sm:$0xff]   ;;  %v8525_v56 = vld [vmem:[%s12575_s20 + $0x12c] ss:$16 sps:$4 sm:$0xff]  }
  0x1e   :  { %957 = vmatpush1.bf16.msra.mxu1 %v8471_v21  ;;  %738 = vmatprep.subr.bf16.mxu0 %v8475_v23  ;;  %v8523_v57 = vld [vmem:[%s12575_s20 + $0x128] ss:$16 sps:$4 sm:$0xff]   ;;  %v8526_v58 = vld [vmem:[%s12575_s20 + $0x180] ss:$16 sps:$4 sm:$0xff]   ;;  %v8527_v59 = vld [vmem:[%s12575_s20 + $0x1a4] ss:$16 sps:$4 sm:$0xff]  }
  0x1f   :  { %958 = vmatprep.subr.bf16.mxu1 %v8480_v24  ;;  %v9640_v60 = vld [vmem:[%s12576_s0 + $0x80] ss:$12 sps:$4 sm:$0xff]   ;;  %v8530_v62 = vld [vmem:[%s12575_s20 + $0x148] ss:$16 sps:$4 sm:$0xff]   ;;  %v8549_v63 = vld [vmem:[%s12576_s0 + $0x4] ss:$12 sps:$4 sm:$0xff]  }
  0x20   :  { %v8532_v61 = vld [vmem:[%s12575_s20 + $0x14c] ss:$16 sps:$4 sm:$0xff]   ;;  %v8533_v0 = vld [vmem:[%s12575_s20 + $0x1a0] ss:$16 sps:$4 sm:$0xff]   ;;  %v8534_v1 = vld [vmem:[%s12575_s20 + $0x1c4] ss:$16 sps:$4 sm:$0xff]   ;;  %760 = vmatprep.mubr.bf16.mxu0 %v8549_v63 }
  0x21   :  { %7199 = vmatmul.mubr.msk.bf16.gmra.mrb[4].mxu1 %vm690_vm1, %v8477_v25  ;;  %739 = vmatpush1.bf16.msra.mxu0 %v8481_v27  ;;  %v8538_v3 = vld [vmem:[%s12575_s20 + $0x16c] ss:$16 sps:$4 sm:$0xff]   ;;  %v8536_v4 = vld [vmem:[%s12575_s20 + $0x168] ss:$16 sps:$4 sm:$0xff]   ;;  %v8539_v5 = vld [vmem:[%s12575_s20 + $0x1c0] ss:$16 sps:$4 sm:$0xff]  }
  0x22   :  { %959 = vmatpush1.bf16.msra.mxu1 %v8478_v26  ;;  %740 = vmatprep.subr.bf16.mxu0 %v8482_v28  ;;  %v8540_v6 = vld [vmem:[%s12575_s20 + $0x1e4] ss:$16 sps:$4 sm:$0xff]   ;;  %v8545_v7 = vld [vmem:[%s12575_s20 + $0x18c] ss:$16 sps:$4 sm:$0xff]   ;;  %v8543_v9 = vld [vmem:[%s12575_s20 + $0x188] ss:$16 sps:$4 sm:$0xff]  }
  0x23   :  { %960 = vmatprep.subr.bf16.mxu1 %v8486_v29  ;;  %893 = vmatprep.mubr.bf16.mxu1 %v9344_v2  ;;  %v9679_v8 = vld [vmem:[%s12576_s0 + $0x98] ss:$12 sps:$4 sm:$0xff]   ;;  %v8546_v10 = vld [vmem:[%s12575_s20 + $0x1e0] ss:$16 sps:$4 sm:$0xff]   ;;  %v8552_v11 = vld [vmem:[%s12575_s20 + $0x1ac] ss:$16 sps:$4 sm:$0xff]  }
  0x24   :  { %v8547_v12 = vld [vmem:[%s12576_s0] ss:$12 sps:$4 sm:$0xff]   ;;  %v8550_v13 = vld [vmem:[%s12575_s20 + $0x1a8] ss:$16 sps:$4 sm:$0xff]   ;;  %v9708_v16 = vld [vmem:[%s12576_s0 + $0xb0] ss:$12 sps:$4 sm:$0xff]  }
  0x25   :  { %741 = vmatpush1.bf16.msra.mxu0 %v8487_v31  ;;  %v8557_v14 = vld [vmem:[%s12576_s0 + $0x1c] ss:$12 sps:$4 sm:$0xff]   ;;  %v8559_v18 = vld [vmem:[%s12576_s0 + $0x18] ss:$12 sps:$4 sm:$0xff]   ;;  %v8566_v22 = vld [vmem:[%s12576_s0 + $0x34] ss:$12 sps:$4 sm:$0xff]  }
  0x26   :  { %961 = vmatpush1.bf16.msra.mxu1 %v8484_v30  ;;  %742 = vmatprep.subr.bf16.mxu0 %v8488_v32  ;;  %v8556_v15 = vld [vmem:[%s12575_s20 + $0x1cc] ss:$16 sps:$4 sm:$0xff]   ;;  %v8554_v17 = vld [vmem:[%s12575_s20 + $0x1c8] ss:$16 sps:$4 sm:$0xff]   ;;  %v9754_v30 = vld [vmem:[%s12553_s7] sm:$0xf] }
  0x27   :  { %962 = vmatprep.subr.bf16.mxu1 %v8493_v33  ;;  %v8562_v19 = vld [vmem:[%s12575_s20 + $0x1ec] ss:$16 sps:$4 sm:$0xff]   ;;  %v8560_v20 = vld [vmem:[%s12575_s20 + $0x1e8] ss:$16 sps:$4 sm:$0xff]   ;;  %v8572_v33 = vld [vmem:[%s12576_s0 + $0x64] ss:$12 sps:$4 sm:$0xff]  }
  0x28   :  { %v8565_v21 = vld [vmem:[%s12575_s20 + $0x20c] ss:$16 sps:$4 sm:$0xff]   ;;  %v8563_v23 = vld [vmem:[%s12575_s20 + $0x208] ss:$16 sps:$4 sm:$0xff]  }
  0x29   :  { %7200 = vmatmul.mubr.msk.bf16.gmra.mrb[8].mxu1 %vm690_vm1, %v8490_v34  ;;  %743 = vmatpush1.bf16.msra.mxu0 %v8494_v36  ;;  %v8577_v24 = vld [vmem:[%s12575_s20 + $0x22c] ss:$16 sps:$4 sm:$0xff]   ;;  %v8575_v27 = vld [vmem:[%s12575_s20 + $0x228] ss:$16 sps:$4 sm:$0xff]  }
  0x2a   :  { %963 = vmatpush1.bf16.msra.mxu1 %v8491_v35  ;;  %744 = vmatprep.subr.bf16.mxu0 %v8495_v37  ;;  %v8568_v25 = vld [vmem:[%s12576_s0 + $0x30] ss:$12 sps:$4 sm:$0xff]   ;;  %v8569_v26 = vld [vmem:[%s12576_s0 + $0x4c] ss:$12 sps:$4 sm:$0xff]   ;;  %v8571_v31 = vld [vmem:[%s12576_s0 + $0x48] ss:$12 sps:$4 sm:$0xff]  }
  0x2b   :  { %964 = vmatprep.subr.bf16.mxu1 %v8499_v38  ;;  %903 = vmatprep.mubr.bf16.mxu1 %v9344_v2  ;;  %v8586_v28 = vld [vmem:[%s12575_s20 + $0x24c] ss:$16 sps:$4 sm:$0x3f]   ;;  %v8589_v29 = vld [vmem:[%s12575_s20 + $0x248] ss:$16 sps:$4 sm:$0x3f]  }
  0x2c   :  { %v723_v32 = vsel %vm715_vm0, %v8589_v29, 0  ;;  %v8574_v34 = vld [vmem:[%s12576_s0 + $0x60] ss:$12 sps:$4 sm:$0xff]   ;;  %v8578_v35 = vld [vmem:[%s12576_s0 + $0x7c] ss:$12 sps:$4 sm:$0xff]  }
  0x2d   :  { %745 = vmatpush1.bf16.msra.mxu0 %v8500_v40  ;;  %v8592_v36 = vld [vmem:[%s12551_s5 + $0x4] ss:$8 sps:$4 sm:$0xff]   ;;  %v8590_v37 = vld [vmem:[%s12551_s5] ss:$8 sps:$4 sm:$0xff]   ;;  %v8595_v40 = vld [vmem:[%s12551_s5 + $0x14] ss:$8 sps:$4 sm:$0xff]  }
  0x2e   :  { %965 = vmatpush1.bf16.msra.mxu1 %v8497_v39  ;;  %746 = vmatprep.subr.bf16.mxu0 %v8501_v41  ;;  %v8580_v38 = vld [vmem:[%s12576_s0 + $0x78] ss:$12 sps:$4 sm:$0xff]   ;;  %v8581_v41 = vld [vmem:[%s12576_s0 + $0x94] ss:$12 sps:$4 sm:$0xff]  }
  0x2f   :  { %966 = vmatprep.subr.bf16.mxu1 %v8506_v42  ;;  %v8593_v39 = vld [vmem:[%s12551_s5 + $0x10] ss:$8 sps:$4 sm:$0xff]   ;;  %v8598_v42 = vld [vmem:[%s12551_s5 + $0x24] ss:$8 sps:$4 sm:$0xff]  }
  0x31   :  { %7201 = vmatmul.mubr.msk.bf16.gmra.mrb[12].mxu1 %vm690_vm1, %v8503_v43  ;;  %747 = vmatpush1.bf16.msra.mxu0 %v8507_v45  ;;  %v8596_v43 = vld [vmem:[%s12551_s5 + $0x20] ss:$8 sps:$4 sm:$0xff]   ;;  %v8599_v45 = vld [vmem:[%s12551_s5 + $0x30] ss:$8 sps:$4 sm:$0xff]  }
  0x32   :  { %967 = vmatpush1.bf16.msra.mxu1 %v8504_v44  ;;  %748 = vmatprep.subr.bf16.mxu0 %v8508_v46  ;;  %v8583_v44 = vld [vmem:[%s12576_s0 + $0x90] ss:$12 sps:$4 sm:$0xff]  }
  0x33   :  { %968 = vmatprep.subr.bf16.mxu1 %v8512_v47  ;;  %913 = vmatprep.mubr.bf16.mxu1 %v9344_v2  ;;  %v8601_v46 = vld [vmem:[%s12551_s5 + $0x34] ss:$8 sps:$4 sm:$0xff]   ;;  %v8584_v47 = vld [vmem:[%s12576_s0 + $0xac] ss:$12 sps:$4 sm:$0xff]  }
  0x35   :  { %749 = vmatpush1.bf16.msra.mxu0 %v8513_v49  ;;  %v8602_v49 = vld [vmem:[%s12551_s5 + $0x40] ss:$8 sps:$4 sm:$0xff]  }
  0x36   :  { %969 = vmatpush1.bf16.msra.mxu1 %v8510_v48  ;;  %750 = vmatprep.subr.bf16.mxu0 %v8514_v50  ;;  %v8604_v48 = vld [vmem:[%s12551_s5 + $0x44] ss:$8 sps:$4 sm:$0xff]   ;;  %v8588_v50 = vld [vmem:[%s12576_s0 + $0xa8] ss:$12 sps:$4 sm:$0xff]  }
  0x37   :  { %970 = vmatprep.subr.bf16.mxu1 %v8519_v51  ;;  %v8605_v51 = vld [vmem:[%s12551_s5 + $0x50] ss:$8 sps:$4 sm:$0xff]  }
  0x39   :  { %7202 = vmatmul.mubr.msk.bf16.gmra.mrb[16].mxu1 %vm690_vm1, %v9612_v52  ;;  %751 = vmatpush1.bf16.msra.mxu0 %v8520_v54  ;;  %v8610_v54 = vld [vmem:[%s12551_s5 + $0x64] ss:$8 sps:$4 sm:$0xff]  }
  0x3a   :  { %971 = vmatpush1.bf16.msra.mxu1 %v8517_v53  ;;  %752 = vmatprep.subr.bf16.mxu0 %v8521_v55  ;;  %v8607_v53 = vld [vmem:[%s12551_s5 + $0x54] ss:$8 sps:$4 sm:$0xff]   ;;  %v8608_v55 = vld [vmem:[%s12551_s5 + $0x60] ss:$8 sps:$4 sm:$0xff]  }
  0x3b   :  { %972 = vmatprep.subr.bf16.mxu1 %v8525_v56  ;;  %923 = vmatprep.mubr.bf16.mxu1 %v9344_v2  ;;  %v8611_v56 = vld [vmem:[%s12551_s5 + $0x70] ss:$8 sps:$4 sm:$0xff]  }
  0x3d   :  { %753 = vmatpush1.bf16.msra.mxu0 %v8526_v58  ;;  %v8616_v58 = vld [vmem:[%s12551_s5 + $0x84] ss:$8 sps:$4 sm:$0xff]  }
  0x3e   :  { %973 = vmatpush1.bf16.msra.mxu1 %v8523_v57  ;;  %754 = vmatprep.subr.bf16.mxu0 %v8527_v59  ;;  %v8613_v57 = vld [vmem:[%s12551_s5 + $0x74] ss:$8 sps:$4 sm:$0xff]   ;;  %v8614_v59 = vld [vmem:[%s12551_s5 + $0x80] ss:$8 sps:$4 sm:$0xff]  }
  0x3f   :  { %974 = vmatprep.subr.bf16.mxu1 %v8532_v61  ;;  %v8617_v61 = vld [vmem:[%s12551_s5 + $0x90] ss:$8 sps:$4 sm:$0xff]  }
  0x41   :  { %7203 = vmatmul.mubr.msk.bf16.gmra.mrb[20].mxu1 %vm690_vm1, %v9640_v60  ;;  %755 = vmatpush1.bf16.msra.mxu0 %v8533_v0  ;;  %v8620_v0 = vld [vmem:[%s12551_s5 + $0xa0] ss:$8 sps:$4 sm:$0xff]  }
  0x42   :  { %975 = vmatpush1.bf16.msra.mxu1 %v8530_v62  ;;  %756 = vmatprep.subr.bf16.mxu0 %v8534_v1  ;;  %v8619_v62 = vld [vmem:[%s12551_s5 + $0x94] ss:$8 sps:$4 sm:$0xff]   ;;  %v8623_v1 = vld [vmem:[%s12551_s5 + $0xb0] ss:$8 sps:$4 sm:$0xff]  }
  0x43   :  { %976 = vmatprep.subr.bf16.mxu1 %v8538_v3  ;;  %933 = vmatprep.mubr.bf16.mxu1 %v9344_v2  ;;  %v8625_v3 = vld [vmem:[%s12551_s5 + $0xb4] ss:$8 sps:$4 sm:$0xff]  }
  0x45   :  { %757 = vmatpush1.bf16.msra.mxu0 %v8539_v5  ;;  %v8628_v5 = vld [vmem:[%s12551_s5 + $0xc4] ss:$8 sps:$4 sm:$0xff]  }
  0x46   :  { %977 = vmatpush1.bf16.msra.mxu1 %v8536_v4  ;;  %758 = vmatprep.subr.bf16.mxu0 %v8540_v6  ;;  %v9316_v4 = vld [vmem:[%s12576_s0 + $0x8] ss:$12 sps:$4 sm:$0xff]  }
  0x47   :  { %978 = vmatprep.subr.bf16.mxu1 %v8545_v7  ;;  %v8626_v6 = vld [vmem:[%s12551_s5 + $0xc0] ss:$8 sps:$4 sm:$0xff]   ;;  %v8631_v7 = vld [vmem:[%s12551_s5 + $0xd4] ss:$8 sps:$4 sm:$0xff]  }
  0x49   :  { %7204 = vmatmul.mubr.msk.bf16.gmra.mrb[24].mxu1 %vm690_vm1, %v9679_v8  ;;  %759 = vmatpush1.bf16.msra.mxu0 %v8546_v10  ;;  %v9317_v10 = vld [vmem:[%s12576_s0 + $0x20] ss:$12 sps:$4 sm:$0xff]  }
  0x4a   :  { %979 = vmatpush1.bf16.msra.mxu1 %v8543_v9  ;;  %943 = vmatprep.mubr.bf16.mxu1 %v9344_v2  ;;  %v8629_v9 = vld [vmem:[%s12551_s5 + $0xd0] ss:$8 sps:$4 sm:$0xff]  }
  0x4b   :  { %980 = vmatprep.subr.bf16.mxu1 %v8552_v11  ;;  %1672 = vmatprep.subr.bf16.mxu0 %v8592_v36  ;;  %v8634_v11 = vld [vmem:[%s12551_s5 + $0xe4] ss:$8 sps:$4 sm:$0xff]  }
  0x4c   :  { %761 = vmatmul.mubr.bf16.vlgmr.msra.gmra.mrb[0].mxu0 %v8547_v12 }
  0x4d   :  { %770 = vmatprep.mubr.bf16.mxu0 %v8557_v14  ;;  %1673 = vmatpush1.bf16.msra.mxu0 %v8590_v37 }
  0x4e   :  { %981 = vmatpush1.bf16.msra.mxu1 %v8550_v13  ;;  %1674 = vmatprep.subr.bf16.mxu0 %v8595_v40  ;;  %v8637_v13 = vld [vmem:[%s12551_s5 + $0xf4] ss:$8 sps:$4 sm:$0xff]  }
  0x4f   :  { %982 = vmatprep.subr.bf16.mxu1 %v8556_v15  ;;  %v9318_v15 = vld [vmem:[%s12576_s0 + $0x38] ss:$12 sps:$4 sm:$0xff]  }
  0x51   :  { %7205 = vmatmul.mubr.msk.bf16.gmra.mrb[28].mxu1 %vm690_vm1, %v9708_v16  ;;  %1675 = vmatpush1.bf16.msra.mxu0 %v8593_v39 }
  0x52   :  { %983 = vmatpush1.bf16.msra.mxu1 %v8554_v17  ;;  %986 = vmatprep.mubr.bf16.mxu1 %v8549_v63  ;;  %v8622_v63 = vld [vmem:[%s12551_s5 + $0xa4] ss:$8 sps:$4 sm:$0xff]   ;;  %v9319_v17 = vld [vmem:[%s12576_s0 + $0x50] ss:$12 sps:$4 sm:$0xff]  }
  0x53   :  { %984 = vmatprep.subr.bf16.mxu1 %v8562_v19  ;;  %1676 = vmatprep.subr.bf16.mxu0 %v8598_v42  ;;  %v1946_v19 = vld [vmem:[%s12577_s22] sm:$0xff] }
  0x54   :  { %771 = vmatmul.mubr.bf16.gmra.mrb[4].mxu0 %v8559_v18 }
  0x55   :  { %780 = vmatprep.mubr.bf16.mxu0 %v8566_v22  ;;  %1677 = vmatpush1.bf16.msra.mxu0 %v8596_v43 }
  0x56   :  { %985 = vmatpush1.bf16.msra.mxu1 %v8560_v20  ;;  %1678 = vmatprep.subr.bf16.mxu0 %v8601_v46  ;;  %v1951_v20 = vld [vmem:[%s12577_s22 + $0x28] sm:$0xff] }
  0x57   :  { %1067 = vmatprep.subr.bf16.mxu1 %v8565_v21  ;;  %v1952_v21 = vld [vmem:[%s12577_s22 + $0x30] sm:$0xff] }
  0x59   :  { %987 = vmatmul.mubr.bf16.vlgmr.msra.gmra.mrb[32].mxu1 %v8547_v12  ;;  %1679 = vmatpush1.bf16.msra.mxu0 %v8599_v45  ;;  %v8632_v12 = vld [vmem:[%s12551_s5 + $0xe0] ss:$8 sps:$4 sm:$0xff]  }
  0x5a   :  { %1068 = vmatpush1.bf16.msra.mxu1 %v8563_v23  ;;  %996 = vmatprep.mubr.bf16.mxu1 %v8557_v14  ;;  %v8635_v14 = vld [vmem:[%s12551_s5 + $0xf0] ss:$8 sps:$4 sm:$0xff]   ;;  %v1954_v23 = vld [vmem:[%s12577_s22 + $0x40] sm:$0xff] }
  0x5b   :  { %1069 = vmatprep.subr.bf16.mxu1 %v8577_v24  ;;  %1680 = vmatprep.subr.bf16.mxu0 %v8604_v48  ;;  %v1955_v24 = vld [vmem:[%s12577_s22 + $0x48] sm:$0xff] }
  0x5c   :  { %781 = vmatmul.mubr.bf16.gmra.mrb[8].mxu0 %v8568_v25 }
  0x5d   :  { %790 = vmatprep.mubr.bf16.mxu0 %v8569_v26  ;;  %1681 = vmatpush1.bf16.msra.mxu0 %v8602_v49 }
  0x5e   :  { %1070 = vmatpush1.bf16.msra.mxu1 %v8575_v27  ;;  %1682 = vmatprep.subr.bf16.mxu0 %v8607_v53  ;;  %v1958_v27 = vld [vmem:[%s12577_s22 + $0x60] sm:$0xff] }
  0x5f   :  { %7206 = vmatprep.subr.msk.bf16.mxu1 %vm715_vm0, %v8586_v28 }
  0x61   :  { %997 = vmatmul.mubr.bf16.gmra.mrb[36].mxu1 %v8559_v18  ;;  %1683 = vmatpush1.bf16.msra.mxu0 %v8605_v51  ;;  %v8640_v18 = vld [vmem:[%s12551_s5 + $0x104] ss:$8 sps:$4 sm:$0xff]  }
  0x62   :  { %1006 = vmatprep.mubr.bf16.mxu1 %v8566_v22  ;;  %1072 = vmatpush1.bf16.msra.mxu1 %v723_v32  ;;  %v1953_v22 = vld [vmem:[%s12577_s22 + $0x38] sm:$0xff]  ;;  %v1960_v32 = vld [vmem:[%s12577_s22 + $0x70] sm:$0xff] }
  0x63   :  { %7806 = vmatprep.subr.msk.mxu1 %vm2019_vm2, %v9754_v30  ;;  %1684 = vmatprep.subr.bf16.mxu0 %v8610_v54 }
  0x64   :  { %791 = vmatmul.mubr.bf16.gmra.mrb[12].mxu0 %v8571_v31 }
  0x65   :  { %800 = vmatprep.mubr.bf16.mxu0 %v8572_v33  ;;  %1685 = vmatpush1.bf16.msra.mxu0 %v8608_v55 }
  0x66   :  { %1686 = vmatprep.subr.bf16.mxu0 %v8613_v57 }
  0x69   :  { %1007 = vmatmul.mubr.bf16.gmra.mrb[40].mxu1 %v8568_v25  ;;  %1687 = vmatpush1.bf16.msra.mxu0 %v8611_v56  ;;  %v1956_v25 = vld [vmem:[%s12577_s22 + $0x50] sm:$0xff] }
  0x6a   :  { %1016 = vmatprep.mubr.bf16.mxu1 %v8569_v26  ;;  %1688 = vmatprep.subr.bf16.mxu0 %v8616_v58  ;;  %v1957_v26 = vld [vmem:[%s12577_s22 + $0x58] sm:$0xff] }
  0x6c   :  { %801 = vmatmul.mubr.bf16.gmra.mrb[16].mxu0 %v8574_v34 }
  0x6d   :  { %810 = vmatprep.mubr.bf16.mxu0 %v8578_v35  ;;  %1689 = vmatpush1.bf16.msra.mxu0 %v8614_v59 }
  0x6e   :  { %1690 = vmatprep.subr.bf16.mxu0 %v8619_v62 }
  0x71   :  { %1017 = vmatmul.mubr.bf16.gmra.mrb[44].mxu1 %v8571_v31  ;;  %1691 = vmatpush1.bf16.msra.mxu0 %v8617_v61 }
  0x72   :  { %1026 = vmatprep.mubr.bf16.mxu1 %v8572_v33  ;;  %1692 = vmatprep.subr.bf16.mxu0 %v8622_v63 }
  0x74   :  { %811 = vmatmul.mubr.bf16.gmra.mrb[20].mxu0 %v8580_v38 }
  0x75   :  { %820 = vmatprep.mubr.bf16.mxu0 %v8581_v41  ;;  %1693 = vmatpush1.bf16.msra.mxu0 %v8620_v0 }
  0x76   :  { %1694 = vmatprep.subr.bf16.mxu0 %v8625_v3 }
  0x79   :  { %1027 = vmatmul.mubr.bf16.gmra.mrb[48].mxu1 %v8574_v34  ;;  %1695 = vmatpush1.bf16.msra.mxu0 %v8623_v1  ;;  %v1961_v34 = vld [vmem:[%s12577_s22 + $0x78] sm:$0xff] }
  0x7a   :  { %1036 = vmatprep.mubr.bf16.mxu1 %v8578_v35  ;;  %1696 = vmatprep.subr.bf16.mxu0 %v8628_v5 }
  0x7c   :  { %821 = vmatmul.mubr.bf16.gmra.mrb[24].mxu0 %v8583_v44 }
  0x7d   :  { %830 = vmatprep.mubr.bf16.mxu0 %v8584_v47  ;;  %1697 = vmatpush1.bf16.msra.mxu0 %v8626_v6 }
  0x7e   :  { %1698 = vmatprep.subr.bf16.mxu0 %v8631_v7 }
  0x81   :  { %1037 = vmatmul.mubr.bf16.gmra.mrb[52].mxu1 %v8580_v38  ;;  %1699 = vmatpush1.bf16.msra.mxu0 %v8629_v9 }
  0x82   :  { %1046 = vmatprep.mubr.bf16.mxu1 %v8581_v41  ;;  %1700 = vmatprep.subr.bf16.mxu0 %v8634_v11 }
  0x84   :  { %831 = vmatmul.mubr.bf16.gmra.mrb[28].mxu0 %v8588_v50 }
  0x85   :  { %1701 = vmatpush1.bf16.msra.mxu0 %v8632_v12 }
  0x86   :  { %1702 = vmatprep.subr.bf16.mxu0 %v8637_v13 }
  0x89   :  { %1047 = vmatmul.mubr.bf16.gmra.mrb[56].mxu1 %v8583_v44  ;;  %1703 = vmatpush1.bf16.msra.mxu0 %v8635_v14 }
  0x8a   :  { %1056 = vmatprep.mubr.bf16.mxu1 %v8584_v47  ;;  %1785 = vmatprep.subr.bf16.mxu0 %v8640_v18 }
  0x91   :  { %1057 = vmatmul.mubr.bf16.gmra.mrb[60].mxu1 %v8588_v50 }
  0x92   :  { %1099 = vmatprep.mubr.bf16.mxu1 %v9344_v2 }
  0x99   :  { %7207 = vmatmul.mubr.msk.bf16.vlgmr.msra.gmra.mrb[32].mxu1 %vm690_vm1, %v9316_v4 }
  0x9a   :  { %7807 = vmatpush3.msk.msra.mxu1 %vm2019_vm2, %v9754_v30  ;;  %1109 = vmatprep.mubr.bf16.mxu1 %v9344_v2  ;;  %v1959_v30 = vld [vmem:[%s12577_s22 + $0x68] sm:$0xff] }
  0xa1   :  { %7208 = vmatmul.mubr.msk.bf16.gmra.mrb[36].mxu1 %vm690_vm1, %v9317_v10 }
  0xa2   :  { %1119 = vmatprep.mubr.bf16.mxu1 %v9344_v2 }
  0xa9   :  { %7209 = vmatmul.mubr.msk.bf16.gmra.mrb[40].mxu1 %vm690_vm1, %v9318_v15 }
  0xaa   :  { %1129 = vmatprep.mubr.bf16.mxu1 %v9344_v2 }
  0xb1   :  { %7210 = vmatmul.mubr.msk.bf16.gmra.mrb[44].mxu1 %vm690_vm1, %v9319_v17 }
  0xb2   :  { %1139 = vmatprep.mubr.bf16.mxu1 %v9344_v2 }
  0xb9   :  { %7211 = vmatmul.mubr.msk.bf16.gmra.mrb[48].mxu1 %vm690_vm1, %v9612_v52  ;;  %v1947_v52 = vld [vmem:[%s12577_s22 + $0x8] sm:$0xff] }
  0xba   :  { %1149 = vmatprep.mubr.bf16.mxu1 %v9344_v2 }
  0xc1   :  { %7212 = vmatmul.mubr.msk.bf16.gmra.mrb[52].mxu1 %vm690_vm1, %v9640_v60  ;;  %v1948_v60 = vld [vmem:[%s12577_s22 + $0x10] sm:$0xff] }
  0xc2   :  { %1159 = vmatprep.mubr.bf16.mxu1 %v9344_v2 }
  0xc9   :  { %7213 = vmatmul.mubr.msk.bf16.gmra.mrb[56].mxu1 %vm690_vm1, %v9679_v8  ;;  %v1949_v8 = vld [vmem:[%s12577_s22 + $0x18] sm:$0xff] }
  0xca   :  { %1169 = vmatprep.mubr.bf16.mxu1 %v9344_v2 }
  0xd1   :  { %7214 = vmatmul.mubr.msk.bf16.gmra.mrb[60].mxu1 %vm690_vm1, %v9708_v16  ;;  %v1950_v16 = vld [vmem:[%s12577_s22 + $0x20] sm:$0xff] }
  0xd2   :  { %7808 = vmatprep.mubr.msk.f32.mxu1 %vm1970_vm3, %v1946_v19 }
  0xd9   :  { %7809 = vmatmul.mubr.msk.f32.vlgmr.msra.gmra.mrb[64].mxu1 %vm1970_vm3, %v1947_v52 }
  0xda   :  { %7811 = vmatprep.mubr.msk.f32.mxu1 %vm1970_vm3, %v1948_v60 }
  0xdd   :  { %7812 = vmatmul.mubr.msk.f32.gmra.mrb[66].mxu1 %vm1970_vm3, %v1949_v8 }
  0xde   :  { %7814 = vmatprep.mubr.msk.f32.mxu1 %vm1970_vm3, %v1950_v16 }
  0xe1   :  { %7815 = vmatmul.mubr.msk.f32.gmra.mrb[68].mxu1 %vm1970_vm3, %v1951_v20 }
  0xe2   :  { %7817 = vmatprep.mubr.msk.f32.mxu1 %vm1970_vm3, %v1952_v21 }
  0xe5   :  { %7818 = vmatmul.mubr.msk.f32.gmra.mrb[70].mxu1 %vm1970_vm3, %v1953_v22 }
  0xe6   :  { %7820 = vmatprep.mubr.msk.f32.mxu1 %vm1970_vm3, %v1954_v23 }
  0xe9   :  { %7821 = vmatmul.mubr.msk.f32.gmra.mrb[72].mxu1 %vm1970_vm3, %v1955_v24 }
  0xea   :  { %7823 = vmatprep.mubr.msk.f32.mxu1 %vm1970_vm3, %v1956_v25 }
  0xec   :  { %v875_v28 = vpop.f32.mrb[0].mxu1 }
  0xed   :  { %v877_v29 = vpop.f32.mrb[1].mxu1  ;;  %7824 = vmatmul.mubr.msk.f32.gmra.mrb[74].mxu1 %vm1970_vm3, %v1957_v26 }
  0xee   :  { %v879_v31 = vpop.f32.mrb[2].mxu1  ;;  %7826 = vmatprep.mubr.msk.f32.mxu1 %vm1970_vm3, %v1958_v27 }
  0xef   :  { %v881_v33 = vpop.f32.mrb[3].mxu1 }
  0xf1   :  { %7827 = vmatmul.mubr.msk.f32.gmra.mrb[76].mxu1 %vm1970_vm3, %v1959_v30 }
  0xf2   :  { %7829 = vmatprep.mubr.msk.f32.mxu1 %vm1970_vm3, %v1960_v32 }
  0xf4   :  { %v9983_v35 = vpop.f32.mrb[4].mxu1 }
  0xf5   :  { %v9985_v36 = vpop.f32.mrb[5].mxu1  ;;  %7830 = vmatmul.mubr.msk.f32.gmra.mrb[78].mxu1 %vm1970_vm3, %v1961_v34 }
  0xf6   :  { %v9988_v37 = vpop.f32.mrb[6].mxu1  ;;  %2285 = vmatprep.mubr.bf16.mxu1 %v9344_v2 }
  0xf7   :  { %v9991_v38 = vpop.f32.mrb[7].mxu1 }
  0xfc   :  { %v9993_v39 = vpop.f32.mrb[8].mxu1 }
  0xfd   :  { %v9995_v40 = vpop.f32.mrb[9].mxu1 }
  0xfe   :  { %v9997_v41 = vpop.f32.mrb[10].mxu1 }
  0xff   :  { %v9999_v42 = vpop.f32.mrb[11].mxu1 }
 0x104   :  { %v10001_v43 = vpop.f32.mrb[12].mxu1 }
 0x105   :  { %v10003_v44 = vpop.f32.mrb[13].mxu1 }
 0x106   :  { %v10005_v45 = vpop.f32.mrb[14].mxu1 }
 0x107   :  { %v10007_v46 = vpop.f32.mrb[15].mxu1 }
 0x10c   :  { %v10009_v47 = vpop.f32.mrb[16].mxu1 }
 0x10d   :  { %v10011_v48 = vpop.f32.mrb[17].mxu1 }
 0x10e   :  { %v10013_v49 = vpop.f32.mrb[18].mxu1 }
 0x10f   :  { %v10015_v50 = vpop.f32.mrb[19].mxu1 }
 0x110   :  { %24 = vsyncpa [#allocation3], 0  ;;  %v174_v51 = vlaneseq  ;;  %v8710_v58 = vld [vmem:[%s12555_s9] ss:$8 sps:$4 sm:$0xff]   ;;  %v8712_v59 = vld [vmem:[%s12555_s9 + $0x4] ss:$8 sps:$4 sm:$0xff]  }
 0x111   :  { %2253 = vmatprep.subr.bf16.mxu1 %v8712_v59  ;;  %v10039_v62 = vld [vmem:[%s12550_s4] sm:$0xf]  ;;  %v8725_v23 = vld [vmem:[%s12555_s9 + $0x10] ss:$8 sps:$4 sm:$0xff]   ;;  %v8727_v24 = vld [vmem:[%s12555_s9 + $0x14] ss:$8 sps:$4 sm:$0xff]  }
 0x112   :  { %v10021_v55 = vshrl.u32 %v174_v51, 7  ;;  %2254 = vmatpush1.bf16.msra.mxu1 %v8710_v58  ;;  %v8638_v34 = vld [vmem:[%s12551_s5 + $0x100] ss:$8 sps:$4 sm:$0xff]   ;;  %s12578_s23 = sld [smem:[#allocation7_spill]]  ;;  %vm2228_vm4 = vcmask 261120  }
 0x113   :  { %2255 = vmatprep.subr.bf16.mxu1 %v8727_v24  ;;  %v8742_v24 = vld [vmem:[%s12557_s11 + $0x4] ss:$16 sps:$4 sm:$0xff]  }
 0x114   :  { %v10017_v53 = vpop.f32.mrb[20].mxu1  ;;  %v10034_v61 = vsub.s32 0, %v10021_v55  ;;  %v10042_v63 = vsub.s32 1, %v10021_v55 }
 0x115   :  { %v10019_v54 = vpop.f32.mrb[21].mxu1 }
 0x116   :  { %v10023_v56 = vpop.f32.mrb[22].mxu1  ;;  %v10050_v3 = vrot.slane %v10039_v62, %v10034_v61  ;;  %v10056_v5 = vrot.slane %v10039_v62, %v10042_v63  ;;  %2256 = vmatpush1.bf16.msra.mxu1 %v8725_v23  ;;  %v8644_v23 = vld [vmem:[%s12551_s5 + $0x120] ss:$8 sps:$4 sm:$0xff]  }
 0x117   :  { %v10025_v57 = vpop.f32.mrb[23].mxu1  ;;  %4356 = vmatprep.subr.bf16.mxu1 %v8742_v24 }
 0x11c   :  { %v10044_v0 = vpop.f32.mrb[24].mxu1 }
 0x11d   :  { %v10046_v1 = vpop.f32.mrb[25].mxu1 }
 0x11e   :  { %v10052_v4 = vpop.f32.mrb[26].mxu1 }
 0x11f   :  { %v10058_v6 = vpop.f32.mrb[27].mxu1  ;;  %v762_v7 = vpop.f32.mrb[0].mxu0 }
 0x120   :  { %v763_v9 = vadd.f32 %v762_v7, %v10050_v3  ;;  %v764_v10 = vpop.f32.mrb[1].mxu0  ;;  %v8643_v7 = vld [vmem:[%s12551_s5 + $0x114] ss:$8 sps:$4 sm:$0xff]  }
 0x121   :  { %v765_v11 = vadd.f32 %v764_v10, %v10056_v5  ;;  %v766_v12 = vpop.f32.mrb[2].mxu0 }
 0x122   :  { %v876_v13 = vadd.f32 %v875_v28, %v763_v9  ;;  %v767_v14 = vadd.f32 %v766_v12, %v10050_v3  ;;  %v768_v15 = vpop.f32.mrb[3].mxu0 }
 0x123   :  { %v878_v17 = vadd.f32 %v877_v29, %v765_v11  ;;  %v769_v18 = vadd.f32 %v768_v15, %v10056_v5 }
 0x124   :  { %v10064_v19 = vpop.f32.mrb[28].mxu1  ;;  %v880_v52 = vadd.f32 %v879_v31, %v767_v14  ;;  %v1180_v8 = vmax.f32 %v876_v13, 0.0 }
 0x125   :  { %v10066_v60 = vpop.f32.mrb[29].mxu1  ;;  %v882_v16 = vadd.f32 %v881_v33, %v769_v18  ;;  %v1181_v25 = vmax.f32 %v878_v17, 0.0 }
 0x126   :  { %v10068_v20 = vpop.f32.mrb[30].mxu1  ;;  %v1184_v21 = vmax.f32 %v880_v52, 0.0 }
 0x127   :  { %v10070_v22 = vpop.f32.mrb[31].mxu1  ;;  %v1185_v26 = vmax.f32 %v882_v16, 0.0  ;;  %v772_v27 = vpop.f32.mrb[4].mxu0 }
 0x128   :  { %v1244_v28 = vpack.c.bf16 %v1184_v21, %v1180_v8  ;;  %v773_v29 = vadd.f32 %v772_v27, %v10050_v3  ;;  %v774_v30 = vpop.f32.mrb[5].mxu0 }
 0x129   :  { %v775_v31 = vadd.f32 %v774_v30, %v10056_v5  ;;  %v776_v32 = vpop.f32.mrb[6].mxu0  ;;  %v1245_v33 = vpack.c.bf16 %v1185_v26, %v1181_v25 }
 0x12a   :  { %v886_v51 = vadd.f32 %v9983_v35, %v773_v29  ;;  %v777_v58 = vadd.f32 %v776_v32, %v10050_v3  ;;  %v778_v59 = vpop.f32.mrb[7].mxu0  ;;  %v8641_v35 = vld [vmem:[%s12551_s5 + $0x110] ss:$8 sps:$4 sm:$0xff]  }
 0x12b   :  { %v888_v9 = vadd.f32 %v9985_v36, %v775_v31  ;;  %v779_v10 = vadd.f32 %v778_v59, %v10056_v5  ;;  %1704 = vmatprep.mubr.bf16.mxu0 %v1245_v33  ;;  %v8646_v36 = vld [vmem:[%s12551_s5 + $0x124] ss:$8 sps:$4 sm:$0xff]  }
 0x12c   :  { %v890_v11 = vadd.f32 %v9988_v37, %v777_v58  ;;  %1705 = vmatmul.mubr.bf16.vlgmr.msra.gmra.mrb[32].mxu0 %v1244_v28  ;;  %v1188_v13 = vmax.f32 %v886_v51, 0.0  ;;  %v8649_v28 = vld [vmem:[%s12551_s5 + $0x134] ss:$8 sps:$4 sm:$0xff]  }
 0x12d   :  { %v892_v12 = vadd.f32 %v9991_v38, %v779_v10  ;;  %1786 = vmatpush1.bf16.msra.mxu0 %v8638_v34  ;;  %v1189_v15 = vmax.f32 %v888_v9, 0.0 }
 0x12e   :  { %v1192_v14 = vmax.f32 %v890_v11, 0.0  ;;  %1787 = vmatprep.subr.bf16.mxu0 %v8643_v7 }
 0x12f   :  { %v1193_v17 = vmax.f32 %v892_v12, 0.0  ;;  %v782_v18 = vpop.f32.mrb[8].mxu0  ;;  %v8650_v12 = vld [vmem:[%s12551_s5 + $0x140] ss:$8 sps:$4 sm:$0xff]  }
 0x130   :  { %v783_v37 = vadd.f32 %v782_v18, %v10050_v3  ;;  %v784_v52 = vpop.f32.mrb[9].mxu0  ;;  %v1248_v8 = vpack.c.bf16 %v1192_v14, %v1188_v13 }
 0x131   :  { %v785_v38 = vadd.f32 %v784_v52, %v10056_v5  ;;  %v786_v16 = vpop.f32.mrb[10].mxu0  ;;  %v1249_v21 = vpack.c.bf16 %v1193_v17, %v1189_v15  ;;  %1788 = vmatpush1.bf16.msra.mxu0 %v8641_v35 }
 0x132   :  { %v896_v25 = vadd.f32 %v9993_v39, %v783_v37  ;;  %v787_v26 = vadd.f32 %v786_v16, %v10050_v3  ;;  %v788_v27 = vpop.f32.mrb[11].mxu0  ;;  %1789 = vmatprep.subr.bf16.mxu0 %v8646_v36  ;;  %v8647_v39 = vld [vmem:[%s12551_s5 + $0x130] ss:$8 sps:$4 sm:$0xff]   ;;  %v8655_v36 = vld [vmem:[%s12551_s5 + $0x154] ss:$8 sps:$4 sm:$0xff]  }
 0x133   :  { %v898_v29 = vadd.f32 %v9995_v40, %v785_v38  ;;  %v789_v30 = vadd.f32 %v788_v27, %v10056_v5  ;;  %1714 = vmatprep.mubr.bf16.mxu0 %v1249_v21  ;;  %v8652_v40 = vld [vmem:[%s12551_s5 + $0x144] ss:$8 sps:$4 sm:$0xff]   ;;  %v8656_v27 = vld [vmem:[%s12551_s5 + $0x160] ss:$8 sps:$4 sm:$0xff]  }
 0x134   :  { %v900_v31 = vadd.f32 %v9997_v41, %v787_v26  ;;  %1715 = vmatmul.mubr.bf16.gmra.mrb[36].mxu0 %v1248_v8  ;;  %v1196_v33 = vmax.f32 %v896_v25, 0.0 }
 0x135   :  { %v902_v32 = vadd.f32 %v9999_v42, %v789_v30  ;;  %1790 = vmatpush1.bf16.msra.mxu0 %v8644_v23  ;;  %v1197_v51 = vmax.f32 %v898_v29, 0.0 }
 0x136   :  { %v1200_v34 = vmax.f32 %v900_v31, 0.0  ;;  %1791 = vmatprep.subr.bf16.mxu0 %v8649_v28  ;;  %v8661_v31 = vld [vmem:[%s12551_s5 + $0x174] ss:$8 sps:$4 sm:$0xff]  }
 0x137   :  { %v1201_v58 = vmax.f32 %v902_v32, 0.0  ;;  %v792_v59 = vpop.f32.mrb[12].mxu0 }
 0x138   :  { %v793_v41 = vadd.f32 %v792_v59, %v10050_v3  ;;  %v794_v7 = vpop.f32.mrb[13].mxu0  ;;  %v1252_v9 = vpack.c.bf16 %v1200_v34, %v1196_v33 }
 0x139   :  { %v795_v42 = vadd.f32 %v794_v7, %v10056_v5  ;;  %v796_v10 = vpop.f32.mrb[14].mxu0  ;;  %v1253_v11 = vpack.c.bf16 %v1201_v58, %v1197_v51  ;;  %1792 = vmatpush1.bf16.msra.mxu0 %v8647_v39 }
 0x13a   :  { %v906_v35 = vadd.f32 %v10001_v43, %v793_v41  ;;  %v797_v13 = vadd.f32 %v796_v10, %v10050_v3  ;;  %v798_v14 = vpop.f32.mrb[15].mxu0  ;;  %1793 = vmatprep.subr.bf16.mxu0 %v8652_v40  ;;  %v8653_v43 = vld [vmem:[%s12551_s5 + $0x150] ss:$8 sps:$4 sm:$0xff]  }
 0x13b   :  { %v908_v15 = vadd.f32 %v10003_v44, %v795_v42  ;;  %v799_v17 = vadd.f32 %v798_v14, %v10056_v5  ;;  %1724 = vmatprep.mubr.bf16.mxu0 %v1253_v11  ;;  %v8658_v44 = vld [vmem:[%s12551_s5 + $0x164] ss:$8 sps:$4 sm:$0xff]   ;;  %v8662_v11 = vld [vmem:[%s12551_s5 + $0x180] ss:$8 sps:$4 sm:$0xff]   ;;  %v8667_v14 = vld [vmem:[%s12551_s5 + $0x194] ss:$8 sps:$4 sm:$0xff]  }
 0x13c   :  { %v910_v18 = vadd.f32 %v10005_v45, %v797_v13  ;;  %1725 = vmatmul.mubr.bf16.gmra.mrb[40].mxu0 %v1252_v9  ;;  %v1204_v52 = vmax.f32 %v906_v35, 0.0 }
 0x13d   :  { %v912_v37 = vadd.f32 %v10007_v46, %v799_v17  ;;  %1794 = vmatpush1.bf16.msra.mxu0 %v8650_v12  ;;  %v1205_v38 = vmax.f32 %v908_v15, 0.0 }
 0x13e   :  { %v1208_v8 = vmax.f32 %v910_v18, 0.0  ;;  %1795 = vmatprep.subr.bf16.mxu0 %v8655_v36 }
 0x13f   :  { %v1209_v16 = vmax.f32 %v912_v37, 0.0  ;;  %v802_v21 = vpop.f32.mrb[16].mxu0 }
 0x140   :  { %v803_v45 = vadd.f32 %v802_v21, %v10050_v3  ;;  %v804_v23 = vpop.f32.mrb[17].mxu0  ;;  %v1256_v24 = vpack.c.bf16 %v1208_v8, %v1204_v52 }
 0x141   :  { %v805_v46 = vadd.f32 %v804_v23, %v10056_v5  ;;  %v806_v25 = vpop.f32.mrb[18].mxu0  ;;  %v1257_v26 = vpack.c.bf16 %v1209_v16, %v1205_v38  ;;  %1796 = vmatpush1.bf16.msra.mxu0 %v8653_v43  ;;  %v8668_v23 = vld [vmem:[%s12551_s5 + $0x1a0] ss:$8 sps:$4 sm:$0xff]  }
 0x142   :  { %v916_v28 = vadd.f32 %v10009_v47, %v803_v45  ;;  %v807_v29 = vadd.f32 %v806_v25, %v10050_v3  ;;  %v808_v30 = vpop.f32.mrb[19].mxu0  ;;  %1797 = vmatprep.subr.bf16.mxu0 %v8658_v44  ;;  %v8659_v47 = vld [vmem:[%s12551_s5 + $0x170] ss:$8 sps:$4 sm:$0xff]  }
 0x143   :  { %v918_v32 = vadd.f32 %v10011_v48, %v805_v46  ;;  %v809_v39 = vadd.f32 %v808_v30, %v10056_v5  ;;  %1734 = vmatprep.mubr.bf16.mxu0 %v1257_v26  ;;  %v8664_v48 = vld [vmem:[%s12551_s5 + $0x184] ss:$8 sps:$4 sm:$0xff]   ;;  %v8673_v26 = vld [vmem:[%s12551_s5 + $0x1b4] ss:$8 sps:$4 sm:$0xff]  }
 0x144   :  { %v920_v33 = vadd.f32 %v10013_v49, %v807_v29  ;;  %1735 = vmatmul.mubr.bf16.gmra.mrb[44].mxu0 %v1256_v24  ;;  %v1212_v40 = vmax.f32 %v916_v28, 0.0 }
 0x145   :  { %v922_v34 = vadd.f32 %v10015_v50, %v809_v39  ;;  %1798 = vmatpush1.bf16.msra.mxu0 %v8656_v27  ;;  %v1213_v58 = vmax.f32 %v918_v32, 0.0 }
 0x146   :  { %v1216_v51 = vmax.f32 %v920_v33, 0.0  ;;  %1799 = vmatprep.subr.bf16.mxu0 %v8661_v31 }
 0x147   :  { %v1217_v59 = vmax.f32 %v922_v34, 0.0  ;;  %v812_v41 = vpop.f32.mrb[20].mxu0 }
 0x148   :  { %v813_v49 = vadd.f32 %v812_v41, %v10050_v3  ;;  %v814_v7 = vpop.f32.mrb[21].mxu0  ;;  %v1260_v9 = vpack.c.bf16 %v1216_v51, %v1212_v40 }
 0x149   :  { %v815_v50 = vadd.f32 %v814_v7, %v10056_v5  ;;  %v816_v42 = vpop.f32.mrb[22].mxu0  ;;  %v1261_v10 = vpack.c.bf16 %v1217_v59, %v1213_v58  ;;  %1800 = vmatpush1.bf16.msra.mxu0 %v8659_v47  ;;  %v8674_v58 = vld [vmem:[%s12551_s5 + $0x1c0] ss:$8 sps:$4 sm:$0xff]   ;;  %v8679_v7 = vld [vmem:[%s12551_s5 + $0x1d4] ss:$8 sps:$4 sm:$0xff]  }
 0x14a   :  { %v926_v12 = vadd.f32 %v10017_v53, %v813_v49  ;;  %v817_v35 = vadd.f32 %v816_v42, %v10050_v3  ;;  %v818_v13 = vpop.f32.mrb[23].mxu0  ;;  %1801 = vmatprep.subr.bf16.mxu0 %v8664_v48  ;;  %v8665_v53 = vld [vmem:[%s12551_s5 + $0x190] ss:$8 sps:$4 sm:$0xff]  }
 0x14b   :  { %v928_v36 = vadd.f32 %v10019_v54, %v815_v50  ;;  %v819_v15 = vadd.f32 %v818_v13, %v10056_v5  ;;  %1744 = vmatprep.mubr.bf16.mxu0 %v1261_v10  ;;  %v8670_v54 = vld [vmem:[%s12551_s5 + $0x1a4] ss:$8 sps:$4 sm:$0xff]  }
 0x14c   :  { %v930_v17 = vadd.f32 %v10023_v56, %v817_v35  ;;  %1745 = vmatmul.mubr.bf16.gmra.mrb[48].mxu0 %v1260_v9  ;;  %v1220_v37 = vmax.f32 %v926_v12, 0.0 }
 0x14d   :  { %v932_v18 = vadd.f32 %v10025_v57, %v819_v15  ;;  %1802 = vmatpush1.bf16.msra.mxu0 %v8662_v11  ;;  %v1221_v52 = vmax.f32 %v928_v36, 0.0  ;;  %v12570_v36 = vsub.s32 3, %v10021_v55  ;;  %v8683_v15 = vld [vmem:[%s12551_s5 + $0x1f0] ss:$8 sps:$4 sm:$0xff]  }
 0x14e   :  { %v1224_v43 = vmax.f32 %v930_v17, 0.0  ;;  %1803 = vmatprep.subr.bf16.mxu0 %v8667_v14  ;;  %v184_v14 = vsub.s32 2, %v10021_v55  ;;  %v8688_v17 = vld [vmem:[%s12557_s11 + $0xc] ss:$16 sps:$4 sm:$0xff]  }
 0x14f   :  { %v1225_v8 = vmax.f32 %v932_v18, 0.0  ;;  %v822_v44 = vpop.f32.mrb[24].mxu0 }
 0x150   :  { %v823_v56 = vadd.f32 %v822_v44, %v10050_v3  ;;  %v824_v38 = vpop.f32.mrb[25].mxu0  ;;  %v1264_v16 = vpack.c.bf16 %v1224_v43, %v1220_v37  ;;  %v10238_v18 = vrot.slane %v10039_v62, %v184_v14 }
 0x151   :  { %v825_v57 = vadd.f32 %v824_v38, %v10056_v5  ;;  %v826_v21 = vpop.f32.mrb[26].mxu0  ;;  %v1265_v45 = vpack.c.bf16 %v1225_v8, %v1221_v52  ;;  %1804 = vmatpush1.bf16.msra.mxu0 %v8665_v53  ;;  %v10243_v53 = vrot.slane %v10039_v62, %v12570_v36 }
 0x152   :  { %v936_v24 = vadd.f32 %v10044_v0, %v823_v56  ;;  %v827_v46 = vadd.f32 %v826_v21, %v10050_v3  ;;  %v828_v25 = vpop.f32.mrb[27].mxu0  ;;  %1805 = vmatprep.subr.bf16.mxu0 %v8670_v54  ;;  %v8671_v0 = vld [vmem:[%s12551_s5 + $0x1b0] ss:$8 sps:$4 sm:$0xff]  }
 0x153   :  { %v938_v27 = vadd.f32 %v10046_v1, %v825_v57  ;;  %v829_v28 = vadd.f32 %v828_v25, %v10056_v5  ;;  %1754 = vmatprep.mubr.bf16.mxu0 %v1265_v45  ;;  %v8676_v1 = vld [vmem:[%s12551_s5 + $0x1c4] ss:$8 sps:$4 sm:$0xff]  }
 0x154   :  { %v940_v29 = vadd.f32 %v10052_v4, %v827_v46  ;;  %1755 = vmatmul.mubr.bf16.gmra.mrb[52].mxu0 %v1264_v16  ;;  %v1228_v31 = vmax.f32 %v936_v24, 0.0  ;;  %v8686_v46 = vld [vmem:[%s12557_s11 + $0x8] ss:$16 sps:$4 sm:$0xff]  }
 0x155   :  { %v942_v30 = vadd.f32 %v10058_v6, %v829_v28  ;;  %1806 = vmatpush1.bf16.msra.mxu0 %v8668_v23  ;;  %v1229_v39 = vmax.f32 %v938_v27, 0.0  ;;  %v8691_v27 = vld [vmem:[%s12557_s11 + $0x2c] ss:$16 sps:$4 sm:$0xff]  }
 0x156   :  { %v1232_v32 = vmax.f32 %v940_v29, 0.0  ;;  %1807 = vmatprep.subr.bf16.mxu0 %v8673_v26 }
 0x157   :  { %v1233_v33 = vmax.f32 %v942_v30, 0.0  ;;  %v832_v34 = vpop.f32.mrb[28].mxu0 }
 0x158   :  { %v833_v4 = vadd.f32 %v832_v34, %v10050_v3  ;;  %v834_v47 = vpop.f32.mrb[29].mxu0  ;;  %v1268_v40 = vpack.c.bf16 %v1232_v32, %v1228_v31  ;;  %v8689_v32 = vld [vmem:[%s12557_s11 + $0x28] ss:$16 sps:$4 sm:$0xff]  }
 0x159   :  { %v835_v6 = vadd.f32 %v834_v47, %v10056_v5  ;;  %v836_v51 = vpop.f32.mrb[30].mxu0  ;;  %v1269_v48 = vpack.c.bf16 %v1233_v33, %v1229_v39  ;;  %1808 = vmatpush1.bf16.msra.mxu0 %v8671_v0  ;;  %v8694_v33 = vld [vmem:[%s12557_s11 + $0x4c] ss:$16 sps:$4 sm:$0xff]  }
 0x15a   :  { %v946_v59 = vadd.f32 %v10064_v19, %v833_v4  ;;  %v837_v41 = vadd.f32 %v836_v51, %v10050_v3  ;;  %v838_v49 = vpop.f32.mrb[31].mxu0  ;;  %1809 = vmatprep.subr.bf16.mxu0 %v8676_v1  ;;  %v8677_v3 = vld [vmem:[%s12551_s5 + $0x1d0] ss:$8 sps:$4 sm:$0xff]  }
 0x15b   :  { %v948_v9 = vadd.f32 %v10066_v60, %v835_v6  ;;  %v839_v50 = vadd.f32 %v838_v49, %v10056_v5  ;;  %1764 = vmatprep.mubr.bf16.mxu0 %v1269_v48  ;;  %v8682_v60 = vld [vmem:[%s12551_s5 + $0x1e4] ss:$8 sps:$4 sm:$0xff]   ;;  %v8692_v51 = vld [vmem:[%s12557_s11 + $0x48] ss:$16 sps:$4 sm:$0xff]  }
 0x15c   :  { %v950_v42 = vadd.f32 %v10068_v20, %v837_v41  ;;  %1765 = vmatmul.mubr.bf16.gmra.mrb[56].mxu0 %v1268_v40  ;;  %v1236_v19 = vmax.f32 %v946_v59, 0.0  ;;  %v8680_v20 = vld [vmem:[%s12551_s5 + $0x1e0] ss:$8 sps:$4 sm:$0xff]   ;;  %v8697_v59 = vld [vmem:[%s12557_s11 + $0x6c] ss:$16 sps:$4 sm:$0xff]  }
 0x15d   :  { %v952_v10 = vadd.f32 %v10070_v22, %v839_v50  ;;  %1810 = vmatpush1.bf16.msra.mxu0 %v8674_v58  ;;  %v1237_v12 = vmax.f32 %v948_v9, 0.0  ;;  %v8685_v22 = vld [vmem:[%s12551_s5 + $0x1f4] ss:$8 sps:$4 sm:$0xff]  }
 0x15e   :  { %v1240_v11 = vmax.f32 %v950_v42, 0.0  ;;  %1811 = vmatprep.subr.bf16.mxu0 %v8679_v7  ;;  %v8695_v42 = vld [vmem:[%s12557_s11 + $0x68] ss:$16 sps:$4 sm:$0xff]  }
 0x15f   :  { %v1241_v5 = vmax.f32 %v952_v10, 0.0 }
 0x160   :  { %v1272_v35 = vpack.c.bf16 %v1240_v11, %v1236_v19  ;;  %v8700_v19 = vld [vmem:[%s12557_s11 + $0x8c] ss:$16 sps:$4 sm:$0xff]  }
 0x161   :  { %v1273_v13 = vpack.c.bf16 %v1241_v5, %v1237_v12  ;;  %1812 = vmatpush1.bf16.msra.mxu0 %v8677_v3 }
 0x162   :  { %1813 = vmatprep.subr.bf16.mxu0 %v8682_v60 }
 0x163   :  { %1774 = vmatprep.mubr.bf16.mxu0 %v1273_v13  ;;  %v8698_v13 = vld [vmem:[%s12557_s11 + $0x88] ss:$16 sps:$4 sm:$0xff]  }
 0x164   :  { %1775 = vmatmul.mubr.bf16.gmra.mrb[60].mxu0 %v1272_v35 }
 0x165   :  { %1814 = vmatpush1.bf16.msra.mxu0 %v8680_v20 }
 0x166   :  { %1815 = vmatprep.subr.bf16.mxu0 %v8685_v22 }
 0x169   :  { %1816 = vmatpush1.bf16.msra.mxu0 %v8683_v15  ;;  %v8703_v15 = vld [vmem:[%s12557_s11 + $0xac] ss:$16 sps:$4 sm:$0xff]  }
 0x16a   :  { %4808 = vmatprep.subr.bf16.mxu0 %v8688_v17 }
 0x16c   :  { %v1101_v37 = vpop.f32.mrb[32].mxu1 }
 0x16d   :  { %v7928_v43 = vadd.f32 %v1101_v37, %v10238_v18  ;;  %v1103_v54 = vpop.f32.mrb[33].mxu1 }
 0x16e   :  { %v7929_v52 = vadd.f32 %v1103_v54, %v10243_v53  ;;  %v1105_v8 = vpop.f32.mrb[34].mxu1 }
 0x16f   :  { %v7930_v44 = vadd.f32 %v1105_v8, %v10238_v18  ;;  %v1107_v56 = vpop.f32.mrb[35].mxu1  ;;  %v1182_v16 = vmax.f32 %v7928_v43, 0.0  ;;  %v8701_v8 = vld [vmem:[%s12557_s11 + $0xa8] ss:$16 sps:$4 sm:$0xff]  }
 0x170   :  { %v7931_v38 = vadd.f32 %v1107_v56, %v10243_v53  ;;  %v1183_v21 = vmax.f32 %v7929_v52, 0.0 }
 0x171   :  { %v1186_v57 = vmax.f32 %v7930_v44, 0.0 }
 0x172   :  { %v1187_v45 = vmax.f32 %v7931_v38, 0.0  ;;  %v8706_v38 = vld [vmem:[%s12557_s11 + $0xcc] ss:$16 sps:$4 sm:$0xff]  }
 0x173   :  { %v1246_v62 = vpack.c.bf16 %v1186_v57, %v1182_v16 }
 0x174   :  { %v1247_v23 = vpack.c.bf16 %v1187_v45, %v1183_v21  ;;  %v1111_v24 = vpop.f32.mrb[36].mxu1 }
 0x175   :  { %v7932_v25 = vadd.f32 %v1111_v24, %v10238_v18  ;;  %v1113_v26 = vpop.f32.mrb[37].mxu1 }
 0x176   :  { %v7933_v28 = vadd.f32 %v1113_v26, %v10243_v53  ;;  %v1115_v29 = vpop.f32.mrb[38].mxu1  ;;  %1817 = vmatprep.mubr.bf16.mxu0 %v1247_v23  ;;  %v8704_v23 = vld [vmem:[%s12557_s11 + $0xc8] ss:$16 sps:$4 sm:$0xff]  }
 0x177   :  { %v7934_v30 = vadd.f32 %v1115_v29, %v10238_v18  ;;  %v1117_v0 = vpop.f32.mrb[39].mxu1  ;;  %1818 = vmatmul.mubr.bf16.vlgmr.msra.gmra.mrb[32].mxu0 %v1246_v62  ;;  %v1190_v1 = vmax.f32 %v7932_v25, 0.0  ;;  %v8709_v25 = vld [vmem:[%s12557_s11 + $0xec] ss:$16 sps:$4 sm:$0xff]  }
 0x178   :  { %v7935_v31 = vadd.f32 %v1117_v0, %v10243_v53  ;;  %4809 = vmatpush1.bf16.msra.mxu0 %v8686_v46  ;;  %v1191_v34 = vmax.f32 %v7933_v28, 0.0  ;;  %v8707_v0 = vld [vmem:[%s12557_s11 + $0xe8] ss:$16 sps:$4 sm:$0xff]  }
 0x179   :  { %v1194_v39 = vmax.f32 %v7934_v30, 0.0  ;;  %4810 = vmatprep.subr.bf16.mxu0 %v8691_v27 }
 0x17a   :  { %v1195_v4 = vmax.f32 %v7935_v31, 0.0 }
 0x17b   :  { %v1250_v47 = vpack.c.bf16 %v1194_v39, %v1190_v1  ;;  %v8715_v1 = vld [vmem:[%s12557_s11 + $0x10c] ss:$16 sps:$4 sm:$0xff]  }
 0x17c   :  { %v1251_v40 = vpack.c.bf16 %v1195_v4, %v1191_v34  ;;  %v1121_v6 = vpop.f32.mrb[40].mxu1  ;;  %4811 = vmatpush1.bf16.msra.mxu0 %v8689_v32 }
 0x17d   :  { %v7936_v48 = vadd.f32 %v1121_v6, %v10238_v18  ;;  %v1123_v58 = vpop.f32.mrb[41].mxu1  ;;  %4812 = vmatprep.subr.bf16.mxu0 %v8694_v33 }
 0x17e   :  { %v7937_v41 = vadd.f32 %v1123_v58, %v10243_v53  ;;  %v1125_v49 = vpop.f32.mrb[42].mxu1  ;;  %1827 = vmatprep.mubr.bf16.mxu0 %v1251_v40  ;;  %v8713_v40 = vld [vmem:[%s12557_s11 + $0x108] ss:$16 sps:$4 sm:$0xff]  }
 0x17f   :  { %v7938_v7 = vadd.f32 %v1125_v49, %v10238_v18  ;;  %v1127_v9 = vpop.f32.mrb[43].mxu1  ;;  %1828 = vmatmul.mubr.bf16.gmra.mrb[36].mxu0 %v1250_v47  ;;  %v1198_v10 = vmax.f32 %v7936_v48, 0.0  ;;  %v8718_v48 = vld [vmem:[%s12557_s11 + $0x12c] ss:$16 sps:$4 sm:$0xff]  }
 0x180   :  { %v7939_v50 = vadd.f32 %v1127_v9, %v10243_v53  ;;  %4813 = vmatpush1.bf16.msra.mxu0 %v8692_v51  ;;  %v1199_v11 = vmax.f32 %v7937_v41, 0.0  ;;  %v8716_v9 = vld [vmem:[%s12557_s11 + $0x128] ss:$16 sps:$4 sm:$0xff]  }
 0x181   :  { %v1202_v3 = vmax.f32 %v7938_v7, 0.0  ;;  %4814 = vmatprep.subr.bf16.mxu0 %v8697_v59 }
 0x182   :  { %v1203_v60 = vmax.f32 %v7939_v50, 0.0 }
 0x183   :  { %v1254_v12 = vpack.c.bf16 %v1202_v3, %v1198_v10  ;;  %v8721_v10 = vld [vmem:[%s12557_s11 + $0x14c] ss:$16 sps:$4 sm:$0xff]  }
 0x184   :  { %v1255_v5 = vpack.c.bf16 %v1203_v60, %v1199_v11  ;;  %v1131_v35 = vpop.f32.mrb[44].mxu1  ;;  %4815 = vmatpush1.bf16.msra.mxu0 %v8695_v42 }
 0x185   :  { %v7940_v20 = vadd.f32 %v1131_v35, %v10238_v18  ;;  %v1133_v22 = vpop.f32.mrb[45].mxu1  ;;  %4816 = vmatprep.subr.bf16.mxu0 %v8700_v19 }
 0x186   :  { %v7941_v17 = vadd.f32 %v1133_v22, %v10243_v53  ;;  %v1135_v37 = vpop.f32.mrb[46].mxu1  ;;  %1837 = vmatprep.mubr.bf16.mxu0 %v1255_v5  ;;  %v8719_v5 = vld [vmem:[%s12557_s11 + $0x148] ss:$16 sps:$4 sm:$0xff]  }
 0x187   :  { %v7942_v43 = vadd.f32 %v1135_v37, %v10238_v18  ;;  %v1137_v54 = vpop.f32.mrb[47].mxu1  ;;  %1838 = vmatmul.mubr.bf16.gmra.mrb[40].mxu0 %v1254_v12  ;;  %v1206_v44 = vmax.f32 %v7940_v20, 0.0  ;;  %v8724_v20 = vld [vmem:[%s12557_s11 + $0x16c] ss:$16 sps:$4 sm:$0xff]  }
 0x188   :  { %v7943_v52 = vadd.f32 %v1137_v54, %v10243_v53  ;;  %4817 = vmatpush1.bf16.msra.mxu0 %v8698_v13  ;;  %v1207_v16 = vmax.f32 %v7941_v17, 0.0  ;;  %v8722_v54 = vld [vmem:[%s12557_s11 + $0x168] ss:$16 sps:$4 sm:$0xff]  }
 0x189   :  { %v1210_v56 = vmax.f32 %v7942_v43, 0.0  ;;  %4818 = vmatprep.subr.bf16.mxu0 %v8703_v15 }
 0x18a   :  { %v1211_v57 = vmax.f32 %v7943_v52, 0.0 }
 0x18b   :  { %v1258_v21 = vpack.c.bf16 %v1210_v56, %v1206_v44  ;;  %v8730_v44 = vld [vmem:[%s12557_s11 + $0x18c] ss:$16 sps:$4 sm:$0xff]  }
 0x18c   :  { %v1259_v45 = vpack.c.bf16 %v1211_v57, %v1207_v16  ;;  %v1141_v62 = vpop.f32.mrb[48].mxu1  ;;  %4819 = vmatpush1.bf16.msra.mxu0 %v8701_v8 }
 0x18d   :  { %v7944_v24 = vadd.f32 %v1141_v62, %v10238_v18  ;;  %v1143_v46 = vpop.f32.mrb[49].mxu1  ;;  %4820 = vmatprep.subr.bf16.mxu0 %v8706_v38 }
 0x18e   :  { %v7945_v26 = vadd.f32 %v1143_v46, %v10243_v53  ;;  %v1145_v27 = vpop.f32.mrb[50].mxu1  ;;  %1847 = vmatprep.mubr.bf16.mxu0 %v1259_v45  ;;  %v8728_v45 = vld [vmem:[%s12557_s11 + $0x188] ss:$16 sps:$4 sm:$0xff]  }
 0x18f   :  { %v7946_v28 = vadd.f32 %v1145_v27, %v10238_v18  ;;  %v1147_v29 = vpop.f32.mrb[51].mxu1  ;;  %1848 = vmatmul.mubr.bf16.gmra.mrb[44].mxu0 %v1258_v21  ;;  %v1214_v31 = vmax.f32 %v7944_v24, 0.0  ;;  %v8733_v24 = vld [vmem:[%s12557_s11 + $0x1ac] ss:$16 sps:$4 sm:$0xff]  }
 0x190   :  { %v7947_v30 = vadd.f32 %v1147_v29, %v10243_v53  ;;  %4821 = vmatpush1.bf16.msra.mxu0 %v8704_v23  ;;  %v1215_v39 = vmax.f32 %v7945_v26, 0.0  ;;  %v8731_v29 = vld [vmem:[%s12557_s11 + $0x1a8] ss:$16 sps:$4 sm:$0xff]  }
 0x191   :  { %v1218_v32 = vmax.f32 %v7946_v28, 0.0  ;;  %4822 = vmatprep.subr.bf16.mxu0 %v8709_v25 }
 0x192   :  { %v1219_v33 = vmax.f32 %v7947_v30, 0.0 }
 0x193   :  { %v1262_v34 = vpack.c.bf16 %v1218_v32, %v1214_v31  ;;  %v8736_v31 = vld [vmem:[%s12557_s11 + $0x1cc] ss:$16 sps:$4 sm:$0xff]  }
 0x194   :  { %v1263_v4 = vpack.c.bf16 %v1219_v33, %v1215_v39  ;;  %v1151_v47 = vpop.f32.mrb[52].mxu1  ;;  %4823 = vmatpush1.bf16.msra.mxu0 %v8707_v0  ;;  %v10370_v39 = vld [vmem:[%s12554_s8] ss:$0 sm:$0xff] }
 0x195   :  { %v7948_v6 = vadd.f32 %v1151_v47, %v10238_v18  ;;  %v1153_v51 = vpop.f32.mrb[53].mxu1  ;;  %4824 = vmatprep.subr.bf16.mxu0 %v8715_v1  ;;  %v8734_v47 = vld [vmem:[%s12557_s11 + $0x1c8] ss:$16 sps:$4 sm:$0xff]  }
 0x196   :  { %v7949_v58 = vadd.f32 %v1153_v51, %v10243_v53  ;;  %v1155_v59 = vpop.f32.mrb[54].mxu1  ;;  %1857 = vmatprep.mubr.bf16.mxu0 %v1263_v4 }
 0x197   :  { %v7950_v41 = vadd.f32 %v1155_v59, %v10238_v18  ;;  %v1157_v49 = vpop.f32.mrb[55].mxu1  ;;  %1858 = vmatmul.mubr.bf16.gmra.mrb[48].mxu0 %v1262_v34  ;;  %v1222_v50 = vmax.f32 %v7948_v6, 0.0 }
 0x198   :  { %v7951_v7 = vadd.f32 %v1157_v49, %v10243_v53  ;;  %4825 = vmatpush1.bf16.msra.mxu0 %v8713_v40  ;;  %v1223_v3 = vmax.f32 %v7949_v58, 0.0  ;;  %v8737_v49 = vld [vmem:[%s12557_s11 + $0x1e8] ss:$16 sps:$4 sm:$0xff]  }
 0x199   :  { %v1226_v42 = vmax.f32 %v7950_v41, 0.0  ;;  %4826 = vmatprep.subr.bf16.mxu0 %v8718_v48  ;;  %v8739_v48 = vld [vmem:[%s12557_s11 + $0x1ec] ss:$16 sps:$4 sm:$0xff]  }
 0x19a   :  { %v1227_v19 = vmax.f32 %v7951_v7, 0.0 }
 0x19b   :  { %v1266_v11 = vpack.c.bf16 %v1226_v42, %v1222_v50 }
 0x19c   :  { %v1267_v60 = vpack.c.bf16 %v1227_v19, %v1223_v3  ;;  %v1161_v12 = vpop.f32.mrb[56].mxu1  ;;  %4827 = vmatpush1.bf16.msra.mxu0 %v8716_v9  ;;  %v8740_v9 = vld [vmem:[%s12557_s11] ss:$16 sps:$4 sm:$0xff]  }
 0x19d   :  { %v7952_v35 = vadd.f32 %v1161_v12, %v10238_v18  ;;  %v1163_v13 = vpop.f32.mrb[57].mxu1  ;;  %4828 = vmatprep.subr.bf16.mxu0 %v8721_v10  ;;  %v8745_v10 = vld [vmem:[%s12557_s11 + $0x20c] ss:$16 sps:$4 sm:$0xff]   ;;  %v2422_v3 = vld [vmem:[%s12578_s23 + $0x40] sm:$0xff] }
 0x19e   :  { %v7953_v22 = vadd.f32 %v1163_v13, %v10243_v53  ;;  %v1165_v15 = vpop.f32.mrb[58].mxu1  ;;  %1867 = vmatprep.mubr.bf16.mxu0 %v1267_v60  ;;  %v2426_v19 = vld [vmem:[%s12578_s23 + $0x60] sm:$0xff] }
 0x19f   :  { %v7954_v17 = vadd.f32 %v1165_v15, %v10238_v18  ;;  %v1167_v37 = vpop.f32.mrb[59].mxu1  ;;  %1868 = vmatmul.mubr.bf16.gmra.mrb[52].mxu0 %v1266_v11  ;;  %v1230_v52 = vmax.f32 %v7952_v35, 0.0  ;;  %v8748_v12 = vld [vmem:[%s12557_s11 + $0x24] ss:$16 sps:$4 sm:$0xff]   ;;  %v10409_v15 = vcombine.high %v2422_v3, %v2426_v19 }
 0x1a0   :  { %v7955_v43 = vadd.f32 %v1167_v37, %v10243_v53  ;;  %4829 = vmatpush1.bf16.msra.mxu0 %v8719_v5  ;;  %v1231_v56 = vmax.f32 %v7953_v22, 0.0  ;;  %v8751_v37 = vld [vmem:[%s12557_s11 + $0x22c] ss:$16 sps:$4 sm:$0xff]  }
 0x1a1   :  { %v1234_v8 = vmax.f32 %v7954_v17, 0.0  ;;  %4830 = vmatprep.subr.bf16.mxu0 %v8724_v20  ;;  %v8743_v20 = vld [vmem:[%s12557_s11 + $0x208] ss:$16 sps:$4 sm:$0xff]   ;;  %v8746_v17 = vld [vmem:[%s12557_s11 + $0x20] ss:$16 sps:$4 sm:$0xff]  }
 0x1a2   :  { %v1235_v38 = vmax.f32 %v7955_v43, 0.0 }
 0x1a3   :  { %v1270_v16 = vpack.c.bf16 %v1234_v8, %v1230_v52  ;;  %v8754_v8 = vld [vmem:[%s12557_s11 + $0x44] ss:$16 sps:$4 sm:$0xff]  }
 0x1a4   :  { %v1271_v57 = vpack.c.bf16 %v1235_v38, %v1231_v56  ;;  %v1171_v21 = vpop.f32.mrb[60].mxu1  ;;  %4831 = vmatpush1.bf16.msra.mxu0 %v8722_v54  ;;  %v8749_v38 = vld [vmem:[%s12557_s11 + $0x228] ss:$16 sps:$4 sm:$0xff]  }
 0x1a5   :  { %v7956_v62 = vadd.f32 %v1171_v21, %v10238_v18  ;;  %v1173_v23 = vpop.f32.mrb[61].mxu1  ;;  %4832 = vmatprep.subr.bf16.mxu0 %v8730_v44 }
 0x1a6   :  { %v7957_v46 = vadd.f32 %v1173_v23, %v10243_v53  ;;  %v1175_v25 = vpop.f32.mrb[62].mxu1  ;;  %1877 = vmatprep.mubr.bf16.mxu0 %v1271_v57 }
 0x1a7   :  { %v7958_v26 = vadd.f32 %v1175_v25, %v10238_v18  ;;  %v1177_v27 = vpop.f32.mrb[63].mxu1  ;;  %1878 = vmatmul.mubr.bf16.gmra.mrb[56].mxu0 %v1270_v16  ;;  %v1238_v30 = vmax.f32 %v7956_v62, 0.0  ;;  %v2414_v18 = vld [vmem:[%s12578_s23] sm:$0xff] }
 0x1a8   :  { %v7959_v28 = vadd.f32 %v1177_v27, %v10243_v53  ;;  %4833 = vmatpush1.bf16.msra.mxu0 %v8728_v45  ;;  %v2418_v53 = vld [vmem:[%s12578_s23 + $0x20] sm:$0xff]  ;;  %v1239_v32 = vmax.f32 %v7957_v46, 0.0  ;;  %v8757_v45 = vld [vmem:[%s12557_s11 + $0x24c] ss:$16 sps:$4 sm:$0xff]  }
 0x1a9   :  { %v1242_v0 = vmax.f32 %v7958_v26, 0.0  ;;  %4834 = vmatprep.subr.bf16.mxu0 %v8733_v24  ;;  %v10375_v40 = vcombine.high %v2414_v18, %v2418_v53  ;;  %v10403_v35 = vcombine.low %v2414_v18, %v2418_v53  ;;  %v8752_v16 = vld [vmem:[%s12557_s11 + $0x40] ss:$16 sps:$4 sm:$0xff]   ;;  %v8760_v26 = vld [vmem:[%s12557_s11 + $0x64] ss:$16 sps:$4 sm:$0xff]  }
 0x1aa   :  { %v1243_v1 = vmax.f32 %v7959_v28, 0.0  ;;  %v2430_v24 = vld [vmem:[%s12578_s23 + $0x80] sm:$0xff]  ;;  %v10445_v28 = vcombine.low %v2422_v3, %v2426_v19 }
 0x1ab   :  { %v1274_v33 = vpack.c.bf16 %v1242_v0, %v1238_v30  ;;  %v2434_v46 = vld [vmem:[%s12578_s23 + $0xa0] sm:$0xff]  ;;  %v8755_v30 = vld [vmem:[%s12557_s11 + $0x248] ss:$16 sps:$4 sm:$0xff]  }
 0x1ac   :  { %v1275_v34 = vpack.c.bf16 %v1243_v1, %v1239_v32  ;;  %v7810_v4 = vpop.f32.mrb[64].mxu1  ;;  %4835 = vmatpush1.bf16.msra.mxu0 %v8731_v29  ;;  %v8758_v53 = vld [vmem:[%s12557_s11 + $0x60] ss:$16 sps:$4 sm:$0xff]   ;;  %v8763_v32 = vld [vmem:[%s12557_s11 + $0x26c] ss:$16 sps:$4 sm:$0xff]   ;;  %v10489_v19 = vcombine.low %v2430_v24, %v2434_v46 }
 0x1ad   :  { %v2095_v6 = vadd.f32 %v7810_v4, %v10370_v39  ;;  %v2089_v51 = vpop.f32.mrb[65].mxu1  ;;  %4836 = vmatprep.subr.bf16.mxu0 %v8736_v31  ;;  %v10451_v31 = vcombine.high %v2430_v24, %v2434_v46  ;;  %v8784_v24 = vld [vmem:[%s12557_s11 + $0xe4] ss:$16 sps:$4 sm:$0xff]  }
 0x1ae   :  { %v2090_v58 = vadd.f32 %v10370_v39, %v2089_v51  ;;  %1887 = vmatprep.mubr.bf16.mxu0 %v1275_v34  ;;  %v8766_v34 = vld [vmem:[%s12557_s11 + $0x84] ss:$16 sps:$4 sm:$0xff]   ;;  %v8761_v51 = vld [vmem:[%s12557_s11 + $0x268] ss:$16 sps:$4 sm:$0xff]  }
 0x1af   :  { %v2169_v59 = vmax.f32 %v2095_v6, 0.0  ;;  %1888 = vmatmul.mubr.bf16.gmra.mrb[60].mxu0 %v1274_v33 }
 0x1b0   :  { %v2168_v41 = vmax.f32 %v2090_v58, 0.0  ;;  %4837 = vmatpush1.bf16.msra.mxu0 %v8734_v47  ;;  %v7813_v7 = vpop.f32.mrb[66].mxu1  ;;  %4840 = vmatprep.mubr.bf16.mxu0 %v10375_v40 }
 0x1b1   :  { %4838 = vmatprep.subr.bf16.mxu0 %v8739_v48  ;;  %v2105_v50 = vadd.f32 %v7813_v7, %v10370_v39  ;;  %v2099_v42 = vpop.f32.mrb[67].mxu1  ;;  %v8764_v48 = vld [vmem:[%s12557_s11 + $0x80] ss:$16 sps:$4 sm:$0xff]  }
 0x1b2   :  { %v2184_v11 = vpack.c.bf16 %v2169_v59, %v2168_v41  ;;  %v2100_v60 = vadd.f32 %v10370_v39, %v2099_v42  ;;  %v8769_v41 = vld [vmem:[%s12557_s11 + $0x28c] ss:$16 sps:$4 sm:$0xff]   ;;  %v2442_v7 = vld [vmem:[%s12578_s23 + $0xe0] sm:$0xff] }
 0x1b3   :  { %v2171_v5 = vmax.f32 %v2105_v50, 0.0  ;;  %v8772_v42 = vld [vmem:[%s12557_s11 + $0xa4] ss:$16 sps:$4 sm:$0xff]  }
 0x1b4   :  { %7301 = vmatmul.mubr.msk.bf16.vlgmr.msra.gmra.mrb[80].mxu1 %vm2228_vm4, %v2184_v11  ;;  %4839 = vmatpush1.bf16.msra.mxu0 %v8737_v49  ;;  %v2170_v13 = vmax.f32 %v2100_v60, 0.0  ;;  %v7816_v22 = vpop.f32.mrb[68].mxu1  ;;  %v2438_v49 = vld [vmem:[%s12578_s23 + $0xc0] sm:$0xff]  ;;  %v8767_v60 = vld [vmem:[%s12557_s11 + $0x288] ss:$16 sps:$4 sm:$0xff]  }
 0x1b5   :  { %4357 = vmatpush1.bf16.msra.mxu1 %v8740_v9  ;;  %4921 = vmatprep.subr.bf16.mxu0 %v8745_v10  ;;  %v2115_v43 = vadd.f32 %v7816_v22, %v10370_v39  ;;  %v2109_v54 = vpop.f32.mrb[69].mxu1  ;;  %v8775_v22 = vld [vmem:[%s12557_s11 + $0x2ac] ss:$16 sps:$4 sm:$0xff]  }
 0x1b6   :  { %v2185_v52 = vpack.c.bf16 %v2171_v5, %v2170_v13  ;;  %4358 = vmatprep.subr.bf16.mxu1 %v8748_v12  ;;  %2295 = vmatprep.mubr.bf16.mxu1 %v9344_v2  ;;  %v2110_v44 = vadd.f32 %v10370_v39, %v2109_v54  ;;  %v10495_v12 = vcombine.high %v2438_v49, %v2442_v7 }
 0x1b7   :  { %4841 = vmatmul.mubr.bf16.vlgmr.msra.gmra.mrb[64].mxu0 %v10403_v35  ;;  %v2173_v56 = vmax.f32 %v2115_v43, 0.0  ;;  %v8778_v43 = vld [vmem:[%s12557_s11 + $0xc4] ss:$16 sps:$4 sm:$0xff]  }
 0x1b8   :  { %4922 = vmatpush1.bf16.msra.mxu0 %v8743_v20  ;;  %v2172_v57 = vmax.f32 %v2110_v44, 0.0  ;;  %4850 = vmatprep.mubr.bf16.mxu0 %v10409_v15  ;;  %v7819_v21 = vpop.f32.mrb[70].mxu1  ;;  %v8770_v20 = vld [vmem:[%s12557_s11 + $0xa0] ss:$16 sps:$4 sm:$0xff]   ;;  %v8773_v44 = vld [vmem:[%s12557_s11 + $0x2a8] ss:$16 sps:$4 sm:$0xff]  }
 0x1b9   :  { %4359 = vmatpush1.bf16.msra.mxu1 %v8746_v17  ;;  %4923 = vmatprep.subr.bf16.mxu0 %v8751_v37  ;;  %v2125_v62 = vadd.f32 %v7819_v21, %v10370_v39  ;;  %v2119_v23 = vpop.f32.mrb[71].mxu1  ;;  %v2446_v21 = vld [vmem:[%s12578_s23 + $0x100] sm:$0xff] }
 0x1ba   :  { %4360 = vmatprep.subr.bf16.mxu1 %v8754_v8  ;;  %v2186_v25 = vpack.c.bf16 %v2173_v56, %v2172_v57  ;;  %v2120_v27 = vadd.f32 %v10370_v39, %v2119_v23  ;;  %v8776_v56 = vld [vmem:[%s12557_s11 + $0xc0] ss:$16 sps:$4 sm:$0xff]   ;;  %v8781_v57 = vld [vmem:[%s12557_s11 + $0x2cc] ss:$16 sps:$4 sm:$0xff]  }
 0x1bb   :  { %v2175_v29 = vmax.f32 %v2125_v62, 0.0 }
 0x1bc   :  { %7302 = vmatmul.mubr.msk.bf16.gmra.mrb[84].mxu1 %vm2228_vm4, %v2185_v52  ;;  %4924 = vmatpush1.bf16.msra.mxu0 %v8749_v38  ;;  %v2174_v0 = vmax.f32 %v2120_v27, 0.0  ;;  %v7822_v18 = vpop.f32.mrb[72].mxu1 }
 0x1bd   :  { %4361 = vmatpush1.bf16.msra.mxu1 %v8752_v16  ;;  %4925 = vmatprep.subr.bf16.mxu0 %v8757_v45  ;;  %v2135_v1 = vadd.f32 %v7822_v18, %v10370_v39  ;;  %v2129_v33 = vpop.f32.mrb[73].mxu1  ;;  %v2450_v45 = vld [vmem:[%s12578_s23 + $0x120] sm:$0xff] }
 0x1be   :  { %4362 = vmatprep.subr.bf16.mxu1 %v8760_v26  ;;  %2305 = vmatprep.mubr.bf16.mxu1 %v9344_v2  ;;  %v2187_v4 = vpack.c.bf16 %v2175_v29, %v2174_v0  ;;  %v2130_v47 = vadd.f32 %v10370_v39, %v2129_v33  ;;  %v10535_v26 = vcombine.low %v2438_v49, %v2442_v7  ;;  %v8779_v29 = vld [vmem:[%s12557_s11 + $0x2c8] ss:$16 sps:$4 sm:$0xff]   ;;  %v8782_v18 = vld [vmem:[%s12557_s11 + $0xe0] ss:$16 sps:$4 sm:$0xff]   ;;  %v8802_v49 = vld [vmem:[%s12557_s11 + $0x144] ss:$16 sps:$4 sm:$0xff]  }
 0x1bf   :  { %4851 = vmatmul.mubr.bf16.gmra.mrb[68].mxu0 %v10445_v28  ;;  %v2177_v6 = vmax.f32 %v2135_v1, 0.0  ;;  %v8785_v1 = vld [vmem:[%s12557_s11 + $0x2e8] ss:$16 sps:$4 sm:$0xff]   ;;  %v8788_v33 = vld [vmem:[%s12557_s11 + $0x100] ss:$16 sps:$4 sm:$0xff]  }
 0x1c0   :  { %4926 = vmatpush1.bf16.msra.mxu0 %v8755_v30  ;;  %4860 = vmatprep.mubr.bf16.mxu0 %v10451_v31  ;;  %v2176_v58 = vmax.f32 %v2130_v47, 0.0  ;;  %v7825_v59 = vpop.f32.mrb[74].mxu1  ;;  %v10541_v30 = vcombine.high %v2446_v21, %v2450_v45  ;;  %v2458_v47 = vld [vmem:[%s12578_s23 + $0x160] sm:$0xff]  ;;  %v8797_v7 = vld [vmem:[%s12557_s11 + $0x328] ss:$16 sps:$4 sm:$0xff]  }
 0x1c1   :  { %4363 = vmatpush1.bf16.msra.mxu1 %v8758_v53  ;;  %4927 = vmatprep.subr.bf16.mxu0 %v8763_v32  ;;  %v2145_v9 = vadd.f32 %v7825_v59, %v10370_v39  ;;  %v2139_v50 = vpop.f32.mrb[75].mxu1  ;;  %v8790_v53 = vld [vmem:[%s12557_s11 + $0x104] ss:$16 sps:$4 sm:$0xff]   ;;  %v8794_v59 = vld [vmem:[%s12557_s11 + $0x120] ss:$16 sps:$4 sm:$0xff]  }
 0x1c2   :  { %4364 = vmatprep.subr.bf16.mxu1 %v8766_v34  ;;  %v10486_v10 = vpack.c.bf16 %v2177_v6, %v2176_v58  ;;  %v2140_v3 = vadd.f32 %v10370_v39, %v2139_v50  ;;  %v8793_v34 = vld [vmem:[%s12557_s11 + $0x30c] ss:$16 sps:$4 sm:$0xff]   ;;  %v8796_v6 = vld [vmem:[%s12557_s11 + $0x124] ss:$16 sps:$4 sm:$0xff]  }
 0x1c3   :  { %v2179_v11 = vmax.f32 %v2145_v9, 0.0  ;;  %v8800_v9 = vld [vmem:[%s12557_s11 + $0x140] ss:$16 sps:$4 sm:$0xff]   ;;  %v8805_v50 = vld [vmem:[%s12557_s11 + $0x34c] ss:$16 sps:$4 sm:$0xff]  }
 0x1c4   :  { %7303 = vmatmul.mubr.msk.bf16.gmra.mrb[88].mxu1 %vm2228_vm4, %v2186_v25  ;;  %4928 = vmatpush1.bf16.msra.mxu0 %v8761_v51  ;;  %v2178_v5 = vmax.f32 %v2140_v3, 0.0  ;;  %v7828_v13 = vpop.f32.mrb[76].mxu1  ;;  %v10575_v51 = vcombine.low %v2446_v21, %v2450_v45  ;;  %v8808_v3 = vld [vmem:[%s12557_s11 + $0x164] ss:$16 sps:$4 sm:$0xff]   ;;  %v8821_v45 = vld [vmem:[%s12557_s11 + $0x3a8] ss:$16 sps:$4 sm:$0xff]  }
 0x1c5   :  { %4365 = vmatpush1.bf16.msra.mxu1 %v8764_v48  ;;  %4929 = vmatprep.subr.bf16.mxu0 %v8769_v41  ;;  %v2155_v17 = vadd.f32 %v7828_v13, %v10370_v39  ;;  %v2149_v37 = vpop.f32.mrb[77].mxu1  ;;  %v8791_v48 = vld [vmem:[%s12557_s11 + $0x308] ss:$16 sps:$4 sm:$0xff]   ;;  %v8799_v41 = vld [vmem:[%s12557_s11 + $0x32c] ss:$16 sps:$4 sm:$0xff]  }
 0x1c6   :  { %4366 = vmatprep.subr.bf16.mxu1 %v8772_v42  ;;  %2315 = vmatprep.mubr.bf16.mxu1 %v9344_v2  ;;  %v10508_v54 = vpack.c.bf16 %v2179_v11, %v2178_v5  ;;  %v2150_v52 = vadd.f32 %v10370_v39, %v2149_v37  ;;  %v2462_v42 = vld [vmem:[%s12578_s23 + $0x180] sm:$0xff] }
 0x1c7   :  { %4861 = vmatmul.mubr.bf16.gmra.mrb[72].mxu0 %v10489_v19  ;;  %v2181_v8 = vmax.f32 %v2155_v17, 0.0  ;;  %v8806_v13 = vld [vmem:[%s12557_s11 + $0x160] ss:$16 sps:$4 sm:$0xff]   ;;  %v8809_v17 = vld [vmem:[%s12557_s11 + $0x368] ss:$16 sps:$4 sm:$0xff]  }
 0x1c8   :  { %4930 = vmatpush1.bf16.msra.mxu0 %v8767_v60  ;;  %4870 = vmatprep.mubr.bf16.mxu0 %v10495_v12  ;;  %v2180_v38 = vmax.f32 %v2150_v52, 0.0  ;;  %v7831_v16 = vpop.f32.mrb[78].mxu1  ;;  %v8803_v60 = vld [vmem:[%s12557_s11 + $0x348] ss:$16 sps:$4 sm:$0xff]   ;;  %v8812_v37 = vld [vmem:[%s12557_s11 + $0x180] ss:$16 sps:$4 sm:$0xff]  }
 0x1c9   :  { %4367 = vmatpush1.bf16.msra.mxu1 %v8770_v20  ;;  %4931 = vmatprep.subr.bf16.mxu0 %v8775_v22  ;;  %v2165_v62 = vadd.f32 %v7831_v16, %v10370_v39  ;;  %v2159_v23 = vpop.f32.mrb[79].mxu1  ;;  %v8811_v20 = vld [vmem:[%s12557_s11 + $0x36c] ss:$16 sps:$4 sm:$0xff]   ;;  %v8814_v22 = vld [vmem:[%s12557_s11 + $0x184] ss:$16 sps:$4 sm:$0xff]  }
 0x1ca   :  { %4368 = vmatprep.subr.bf16.mxu1 %v8778_v43  ;;  %v10532_v46 = vpack.c.bf16 %v2181_v8, %v2180_v38  ;;  %v2160_v25 = vadd.f32 %v10370_v39, %v2159_v23  ;;  %v8787_v39 = vld [vmem:[%s12557_s11 + $0x2ec] ss:$16 sps:$4 sm:$0xff]   ;;  %v2474_v52 = vld [vmem:[%s12578_s23 + $0x1e0] sm:$0xff] }
 0x1cb   :  { %v2183_v27 = vmax.f32 %v2165_v62, 0.0  ;;  %v8817_v43 = vld [vmem:[%s12557_s11 + $0x38c] ss:$16 sps:$4 sm:$0xff]   ;;  %v8820_v8 = vld [vmem:[%s12557_s11 + $0x1a4] ss:$16 sps:$4 sm:$0xff]  }
 0x1cc   :  { %7304 = vmatmul.mubr.msk.bf16.gmra.mrb[92].mxu1 %vm2228_vm4, %v2187_v4  ;;  %4932 = vmatpush1.bf16.msra.mxu0 %v8773_v44  ;;  %v2182_v0 = vmax.f32 %v2160_v25, 0.0  ;;  %v2454_v4 = vld [vmem:[%s12578_s23 + $0x140] sm:$0xff]  ;;  %v2415_v23 = vld [vmem:[%s12578_s23 + $0x8] sm:$0xff] }
 0x1cd   :  { %4369 = vmatpush1.bf16.msra.mxu1 %v8776_v56  ;;  %4933 = vmatprep.subr.bf16.mxu0 %v8781_v57  ;;  %v10582_v58 = vcombine.high %v2454_v4, %v2458_v47  ;;  %v10614_v11 = vcombine.low %v2454_v4, %v2458_v47  ;;  %v8815_v56 = vld [vmem:[%s12557_s11 + $0x388] ss:$16 sps:$4 sm:$0xff]   ;;  %v8818_v16 = vld [vmem:[%s12557_s11 + $0x1a0] ss:$16 sps:$4 sm:$0xff]   ;;  %v8823_v57 = vld [vmem:[%s12557_s11 + $0x3ac] ss:$16 sps:$4 sm:$0xff]  }
 0x1ce   :  { %4370 = vmatprep.subr.bf16.mxu1 %v8784_v24  ;;  %2325 = vmatprep.mubr.bf16.mxu1 %v9344_v2  ;;  %v10553_v32 = vpack.c.bf16 %v2183_v27, %v2182_v0  ;;  %v8826_v21 = vld [vmem:[%s12557_s11 + $0x1c4] ss:$16 sps:$4 sm:$0xff]   ;;  %v8824_v62 = vld [vmem:[%s12557_s11 + $0x1c0] ss:$16 sps:$4 sm:$0xff]   ;;  %v2419_v24 = vld [vmem:[%s12578_s23 + $0x28] sm:$0xff] }
 0x1cf   :  { %4871 = vmatmul.mubr.bf16.gmra.mrb[76].mxu0 %v10535_v26  ;;  %v8827_v27 = vld [vmem:[%s12557_s11 + $0x3c8] ss:$16 sps:$4 sm:$0xff]   ;;  %v8830_v0 = vld [vmem:[%s12557_s11 + $0x1e0] ss:$16 sps:$4 sm:$0xff]   ;;  %v10731_v4 = vcombine.low %v2415_v23, %v2419_v24 }
 0x1d0   :  { %4934 = vmatpush1.bf16.msra.mxu0 %v8779_v29  ;;  %4880 = vmatprep.mubr.bf16.mxu0 %v10541_v30  ;;  %v10699_v29 = vcombine.high %v2415_v23, %v2419_v24  ;;  %v8839_v47 = vld [vmem:[%s12557_s11 + $0x408] ss:$16 sps:$4 sm:$0xff]  }
 0x1d1   :  { %4371 = vmatpush1.bf16.msra.mxu1 %v8782_v18  ;;  %4935 = vmatprep.subr.bf16.mxu0 %v8787_v39  ;;  %v8835_v18 = vld [vmem:[%s12557_s11 + $0x3ec] ss:$16 sps:$4 sm:$0xff]   ;;  %v8838_v39 = vld [vmem:[%s12557_s11 + $0x204] ss:$16 sps:$4 sm:$0xff]   ;;  %v8875_v24 = vld [vmem:[%s12557_s11 + $0x4c8] ss:$16 sps:$4 sm:$0xff]  }
 0x1d2   :  { %4372 = vmatprep.subr.bf16.mxu1 %v8790_v53  ;;  %v8833_v53 = vld [vmem:[%s12557_s11 + $0x3e8] ss:$16 sps:$4 sm:$0xff]  }
 0x1d4   :  { %7305 = vmatmul.mubr.msk.bf16.gmra.mrb[96].mxu1 %vm2228_vm4, %v10486_v10  ;;  %4936 = vmatpush1.bf16.msra.mxu0 %v8785_v1  ;;  %v2466_v10 = vld [vmem:[%s12578_s23 + $0x1a0] sm:$0xff]  ;;  %v2423_v1 = vld [vmem:[%s12578_s23 + $0x48] sm:$0xff] }
 0x1d5   :  { %4373 = vmatpush1.bf16.msra.mxu1 %v8788_v33  ;;  %4937 = vmatprep.subr.bf16.mxu0 %v8793_v34  ;;  %v10621_v5 = vcombine.high %v2462_v42, %v2466_v10  ;;  %v10653_v44 = vcombine.low %v2462_v42, %v2466_v10  ;;  %v2427_v33 = vld [vmem:[%s12578_s23 + $0x68] sm:$0xff]  ;;  %v8844_v34 = vld [vmem:[%s12557_s11 + $0x224] ss:$16 sps:$4 sm:$0xff]  }
 0x1d6   :  { %4374 = vmatprep.subr.bf16.mxu1 %v8796_v6  ;;  %2335 = vmatprep.mubr.bf16.mxu1 %v9344_v2  ;;  %v10737_v6 = vcombine.high %v2423_v1, %v2427_v33  ;;  %v10769_v42 = vcombine.low %v2423_v1, %v2427_v33  ;;  %v8851_v10 = vld [vmem:[%s12557_s11 + $0x448] ss:$16 sps:$4 sm:$0xff]  }
 0x1d7   :  { %4881 = vmatmul.mubr.bf16.gmra.mrb[80].mxu0 %v10575_v51  ;;  %v8887_v33 = vld [vmem:[%s12557_s11 + $0x508] ss:$16 sps:$4 sm:$0xff]  }
 0x1d8   :  { %4938 = vmatpush1.bf16.msra.mxu0 %v8791_v48  ;;  %4890 = vmatprep.mubr.bf16.mxu0 %v10582_v58  ;;  %v8842_v48 = vld [vmem:[%s12557_s11 + $0x220] ss:$16 sps:$4 sm:$0xff]  }
 0x1d9   :  { %4375 = vmatpush1.bf16.msra.mxu1 %v8794_v59  ;;  %4939 = vmatprep.subr.bf16.mxu0 %v8799_v41  ;;  %v8847_v59 = vld [vmem:[%s12557_s11 + $0x42c] ss:$16 sps:$4 sm:$0xff]   ;;  %v8845_v41 = vld [vmem:[%s12557_s11 + $0x428] ss:$16 sps:$4 sm:$0xff]  }
 0x1da   :  { %4376 = vmatprep.subr.bf16.mxu1 %v8802_v49  ;;  %v8848_v49 = vld [vmem:[%s12557_s11 + $0x240] ss:$16 sps:$4 sm:$0xff]  }
 0x1dc   :  { %7306 = vmatmul.mubr.msk.bf16.gmra.mrb[100].mxu1 %vm2228_vm4, %v10508_v54  ;;  %4940 = vmatpush1.bf16.msra.mxu0 %v8797_v7  ;;  %v2470_v54 = vld [vmem:[%s12578_s23 + $0x1c0] sm:$0xff]  ;;  %v2431_v7 = vld [vmem:[%s12578_s23 + $0x88] sm:$0xff] }
 0x1dd   :  { %4377 = vmatpush1.bf16.msra.mxu1 %v8800_v9  ;;  %4941 = vmatprep.subr.bf16.mxu0 %v8805_v50  ;;  %v10660_v38 = vcombine.high %v2470_v54, %v2474_v52  ;;  %v10692_v25 = vcombine.low %v2470_v54, %v2474_v52  ;;  %v2435_v9 = vld [vmem:[%s12578_s23 + $0xa8] sm:$0xff]  ;;  %v8856_v50 = vld [vmem:[%s12557_s11 + $0x264] ss:$16 sps:$4 sm:$0xff]  }
 0x1de   :  { %4378 = vmatprep.subr.bf16.mxu1 %v8808_v3  ;;  %2345 = vmatprep.mubr.bf16.mxu1 %v9344_v2  ;;  %v10775_v3 = vcombine.high %v2431_v7, %v2435_v9  ;;  %v10807_v54 = vcombine.low %v2431_v7, %v2435_v9  ;;  %v8863_v52 = vld [vmem:[%s12557_s11 + $0x488] ss:$16 sps:$4 sm:$0xff]  }
 0x1df   :  { %4891 = vmatmul.mubr.bf16.gmra.mrb[84].mxu0 %v10614_v11  ;;  %v8899_v9 = vld [vmem:[%s12557_s11 + $0x548] ss:$16 sps:$4 sm:$0xff]  }
 0x1e0   :  { %4942 = vmatpush1.bf16.msra.mxu0 %v8803_v60  ;;  %4900 = vmatprep.mubr.bf16.mxu0 %v10621_v5  ;;  %v8854_v60 = vld [vmem:[%s12557_s11 + $0x260] ss:$16 sps:$4 sm:$0xff]  }
 0x1e1   :  { %4379 = vmatpush1.bf16.msra.mxu1 %v8806_v13  ;;  %4943 = vmatprep.subr.bf16.mxu0 %v8811_v20  ;;  %v8859_v13 = vld [vmem:[%s12557_s11 + $0x46c] ss:$16 sps:$4 sm:$0xff]   ;;  %v8857_v20 = vld [vmem:[%s12557_s11 + $0x468] ss:$16 sps:$4 sm:$0xff]  }
 0x1e2   :  { %4380 = vmatprep.subr.bf16.mxu1 %v8814_v22  ;;  %v8860_v22 = vld [vmem:[%s12557_s11 + $0x280] ss:$16 sps:$4 sm:$0xff]  }
 0x1e4   :  { %7307 = vmatmul.mubr.msk.bf16.gmra.mrb[104].mxu1 %vm2228_vm4, %v10532_v46  ;;  %4944 = vmatpush1.bf16.msra.mxu0 %v8809_v17  ;;  %v8832_v46 = vld [vmem:[%s12557_s11 + $0x1e4] ss:$16 sps:$4 sm:$0xff]   ;;  %v2439_v17 = vld [vmem:[%s12578_s23 + $0xc8] sm:$0xff] }
 0x1e5   :  { %4381 = vmatpush1.bf16.msra.mxu1 %v8812_v37  ;;  %4945 = vmatprep.subr.bf16.mxu0 %v8817_v43  ;;  %v2443_v37 = vld [vmem:[%s12578_s23 + $0xe8] sm:$0xff]  ;;  %v8868_v43 = vld [vmem:[%s12557_s11 + $0x2a4] ss:$16 sps:$4 sm:$0xff]  }
 0x1e6   :  { %4382 = vmatprep.subr.bf16.mxu1 %v8820_v8  ;;  %2355 = vmatprep.mubr.bf16.mxu1 %v9344_v2  ;;  %v8829_v2 = vld [vmem:[%s12557_s11 + $0x3cc] ss:$16 sps:$4 sm:$0xff]   ;;  %v10813_v8 = vcombine.high %v2439_v17, %v2443_v37  ;;  %v10845_v23 = vcombine.low %v2439_v17, %v2443_v37  ;;  %v8911_v37 = vld [vmem:[%s12557_s11 + $0x588] ss:$16 sps:$4 sm:$0xff]  }
 0x1e7   :  { %4901 = vmatmul.mubr.bf16.gmra.mrb[88].mxu0 %v10653_v44 }
 0x1e8   :  { %4946 = vmatpush1.bf16.msra.mxu0 %v8815_v56  ;;  %4910 = vmatprep.mubr.bf16.mxu0 %v10660_v38  ;;  %v8866_v56 = vld [vmem:[%s12557_s11 + $0x2a0] ss:$16 sps:$4 sm:$0xff]  }
 0x1e9   :  { %4383 = vmatpush1.bf16.msra.mxu1 %v8818_v16  ;;  %4947 = vmatprep.subr.bf16.mxu0 %v8823_v57  ;;  %v8871_v16 = vld [vmem:[%s12557_s11 + $0x4ac] ss:$16 sps:$4 sm:$0xff]   ;;  %v8869_v57 = vld [vmem:[%s12557_s11 + $0x4a8] ss:$16 sps:$4 sm:$0xff]  }
 0x1ea   :  { %4384 = vmatprep.subr.bf16.mxu1 %v8826_v21  ;;  %v8872_v21 = vld [vmem:[%s12557_s11 + $0x2c0] ss:$16 sps:$4 sm:$0xff]  }
 0x1ec   :  { %7308 = vmatmul.mubr.msk.bf16.gmra.mrb[108].mxu1 %vm2228_vm4, %v10553_v32  ;;  %4948 = vmatpush1.bf16.msra.mxu0 %v8821_v45  ;;  %v8836_v32 = vld [vmem:[%s12557_s11 + $0x200] ss:$16 sps:$4 sm:$0xff]   ;;  %v2447_v45 = vld [vmem:[%s12578_s23 + $0x108] sm:$0xff] }
 0x1ed   :  { %4385 = vmatpush1.bf16.msra.mxu1 %v8824_v62  ;;  %4949 = vmatprep.subr.bf16.mxu0 %v8829_v2  ;;  %v2451_v62 = vld [vmem:[%s12578_s23 + $0x128] sm:$0xff]  ;;  %v8880_v2 = vld [vmem:[%s12557_s11 + $0x2e4] ss:$16 sps:$4 sm:$0xff]  }
 0x1ee   :  { %4386 = vmatprep.subr.bf16.mxu1 %v8832_v46  ;;  %4388 = vmatprep.mubr.bf16.mxu1 %v10375_v40  ;;  %v8841_v40 = vld [vmem:[%s12557_s11 + $0x40c] ss:$16 sps:$4 sm:$0xff]   ;;  %v10851_v46 = vcombine.high %v2447_v45, %v2451_v62  ;;  %v10883_v1 = vcombine.low %v2447_v45, %v2451_v62  ;;  %v8923_v62 = vld [vmem:[%s12557_s11 + $0x5c8] ss:$16 sps:$4 sm:$0xff]  }
 0x1ef   :  { %4911 = vmatmul.mubr.bf16.gmra.mrb[92].mxu0 %v10692_v25 }
 0x1f0   :  { %4950 = vmatpush1.bf16.msra.mxu0 %v8827_v27  ;;  %4953 = vmatprep.mubr.bf16.mxu0 %v10699_v29  ;;  %v8878_v27 = vld [vmem:[%s12557_s11 + $0x2e0] ss:$16 sps:$4 sm:$0xff]  }
 0x1f1   :  { %4387 = vmatpush1.bf16.msra.mxu1 %v8830_v0  ;;  %4951 = vmatprep.subr.bf16.mxu0 %v8835_v18  ;;  %v8883_v0 = vld [vmem:[%s12557_s11 + $0x4ec] ss:$16 sps:$4 sm:$0xff]   ;;  %v8881_v18 = vld [vmem:[%s12557_s11 + $0x4e8] ss:$16 sps:$4 sm:$0xff]  }
 0x1f2   :  { %4469 = vmatprep.subr.bf16.mxu1 %v8838_v39  ;;  %v8884_v39 = vld [vmem:[%s12557_s11 + $0x300] ss:$16 sps:$4 sm:$0xff]  }
 0x1f4   :  { %4389 = vmatmul.mubr.bf16.vlgmr.msra.gmra.mrb[112].mxu1 %v10403_v35  ;;  %4952 = vmatpush1.bf16.msra.mxu0 %v8833_v53  ;;  %v8850_v35 = vld [vmem:[%s12557_s11 + $0x244] ss:$16 sps:$4 sm:$0xff]   ;;  %v2455_v53 = vld [vmem:[%s12578_s23 + $0x148] sm:$0xff] }
 0x1f5   :  { %4470 = vmatpush1.bf16.msra.mxu1 %v8836_v32  ;;  %5034 = vmatprep.subr.bf16.mxu0 %v8841_v40  ;;  %v2459_v32 = vld [vmem:[%s12578_s23 + $0x168] sm:$0xff]  ;;  %v8892_v40 = vld [vmem:[%s12557_s11 + $0x324] ss:$16 sps:$4 sm:$0xff]  }
 0x1f6   :  { %4471 = vmatprep.subr.bf16.mxu1 %v8844_v34  ;;  %4398 = vmatprep.mubr.bf16.mxu1 %v10409_v15  ;;  %v8853_v15 = vld [vmem:[%s12557_s11 + $0x44c] ss:$16 sps:$4 sm:$0xff]   ;;  %v10889_v34 = vcombine.high %v2455_v53, %v2459_v32  ;;  %v10921_v7 = vcombine.low %v2455_v53, %v2459_v32  ;;  %v8935_v32 = vld [vmem:[%s12557_s11 + $0x608] ss:$16 sps:$4 sm:$0xff]  }
 0x1f7   :  { %4954 = vmatmul.mubr.bf16.vlgmr.msra.gmra.mrb[64].mxu0 %v10731_v4 }
 0x1f8   :  { %5035 = vmatpush1.bf16.msra.mxu0 %v8839_v47  ;;  %4963 = vmatprep.mubr.bf16.mxu0 %v10737_v6  ;;  %v8890_v47 = vld [vmem:[%s12557_s11 + $0x320] ss:$16 sps:$4 sm:$0xff]  }
 0x1f9   :  { %4472 = vmatpush1.bf16.msra.mxu1 %v8842_v48  ;;  %5036 = vmatprep.subr.bf16.mxu0 %v8847_v59  ;;  %v8895_v48 = vld [vmem:[%s12557_s11 + $0x52c] ss:$16 sps:$4 sm:$0xff]   ;;  %v8893_v59 = vld [vmem:[%s12557_s11 + $0x528] ss:$16 sps:$4 sm:$0xff]  }
 0x1fa   :  { %4473 = vmatprep.subr.bf16.mxu1 %v8850_v35  ;;  %v8896_v35 = vld [vmem:[%s12557_s11 + $0x340] ss:$16 sps:$4 sm:$0xff]  }
 0x1fc   :  { %4399 = vmatmul.mubr.bf16.gmra.mrb[116].mxu1 %v10445_v28  ;;  %5037 = vmatpush1.bf16.msra.mxu0 %v8845_v41  ;;  %v8862_v28 = vld [vmem:[%s12557_s11 + $0x284] ss:$16 sps:$4 sm:$0xff]   ;;  %v2463_v41 = vld [vmem:[%s12578_s23 + $0x188] sm:$0xff] }
 0x1fd   :  { %4474 = vmatpush1.bf16.msra.mxu1 %v8848_v49  ;;  %5038 = vmatprep.subr.bf16.mxu0 %v8853_v15  ;;  %v2467_v49 = vld [vmem:[%s12578_s23 + $0x1a8] sm:$0xff]  ;;  %v8904_v15 = vld [vmem:[%s12557_s11 + $0x364] ss:$16 sps:$4 sm:$0xff]  }
 0x1fe   :  { %4475 = vmatprep.subr.bf16.mxu1 %v8856_v50  ;;  %4408 = vmatprep.mubr.bf16.mxu1 %v10451_v31  ;;  %v8865_v31 = vld [vmem:[%s12557_s11 + $0x48c] ss:$16 sps:$4 sm:$0xff]   ;;  %v10927_v50 = vcombine.high %v2463_v41, %v2467_v49  ;;  %v10959_v17 = vcombine.low %v2463_v41, %v2467_v49  ;;  %v8947_v49 = vld [vmem:[%s12557_s11 + $0x648] ss:$16 sps:$4 sm:$0xff]  }
 0x1ff   :  { %4964 = vmatmul.mubr.bf16.gmra.mrb[68].mxu0 %v10769_v42 }
 0x200   :  { %5039 = vmatpush1.bf16.msra.mxu0 %v8851_v10  ;;  %4973 = vmatprep.mubr.bf16.mxu0 %v10775_v3  ;;  %v8902_v10 = vld [vmem:[%s12557_s11 + $0x360] ss:$16 sps:$4 sm:$0xff]  }
 0x201   :  { %4476 = vmatpush1.bf16.msra.mxu1 %v8854_v60  ;;  %5040 = vmatprep.subr.bf16.mxu0 %v8859_v13  ;;  %v8907_v60 = vld [vmem:[%s12557_s11 + $0x56c] ss:$16 sps:$4 sm:$0xff]   ;;  %v8905_v13 = vld [vmem:[%s12557_s11 + $0x568] ss:$16 sps:$4 sm:$0xff]  }
 0x202   :  { %4477 = vmatprep.subr.bf16.mxu1 %v8862_v28  ;;  %v8908_v28 = vld [vmem:[%s12557_s11 + $0x380] ss:$16 sps:$4 sm:$0xff]  }
 0x204   :  { %4409 = vmatmul.mubr.bf16.gmra.mrb[120].mxu1 %v10489_v19  ;;  %5041 = vmatpush1.bf16.msra.mxu0 %v8857_v20  ;;  %v8874_v19 = vld [vmem:[%s12557_s11 + $0x2c4] ss:$16 sps:$4 sm:$0xff]   ;;  %v2471_v20 = vld [vmem:[%s12578_s23 + $0x1c8] sm:$0xff] }
 0x205   :  { %4478 = vmatpush1.bf16.msra.mxu1 %v8860_v22  ;;  %5042 = vmatprep.subr.bf16.mxu0 %v8865_v31  ;;  %v2475_v22 = vld [vmem:[%s12578_s23 + $0x1e8] sm:$0xff]  ;;  %v8916_v31 = vld [vmem:[%s12557_s11 + $0x3a4] ss:$16 sps:$4 sm:$0xff]  }
 0x206   :  { %4479 = vmatprep.subr.bf16.mxu1 %v8868_v43  ;;  %4418 = vmatprep.mubr.bf16.mxu1 %v10495_v12  ;;  %v8877_v12 = vld [vmem:[%s12557_s11 + $0x4cc] ss:$16 sps:$4 sm:$0xff]   ;;  %v10965_v43 = vcombine.high %v2471_v20, %v2475_v22  ;;  %v10997_v45 = vcombine.low %v2471_v20, %v2475_v22  ;;  %v8959_v22 = vld [vmem:[%s12557_s11 + $0x688] ss:$16 sps:$4 sm:$0xff]  }
 0x207   :  { %4974 = vmatmul.mubr.bf16.gmra.mrb[72].mxu0 %v10807_v54 }
 0x208   :  { %5043 = vmatpush1.bf16.msra.mxu0 %v8863_v52  ;;  %4983 = vmatprep.mubr.bf16.mxu0 %v10813_v8  ;;  %v8914_v52 = vld [vmem:[%s12557_s11 + $0x3a0] ss:$16 sps:$4 sm:$0xff]  }
 0x209   :  { %4480 = vmatpush1.bf16.msra.mxu1 %v8866_v56  ;;  %5044 = vmatprep.subr.bf16.mxu0 %v8871_v16  ;;  %v8919_v56 = vld [vmem:[%s12557_s11 + $0x5ac] ss:$16 sps:$4 sm:$0xff]   ;;  %v8917_v16 = vld [vmem:[%s12557_s11 + $0x5a8] ss:$16 sps:$4 sm:$0xff]  }
 0x20a   :  { %4481 = vmatprep.subr.bf16.mxu1 %v8874_v19  ;;  %v8920_v19 = vld [vmem:[%s12557_s11 + $0x3c0] ss:$16 sps:$4 sm:$0xff]  }
 0x20c   :  { %4419 = vmatmul.mubr.bf16.gmra.mrb[124].mxu1 %v10535_v26  ;;  %5045 = vmatpush1.bf16.msra.mxu0 %v8869_v57  ;;  %v8886_v26 = vld [vmem:[%s12557_s11 + $0x304] ss:$16 sps:$4 sm:$0xff]  }
 0x20d   :  { %4482 = vmatpush1.bf16.msra.mxu1 %v8872_v21  ;;  %5046 = vmatprep.subr.bf16.mxu0 %v8877_v12  ;;  %v2416_v57 = vld [vmem:[%s12578_s23 + $0x10] sm:$0xff] }
 0x20e   :  { %4483 = vmatprep.subr.bf16.mxu1 %v8880_v2  ;;  %4428 = vmatprep.mubr.bf16.mxu1 %v10541_v30  ;;  %v8889_v30 = vld [vmem:[%s12557_s11 + $0x50c] ss:$16 sps:$4 sm:$0xff]   ;;  %v2420_v21 = vld [vmem:[%s12578_s23 + $0x30] sm:$0xff] }
 0x20f   :  { %4984 = vmatmul.mubr.bf16.gmra.mrb[76].mxu0 %v10845_v23  ;;  %v8928_v12 = vld [vmem:[%s12557_s11 + $0x3e4] ss:$16 sps:$4 sm:$0xff]   ;;  %v11003_v2 = vcombine.high %v2416_v57, %v2420_v21  ;;  %v11035_v53 = vcombine.low %v2416_v57, %v2420_v21 }
 0x210   :  { %5047 = vmatpush1.bf16.msra.mxu0 %v8875_v24  ;;  %4993 = vmatprep.mubr.bf16.mxu0 %v10851_v46  ;;  %v8926_v24 = vld [vmem:[%s12557_s11 + $0x3e0] ss:$16 sps:$4 sm:$0xff]  }
 0x211   :  { %4484 = vmatpush1.bf16.msra.mxu1 %v8878_v27  ;;  %5048 = vmatprep.subr.bf16.mxu0 %v8883_v0  ;;  %v8931_v27 = vld [vmem:[%s12557_s11 + $0x5ec] ss:$16 sps:$4 sm:$0xff]   ;;  %v8929_v0 = vld [vmem:[%s12557_s11 + $0x5e8] ss:$16 sps:$4 sm:$0xff]   ;;  %v2448_v57 = vld [vmem:[%s12578_s23 + $0x110] sm:$0xff] }
 0x212   :  { %4485 = vmatprep.subr.bf16.mxu1 %v8886_v26  ;;  %v8932_v26 = vld [vmem:[%s12557_s11 + $0x400] ss:$16 sps:$4 sm:$0xff]  }
 0x213   :  { %v2452_v21 = vld [vmem:[%s12578_s23 + $0x130] sm:$0xff] }
 0x214   :  { %4429 = vmatmul.mubr.bf16.gmra.mrb[128].mxu1 %v10575_v51  ;;  %5049 = vmatpush1.bf16.msra.mxu0 %v8881_v18  ;;  %v8898_v51 = vld [vmem:[%s12557_s11 + $0x344] ss:$16 sps:$4 sm:$0xff]  }
 0x215   :  { %4486 = vmatpush1.bf16.msra.mxu1 %v8884_v39  ;;  %5050 = vmatprep.subr.bf16.mxu0 %v8889_v30  ;;  %v2424_v18 = vld [vmem:[%s12578_s23 + $0x50] sm:$0xff] }
 0x216   :  { %4487 = vmatprep.subr.bf16.mxu1 %v8892_v40  ;;  %4438 = vmatprep.mubr.bf16.mxu1 %v10582_v58  ;;  %v8901_v58 = vld [vmem:[%s12557_s11 + $0x54c] ss:$16 sps:$4 sm:$0xff]   ;;  %v2428_v39 = vld [vmem:[%s12578_s23 + $0x70] sm:$0xff] }
 0x217   :  { %4994 = vmatmul.mubr.bf16.gmra.mrb[80].mxu0 %v10883_v1  ;;  %v8940_v30 = vld [vmem:[%s12557_s11 + $0x424] ss:$16 sps:$4 sm:$0xff]   ;;  %v11041_v40 = vcombine.high %v2424_v18, %v2428_v39  ;;  %v11073_v41 = vcombine.low %v2424_v18, %v2428_v39  ;;  %v11166_v18 = vcombine.high %v2448_v57, %v2452_v21 }
 0x218   :  { %5051 = vmatpush1.bf16.msra.mxu0 %v8887_v33  ;;  %5003 = vmatprep.mubr.bf16.mxu0 %v10889_v34  ;;  %v8938_v33 = vld [vmem:[%s12557_s11 + $0x420] ss:$16 sps:$4 sm:$0xff]  }
 0x219   :  { %4488 = vmatpush1.bf16.msra.mxu1 %v8890_v47  ;;  %5052 = vmatprep.subr.bf16.mxu0 %v8895_v48  ;;  %v8943_v47 = vld [vmem:[%s12557_s11 + $0x62c] ss:$16 sps:$4 sm:$0xff]   ;;  %v8941_v48 = vld [vmem:[%s12557_s11 + $0x628] ss:$16 sps:$4 sm:$0xff]  }
 0x21a   :  { %4489 = vmatprep.subr.bf16.mxu1 %v8898_v51  ;;  %v8944_v51 = vld [vmem:[%s12557_s11 + $0x440] ss:$16 sps:$4 sm:$0xff]  }
 0x21c   :  { %4439 = vmatmul.mubr.bf16.gmra.mrb[132].mxu1 %v10614_v11  ;;  %5053 = vmatpush1.bf16.msra.mxu0 %v8893_v59  ;;  %v8910_v11 = vld [vmem:[%s12557_s11 + $0x384] ss:$16 sps:$4 sm:$0xff]  }
 0x21d   :  { %4490 = vmatpush1.bf16.msra.mxu1 %v8896_v35  ;;  %5054 = vmatprep.subr.bf16.mxu0 %v8901_v58  ;;  %v2432_v59 = vld [vmem:[%s12578_s23 + $0x90] sm:$0xff] }
 0x21e   :  { %4491 = vmatprep.subr.bf16.mxu1 %v8904_v15  ;;  %4448 = vmatprep.mubr.bf16.mxu1 %v10621_v5  ;;  %v8913_v5 = vld [vmem:[%s12557_s11 + $0x58c] ss:$16 sps:$4 sm:$0xff]   ;;  %v2436_v35 = vld [vmem:[%s12578_s23 + $0xb0] sm:$0xff] }
 0x21f   :  { %5004 = vmatmul.mubr.bf16.gmra.mrb[84].mxu0 %v10921_v7  ;;  %v8952_v58 = vld [vmem:[%s12557_s11 + $0x464] ss:$16 sps:$4 sm:$0xff]   ;;  %v11079_v15 = vcombine.high %v2432_v59, %v2436_v35  ;;  %v11111_v20 = vcombine.low %v2432_v59, %v2436_v35  ;;  %v8977_v59 = vld [vmem:[%s12557_s11 + $0x6e8] ss:$16 sps:$4 sm:$0xff]   ;;  %v8980_v35 = vld [vmem:[%s12557_s11 + $0x500] ss:$16 sps:$4 sm:$0xff]  }
 0x220   :  { %5055 = vmatpush1.bf16.msra.mxu0 %v8899_v9  ;;  %5013 = vmatprep.mubr.bf16.mxu0 %v10927_v50  ;;  %v8950_v9 = vld [vmem:[%s12557_s11 + $0x460] ss:$16 sps:$4 sm:$0xff]  }
 0x221   :  { %4492 = vmatpush1.bf16.msra.mxu1 %v8902_v10  ;;  %5056 = vmatprep.subr.bf16.mxu0 %v8907_v60  ;;  %v8955_v10 = vld [vmem:[%s12557_s11 + $0x66c] ss:$16 sps:$4 sm:$0xff]   ;;  %v8953_v60 = vld [vmem:[%s12557_s11 + $0x668] ss:$16 sps:$4 sm:$0xff]  }
 0x222   :  { %4493 = vmatprep.subr.bf16.mxu1 %v8910_v11  ;;  %v8956_v11 = vld [vmem:[%s12557_s11 + $0x480] ss:$16 sps:$4 sm:$0xff]  }
 0x224   :  { %4449 = vmatmul.mubr.bf16.gmra.mrb[136].mxu1 %v10653_v44  ;;  %5057 = vmatpush1.bf16.msra.mxu0 %v8905_v13  ;;  %v8922_v44 = vld [vmem:[%s12557_s11 + $0x3c4] ss:$16 sps:$4 sm:$0xff]  }
 0x225   :  { %4494 = vmatpush1.bf16.msra.mxu1 %v8908_v28  ;;  %5058 = vmatprep.subr.bf16.mxu0 %v8913_v5  ;;  %v2440_v13 = vld [vmem:[%s12578_s23 + $0xd0] sm:$0xff] }
 0x226   :  { %4495 = vmatprep.subr.bf16.mxu1 %v8916_v31  ;;  %4458 = vmatprep.mubr.bf16.mxu1 %v10660_v38  ;;  %v8925_v38 = vld [vmem:[%s12557_s11 + $0x5cc] ss:$16 sps:$4 sm:$0xff]   ;;  %v2444_v28 = vld [vmem:[%s12578_s23 + $0xf0] sm:$0xff]  ;;  %v1340_v31 = vld [vmem:[%s12552_s6] sm:$0x3] }
 0x227   :  { %5014 = vmatmul.mubr.bf16.gmra.mrb[88].mxu0 %v10959_v17  ;;  %v8964_v5 = vld [vmem:[%s12557_s11 + $0x4a4] ss:$16 sps:$4 sm:$0xff]  }
 0x228   :  { %5059 = vmatpush1.bf16.msra.mxu0 %v8911_v37  ;;  %5023 = vmatprep.mubr.bf16.mxu0 %v10965_v43  ;;  %v11120_v37 = vcombine.high %v2440_v13, %v2444_v28 }
 0x229   :  { %4496 = vmatpush1.bf16.msra.mxu1 %v8914_v52  ;;  %5060 = vmatprep.subr.bf16.mxu0 %v8919_v56  ;;  %v8962_v52 = vld [vmem:[%s12557_s11 + $0x4a0] ss:$16 sps:$4 sm:$0xff]   ;;  %v8970_v56 = vld [vmem:[%s12557_s11 + $0x4c4] ss:$16 sps:$4 sm:$0xff]  }
 0x22a   :  { %4497 = vmatprep.subr.bf16.mxu1 %v8922_v44  ;;  %v11134_v44 = vrot.slane %v1340_v31, %v10034_v61 }
 0x22c   :  { %4459 = vmatmul.mubr.bf16.gmra.mrb[140].mxu1 %v10692_v25  ;;  %5061 = vmatpush1.bf16.msra.mxu0 %v8917_v16  ;;  %v8934_v25 = vld [vmem:[%s12557_s11 + $0x404] ss:$16 sps:$4 sm:$0xff]   ;;  %v11137_v16 = vrot.slane %v1340_v31, %v10042_v63 }
 0x22d   :  { %4498 = vmatpush1.bf16.msra.mxu1 %v8920_v19  ;;  %5062 = vmatprep.subr.bf16.mxu0 %v8925_v38  ;;  %v8965_v19 = vld [vmem:[%s12557_s11 + $0x6a8] ss:$16 sps:$4 sm:$0xff]   ;;  %v8973_v38 = vld [vmem:[%s12557_s11 + $0x6cc] ss:$16 sps:$4 sm:$0xff]  }
 0x22e   :  { %4499 = vmatprep.subr.bf16.mxu1 %v8928_v12  ;;  %4501 = vmatprep.mubr.bf16.mxu1 %v10699_v29  ;;  %v8937_v29 = vld [vmem:[%s12557_s11 + $0x60c] ss:$16 sps:$4 sm:$0xff]  }
 0x22f   :  { %5024 = vmatmul.mubr.bf16.gmra.mrb[92].mxu0 %v10997_v45 }
 0x230   :  { %5063 = vmatpush1.bf16.msra.mxu0 %v8923_v62  ;;  %5066 = vmatprep.mubr.bf16.mxu0 %v11003_v2  ;;  %v8976_v62 = vld [vmem:[%s12557_s11 + $0x4e4] ss:$16 sps:$4 sm:$0xff]  }
 0x231   :  { %4500 = vmatpush1.bf16.msra.mxu1 %v8926_v24  ;;  %5064 = vmatprep.subr.bf16.mxu0 %v8931_v27 }
 0x232   :  { %4582 = vmatprep.subr.bf16.mxu1 %v8934_v25  ;;  %v11159_v25 = vcombine.low %v2440_v13, %v2444_v28  ;;  %v11205_v13 = vcombine.low %v2448_v57, %v2452_v21 }
 0x234   :  { %4502 = vmatmul.mubr.bf16.vlgmr.msra.gmra.mrb[112].mxu1 %v10731_v4  ;;  %5065 = vmatpush1.bf16.msra.mxu0 %v8929_v0  ;;  %v8946_v4 = vld [vmem:[%s12557_s11 + $0x444] ss:$16 sps:$4 sm:$0xff]  }
 0x235   :  { %4583 = vmatpush1.bf16.msra.mxu1 %v8932_v26  ;;  %5147 = vmatprep.subr.bf16.mxu0 %v8937_v29  ;;  %v8971_v29 = vld [vmem:[%s12557_s11 + $0x6c8] ss:$16 sps:$4 sm:$0xff]  }
 0x236   :  { %4584 = vmatprep.subr.bf16.mxu1 %v8940_v30  ;;  %4511 = vmatprep.mubr.bf16.mxu1 %v10737_v6  ;;  %v8949_v6 = vld [vmem:[%s12557_s11 + $0x64c] ss:$16 sps:$4 sm:$0xff]  }
 0x237   :  { %5067 = vmatmul.mubr.bf16.vlgmr.msra.gmra.mrb[64].mxu0 %v11035_v53 }
 0x238   :  { %5148 = vmatpush1.bf16.msra.mxu0 %v8935_v32  ;;  %5076 = vmatprep.mubr.bf16.mxu0 %v11041_v40  ;;  %v8974_v32 = vld [vmem:[%s12557_s11 + $0x4e0] ss:$16 sps:$4 sm:$0xff]  }
 0x239   :  { %4585 = vmatpush1.bf16.msra.mxu1 %v8938_v33  ;;  %5149 = vmatprep.subr.bf16.mxu0 %v8943_v47  ;;  %v8982_v47 = vld [vmem:[%s12557_s11 + $0x504] ss:$16 sps:$4 sm:$0xff]  }
 0x23a   :  { %4586 = vmatprep.subr.bf16.mxu1 %v8946_v4 }
 0x23c   :  { %4512 = vmatmul.mubr.bf16.gmra.mrb[116].mxu1 %v10769_v42  ;;  %5150 = vmatpush1.bf16.msra.mxu0 %v8941_v48  ;;  %v8958_v42 = vld [vmem:[%s12557_s11 + $0x484] ss:$16 sps:$4 sm:$0xff]  }
 0x23d   :  { %4587 = vmatpush1.bf16.msra.mxu1 %v8944_v51  ;;  %5151 = vmatprep.subr.bf16.mxu0 %v8949_v6 }
 0x23e   :  { %4588 = vmatprep.subr.bf16.mxu1 %v8952_v58  ;;  %4521 = vmatprep.mubr.bf16.mxu1 %v10775_v3  ;;  %v8961_v3 = vld [vmem:[%s12557_s11 + $0x68c] ss:$16 sps:$4 sm:$0xff]  }
 0x23f   :  { %5077 = vmatmul.mubr.bf16.gmra.mrb[68].mxu0 %v11073_v41  ;;  %v8985_v58 = vld [vmem:[%s12557_s11 + $0x70c] ss:$16 sps:$4 sm:$0xff]  }
 0x240   :  { %5152 = vmatpush1.bf16.msra.mxu0 %v8947_v49  ;;  %5086 = vmatprep.mubr.bf16.mxu0 %v11079_v15  ;;  %v2456_v49 = vld [vmem:[%s12578_s23 + $0x150] sm:$0xff] }
 0x241   :  { %4589 = vmatpush1.bf16.msra.mxu1 %v8950_v9  ;;  %5153 = vmatprep.subr.bf16.mxu0 %v8955_v10  ;;  %v2460_v9 = vld [vmem:[%s12578_s23 + $0x170] sm:$0xff] }
 0x242   :  { %4590 = vmatprep.subr.bf16.mxu1 %v8958_v42  ;;  %v11212_v31 = vcombine.high %v2456_v49, %v2460_v9 }
 0x244   :  { %4522 = vmatmul.mubr.bf16.gmra.mrb[120].mxu1 %v10807_v54  ;;  %5154 = vmatpush1.bf16.msra.mxu0 %v8953_v60  ;;  %v8967_v54 = vld [vmem:[%s12557_s11 + $0x6ac] ss:$16 sps:$4 sm:$0xff]   ;;  %v8988_v60 = vld [vmem:[%s12557_s11 + $0x524] ss:$16 sps:$4 sm:$0xff]  }
 0x245   :  { %4591 = vmatpush1.bf16.msra.mxu1 %v8956_v11  ;;  %5155 = vmatprep.subr.bf16.mxu0 %v8961_v3 }
 0x246   :  { %4592 = vmatprep.subr.bf16.mxu1 %v8964_v5  ;;  %4531 = vmatprep.mubr.bf16.mxu1 %v10813_v8  ;;  %v8968_v8 = vld [vmem:[%s12557_s11 + $0x4c0] ss:$16 sps:$4 sm:$0xff]  }
 0x247   :  { %5087 = vmatmul.mubr.bf16.gmra.mrb[72].mxu0 %v11111_v20 }
 0x248   :  { %5156 = vmatpush1.bf16.msra.mxu0 %v8959_v22  ;;  %5096 = vmatprep.mubr.bf16.mxu0 %v11120_v37  ;;  %v8983_v22 = vld [vmem:[%s12557_s11 + $0x708] ss:$16 sps:$4 sm:$0xff]  }
 0x249   :  { %4593 = vmatpush1.bf16.msra.mxu1 %v8962_v52  ;;  %5157 = vmatprep.subr.bf16.mxu0 %v8967_v54 }
 0x24a   :  { %v1819_v12 = vpop.f32.mrb[32].mxu0  ;;  %4594 = vmatprep.subr.bf16.mxu1 %v8970_v56  ;;  %v8986_v56 = vld [vmem:[%s12557_s11 + $0x520] ss:$16 sps:$4 sm:$0xff]  }
 0x24b   :  { %v7960_v24 = vadd.f32 %v1819_v12, %v11134_v44  ;;  %v1821_v27 = vpop.f32.mrb[33].mxu0 }
 0x24c   :  { %v7961_v0 = vadd.f32 %v1821_v27, %v11137_v16  ;;  %v1823_v26 = vpop.f32.mrb[34].mxu0  ;;  %4532 = vmatmul.mubr.bf16.gmra.mrb[124].mxu1 %v10845_v23  ;;  %5158 = vmatpush1.bf16.msra.mxu0 %v8965_v19  ;;  %v8979_v23 = vld [vmem:[%s12557_s11 + $0x6ec] ss:$16 sps:$4 sm:$0xff]  }
 0x24d   :  { %v7962_v39 = vadd.f32 %v1823_v26, %v11134_v44  ;;  %v1825_v30 = vpop.f32.mrb[35].mxu0  ;;  %4595 = vmatpush1.bf16.msra.mxu1 %v8968_v8  ;;  %5159 = vmatprep.subr.bf16.mxu0 %v8973_v38  ;;  %v1898_v4 = vmax.f32 %v7960_v24, 0.0  ;;  %v8994_v8 = vld [vmem:[%s12557_s11 + $0x544] ss:$16 sps:$4 sm:$0xff]   ;;  %v8992_v24 = vld [vmem:[%s12557_s11 + $0x540] ss:$16 sps:$4 sm:$0xff]  }
 0x24e   :  { %v7963_v33 = vadd.f32 %v1825_v30, %v11137_v16  ;;  %4596 = vmatprep.subr.bf16.mxu1 %v8976_v62  ;;  %4541 = vmatprep.mubr.bf16.mxu1 %v10851_v46  ;;  %v1899_v51 = vmax.f32 %v7961_v0, 0.0  ;;  %v8989_v62 = vld [vmem:[%s12557_s11 + $0x728] ss:$16 sps:$4 sm:$0xff]   ;;  %v8997_v27 = vld [vmem:[%s12557_s11 + $0x74c] ss:$16 sps:$4 sm:$0xff]   ;;  %v2464_v0 = vld [vmem:[%s12578_s23 + $0x190] sm:$0xff] }
 0x24f   :  { %v1900_v48 = vmax.f32 %v7962_v39, 0.0  ;;  %5097 = vmatmul.mubr.bf16.gmra.mrb[76].mxu0 %v11159_v25  ;;  %v2468_v26 = vld [vmem:[%s12578_s23 + $0x1b0] sm:$0xff] }
 0x250   :  { %v1901_v6 = vmax.f32 %v7963_v33, 0.0  ;;  %5160 = vmatpush1.bf16.msra.mxu0 %v8971_v29  ;;  %5106 = vmatprep.mubr.bf16.mxu0 %v11166_v18  ;;  %v9000_v30 = vld [vmem:[%s12557_s11 + $0x564] ss:$16 sps:$4 sm:$0xff]   ;;  %v11251_v33 = vcombine.low %v2456_v49, %v2460_v9 }
 0x251   :  { %v11188_v46 = vpack.c.bf16 %v1900_v48, %v1898_v4  ;;  %4597 = vmatpush1.bf16.msra.mxu1 %v8974_v32  ;;  %5161 = vmatprep.subr.bf16.mxu0 %v8979_v23  ;;  %v8995_v48 = vld [vmem:[%s12557_s11 + $0x748] ss:$16 sps:$4 sm:$0xff]   ;;  %v9006_v49 = vld [vmem:[%s12557_s11 + $0x584] ss:$16 sps:$4 sm:$0xff]  }
 0x252   :  { %v11199_v10 = vpack.c.bf16 %v1901_v6, %v1899_v51  ;;  %v1829_v42 = vpop.f32.mrb[36].mxu0  ;;  %4598 = vmatprep.subr.bf16.mxu1 %v8982_v47  ;;  %v11258_v51 = vcombine.high %v2464_v0, %v2468_v26 }
 0x253   :  { %v7964_v11 = vadd.f32 %v1829_v42, %v11134_v44  ;;  %v1831_v3 = vpop.f32.mrb[37].mxu0 }
 0x254   :  { %v7965_v28 = vadd.f32 %v1831_v3, %v11137_v16  ;;  %v1833_v5 = vpop.f32.mrb[38].mxu0  ;;  %4542 = vmatmul.mubr.bf16.gmra.mrb[128].mxu1 %v10883_v1  ;;  %5162 = vmatpush1.bf16.msra.mxu0 %v8977_v59  ;;  %v8991_v1 = vld [vmem:[%s12557_s11 + $0x72c] ss:$16 sps:$4 sm:$0xff]   ;;  %v9001_v3 = vld [vmem:[%s12557_s11 + $0x768] ss:$16 sps:$4 sm:$0xff]  }
 0x255   :  { %v7966_v52 = vadd.f32 %v1833_v5, %v11134_v44  ;;  %v1835_v54 = vpop.f32.mrb[39].mxu0  ;;  %4599 = vmatpush1.bf16.msra.mxu1 %v8980_v35  ;;  %5163 = vmatprep.subr.bf16.mxu0 %v8985_v58  ;;  %v1902_v38 = vmax.f32 %v7964_v11, 0.0  ;;  %v8998_v35 = vld [vmem:[%s12557_s11 + $0x560] ss:$16 sps:$4 sm:$0xff]   ;;  %v9009_v5 = vld [vmem:[%s12557_s11 + $0x78c] ss:$16 sps:$4 sm:$0xff]  }
 0x256   :  { %v7967_v19 = vadd.f32 %v1835_v54, %v11137_v16  ;;  %4600 = vmatprep.subr.bf16.mxu1 %v8988_v60  ;;  %4551 = vmatprep.mubr.bf16.mxu1 %v10889_v34  ;;  %v1903_v21 = vmax.f32 %v7965_v28, 0.0  ;;  %v9004_v28 = vld [vmem:[%s12557_s11 + $0x580] ss:$16 sps:$4 sm:$0xff]  }
 0x257   :  { %v1904_v57 = vmax.f32 %v7966_v52, 0.0  ;;  %5107 = vmatmul.mubr.bf16.gmra.mrb[80].mxu0 %v11205_v13  ;;  %v2476_v52 = vld [vmem:[%s12578_s23 + $0x1f0] sm:$0xff] }
 0x258   :  { %v1905_v12 = vmax.f32 %v7967_v19, 0.0  ;;  %5164 = vmatpush1.bf16.msra.mxu0 %v8983_v22  ;;  %5116 = vmatprep.mubr.bf16.mxu0 %v11212_v31  ;;  %v2472_v22 = vld [vmem:[%s12578_s23 + $0x1d0] sm:$0xff] }
 0x259   :  { %v11234_v34 = vpack.c.bf16 %v1904_v57, %v1902_v38  ;;  %4601 = vmatpush1.bf16.msra.mxu1 %v8986_v56  ;;  %5165 = vmatprep.subr.bf16.mxu0 %v8991_v1  ;;  %v9012_v1 = vld [vmem:[%s12557_s11 + $0x5a4] ss:$16 sps:$4 sm:$0xff]   ;;  %v11297_v38 = vcombine.low %v2464_v0, %v2468_v26  ;;  %v9010_v0 = vld [vmem:[%s12557_s11 + $0x5a0] ss:$16 sps:$4 sm:$0xff]  }
 0x25a   :  { %v11245_v29 = vpack.c.bf16 %v1905_v12, %v1903_v21  ;;  %v1839_v39 = vpop.f32.mrb[40].mxu0  ;;  %4602 = vmatprep.subr.bf16.mxu1 %v8994_v8  ;;  %v9007_v12 = vld [vmem:[%s12557_s11 + $0x788] ss:$16 sps:$4 sm:$0xff]  }
 0x25b   :  { %v7968_v32 = vadd.f32 %v1839_v39, %v11134_v44  ;;  %v1841_v23 = vpop.f32.mrb[41].mxu0  ;;  %v9018_v39 = vld [vmem:[%s12557_s11 + $0x5c4] ss:$16 sps:$4 sm:$0xff]  }
 0x25c   :  { %v7969_v47 = vadd.f32 %v1841_v23, %v11137_v16  ;;  %v1843_v4 = vpop.f32.mrb[42].mxu0  ;;  %4552 = vmatmul.mubr.bf16.gmra.mrb[132].mxu1 %v10921_v7  ;;  %5166 = vmatpush1.bf16.msra.mxu0 %v8989_v62  ;;  %v9003_v7 = vld [vmem:[%s12557_s11 + $0x76c] ss:$16 sps:$4 sm:$0xff]   ;;  %v11304_v62 = vcombine.high %v2472_v22, %v2476_v52 }
 0x25d   :  { %v7970_v6 = vadd.f32 %v1843_v4, %v11134_v44  ;;  %v1845_v59 = vpop.f32.mrb[43].mxu0  ;;  %4603 = vmatpush1.bf16.msra.mxu1 %v8992_v24  ;;  %5167 = vmatprep.subr.bf16.mxu0 %v8997_v27  ;;  %v1906_v9 = vmax.f32 %v7968_v32, 0.0  ;;  %v9013_v4 = vld [vmem:[%s12557_s11 + $0x7a8] ss:$16 sps:$4 sm:$0xff]  }
 0x25e   :  { %v7971_v58 = vadd.f32 %v1845_v59, %v11137_v16  ;;  %4604 = vmatprep.subr.bf16.mxu1 %v9000_v30  ;;  %4561 = vmatprep.mubr.bf16.mxu1 %v10927_v50  ;;  %v1907_v60 = vmax.f32 %v7969_v47, 0.0  ;;  %v2417_v59 = vld [vmem:[%s12578_s23 + $0x18] sm:$0xff] }
 0x25f   :  { %v1908_v42 = vmax.f32 %v7970_v6, 0.0  ;;  %5117 = vmatmul.mubr.bf16.gmra.mrb[84].mxu0 %v11251_v33  ;;  %v9021_v6 = vld [vmem:[%s12557_s11 + $0x7cc] ss:$16 sps:$4 sm:$0xff]  }
 0x260   :  { %v1909_v11 = vmax.f32 %v7971_v58, 0.0  ;;  %5168 = vmatpush1.bf16.msra.mxu0 %v8995_v48  ;;  %5126 = vmatprep.mubr.bf16.mxu0 %v11258_v51  ;;  %v9016_v48 = vld [vmem:[%s12557_s11 + $0x5c0] ss:$16 sps:$4 sm:$0xff]  }
 0x261   :  { %v11280_v50 = vpack.c.bf16 %v1908_v42, %v1906_v9  ;;  %4605 = vmatpush1.bf16.msra.mxu1 %v8998_v35  ;;  %5169 = vmatprep.subr.bf16.mxu0 %v9003_v7  ;;  %v2421_v35 = vld [vmem:[%s12578_s23 + $0x38] sm:$0xff] }
 0x262   :  { %v11291_v54 = vpack.c.bf16 %v1909_v11, %v1907_v60  ;;  %v1849_v56 = vpop.f32.mrb[44].mxu0  ;;  %4606 = vmatprep.subr.bf16.mxu1 %v9006_v49  ;;  %v9024_v49 = vld [vmem:[%s12557_s11 + $0x5e4] ss:$16 sps:$4 sm:$0xff]   ;;  %v11343_v60 = vcombine.low %v2472_v22, %v2476_v52  ;;  %v9022_v22 = vld [vmem:[%s12557_s11 + $0x5e0] ss:$16 sps:$4 sm:$0xff]  }
 0x263   :  { %v7972_v19 = vadd.f32 %v1849_v56, %v11134_v44  ;;  %v1851_v8 = vpop.f32.mrb[45].mxu0 }
 0x264   :  { %v7973_v57 = vadd.f32 %v1851_v8, %v11137_v16  ;;  %v1853_v21 = vpop.f32.mrb[46].mxu0  ;;  %4562 = vmatmul.mubr.bf16.gmra.mrb[136].mxu1 %v10959_v17  ;;  %5170 = vmatpush1.bf16.msra.mxu0 %v9001_v3  ;;  %v9015_v17 = vld [vmem:[%s12557_s11 + $0x7ac] ss:$16 sps:$4 sm:$0xff]  }
 0x265   :  { %v7974_v24 = vadd.f32 %v1853_v21, %v11134_v44  ;;  %v1855_v27 = vpop.f32.mrb[47].mxu0  ;;  %4607 = vmatpush1.bf16.msra.mxu1 %v9004_v28  ;;  %5171 = vmatprep.subr.bf16.mxu0 %v9009_v5  ;;  %v1910_v30 = vmax.f32 %v7972_v19, 0.0  ;;  %v9019_v28 = vld [vmem:[%s12557_s11 + $0x7c8] ss:$16 sps:$4 sm:$0xff]   ;;  %v11350_v5 = vcombine.high %v2417_v59, %v2421_v35  ;;  %v9030_v19 = vld [vmem:[%s12557_s11 + $0x604] ss:$16 sps:$4 sm:$0xff]  }
 0x266   :  { %v7975_v26 = vadd.f32 %v1855_v27, %v11137_v16  ;;  %4608 = vmatprep.subr.bf16.mxu1 %v9012_v1  ;;  %4571 = vmatprep.mubr.bf16.mxu1 %v10965_v43  ;;  %v1911_v23 = vmax.f32 %v7973_v57, 0.0  ;;  %v9028_v27 = vld [vmem:[%s12557_s11 + $0x600] ss:$16 sps:$4 sm:$0xff]  }
 0x267   :  { %v1912_v32 = vmax.f32 %v7974_v24, 0.0  ;;  %5127 = vmatmul.mubr.bf16.gmra.mrb[88].mxu0 %v11297_v38  ;;  %v9025_v24 = vld [vmem:[%s12557_s11 + $0x7e8] ss:$16 sps:$4 sm:$0xff]  }
 0x268   :  { %v1913_v47 = vmax.f32 %v7975_v26, 0.0  ;;  %5172 = vmatpush1.bf16.msra.mxu0 %v9007_v12  ;;  %5136 = vmatprep.mubr.bf16.mxu0 %v11304_v62  ;;  %v2429_v26 = vld [vmem:[%s12578_s23 + $0x78] sm:$0xff] }
 0x269   :  { %v11326_v43 = vpack.c.bf16 %v1912_v32, %v1910_v30  ;;  %4609 = vmatpush1.bf16.msra.mxu1 %v9010_v0  ;;  %5173 = vmatprep.subr.bf16.mxu0 %v9015_v17  ;;  %v9033_v0 = vld [vmem:[%s12562_s16 + $0x4] ss:$8 sps:$4 sm:$0xff]   ;;  %v2425_v17 = vld [vmem:[%s12578_s23 + $0x58] sm:$0xff] }
 0x26a   :  { %v11337_v7 = vpack.c.bf16 %v1913_v47, %v1911_v23  ;;  %v1859_v58 = vpop.f32.mrb[48].mxu0  ;;  %4610 = vmatprep.subr.bf16.mxu1 %v9018_v39  ;;  %v9036_v32 = vld [vmem:[%s12557_s11 + $0x624] ss:$16 sps:$4 sm:$0xff]  }
 0x26b   :  { %v7976_v9 = vadd.f32 %v1859_v58, %v11134_v44  ;;  %v1861_v42 = vpop.f32.mrb[49].mxu0  ;;  %v9031_v58 = vld [vmem:[%s12562_s16] ss:$8 sps:$4 sm:$0xff]  }
 0x26c   :  { %v7977_v11 = vadd.f32 %v1861_v42, %v11137_v16  ;;  %v1863_v3 = vpop.f32.mrb[50].mxu0  ;;  %4572 = vmatmul.mubr.bf16.gmra.mrb[140].mxu1 %v10997_v45  ;;  %5174 = vmatpush1.bf16.msra.mxu0 %v9013_v4  ;;  %v9027_v45 = vld [vmem:[%s12557_s11 + $0x7ec] ss:$16 sps:$4 sm:$0xff]   ;;  %v11389_v4 = vcombine.low %v2417_v59, %v2421_v35  ;;  %v9034_v59 = vld [vmem:[%s12557_s11 + $0x620] ss:$16 sps:$4 sm:$0xff]  }
 0x26d   :  { %v7978_v56 = vadd.f32 %v1863_v3, %v11134_v44  ;;  %v1865_v1 = vpop.f32.mrb[51].mxu0  ;;  %4611 = vmatpush1.bf16.msra.mxu1 %v9016_v48  ;;  %5175 = vmatprep.subr.bf16.mxu0 %v9021_v6  ;;  %v1914_v8 = vmax.f32 %v7976_v9, 0.0 }
 0x26e   :  { %v7979_v52 = vadd.f32 %v1865_v1, %v11137_v16  ;;  %4612 = vmatprep.subr.bf16.mxu1 %v9024_v49  ;;  %4614 = vmatprep.mubr.bf16.mxu1 %v11003_v2  ;;  %v1915_v21 = vmax.f32 %v7977_v11, 0.0  ;;  %v11396_v49 = vcombine.high %v2425_v17, %v2429_v26  ;;  %v9042_v11 = vld [vmem:[%s12557_s11 + $0x644] ss:$16 sps:$4 sm:$0xff]  }
 0x26f   :  { %v1916_v57 = vmax.f32 %v7978_v56, 0.0  ;;  %5137 = vmatmul.mubr.bf16.gmra.mrb[92].mxu0 %v11343_v60 }
 0x270   :  { %v1917_v12 = vmax.f32 %v7979_v52, 0.0  ;;  %5176 = vmatpush1.bf16.msra.mxu0 %v9019_v28  ;;  %5179 = vmatprep.mubr.bf16.mxu0 %v11350_v5  ;;  %v9045_v52 = vld [vmem:[%s12562_s16 + $0x24] ss:$8 sps:$4 sm:$0xff]  }
 0x271   :  { %v11372_v2 = vpack.c.bf16 %v1916_v57, %v1914_v8  ;;  %4613 = vmatpush1.bf16.msra.mxu1 %v9022_v22  ;;  %5177 = vmatprep.subr.bf16.mxu0 %v9027_v45  ;;  %v9037_v22 = vld [vmem:[%s12562_s16 + $0x10] ss:$8 sps:$4 sm:$0xff]  }
 0x272   :  { %v11383_v39 = vpack.c.bf16 %v1917_v12, %v1915_v21  ;;  %v1869_v30 = vpop.f32.mrb[52].mxu0  ;;  %4695 = vmatprep.subr.bf16.mxu1 %v9030_v19  ;;  %v9040_v45 = vld [vmem:[%s12557_s11 + $0x640] ss:$16 sps:$4 sm:$0xff]   ;;  %v2433_v19 = vld [vmem:[%s12578_s23 + $0x98] sm:$0xff]  ;;  %v9048_v12 = vld [vmem:[%s12557_s11 + $0x664] ss:$16 sps:$4 sm:$0xff]  }
 0x273   :  { %v7980_v23 = vadd.f32 %v1869_v30, %v11134_v44  ;;  %v1871_v47 = vpop.f32.mrb[53].mxu0  ;;  %v2437_v8 = vld [vmem:[%s12578_s23 + $0xb8] sm:$0xff] }
 0x274   :  { %v7981_v48 = vadd.f32 %v1871_v47, %v11137_v16  ;;  %v1873_v6 = vpop.f32.mrb[54].mxu0  ;;  %4615 = vmatmul.mubr.bf16.vlgmr.msra.gmra.mrb[112].mxu1 %v11035_v53  ;;  %5178 = vmatpush1.bf16.msra.mxu0 %v9025_v24  ;;  %v9039_v53 = vld [vmem:[%s12562_s16 + $0x14] ss:$8 sps:$4 sm:$0xff]   ;;  %v11442_v47 = vcombine.high %v2433_v19, %v2437_v8 }
 0x275   :  { %v7982_v9 = vadd.f32 %v1873_v6, %v11134_v44  ;;  %v1875_v42 = vpop.f32.mrb[55].mxu0  ;;  %4696 = vmatpush1.bf16.msra.mxu1 %v9028_v27  ;;  %6250 = vmatprep.subr.bf16.mxu0 %v9033_v0  ;;  %v1918_v3 = vmax.f32 %v7980_v23, 0.0  ;;  %v11435_v0 = vcombine.low %v2425_v17, %v2429_v26  ;;  %v9043_v23 = vld [vmem:[%s12562_s16 + $0x20] ss:$8 sps:$4 sm:$0xff]  }
 0x276   :  { %v7983_v35 = vadd.f32 %v1875_v42, %v11137_v16  ;;  %4697 = vmatprep.subr.bf16.mxu1 %v9036_v32  ;;  %4624 = vmatprep.mubr.bf16.mxu1 %v11041_v40  ;;  %v1919_v56 = vmax.f32 %v7981_v48, 0.0  ;;  %v9046_v17 = vld [vmem:[%s12557_s11 + $0x660] ss:$16 sps:$4 sm:$0xff]  }
 0x277   :  { %v1920_v28 = vmax.f32 %v7982_v9, 0.0  ;;  %5180 = vmatmul.mubr.bf16.vlgmr.msra.gmra.mrb[64].mxu0 %v11389_v4 }
 0x278   :  { %v1921_v1 = vmax.f32 %v7983_v35, 0.0  ;;  %6251 = vmatpush1.bf16.msra.mxu0 %v9031_v58  ;;  %5189 = vmatprep.mubr.bf16.mxu0 %v11396_v49  ;;  %v9054_v58 = vld [vmem:[%s12557_s11 + $0x684] ss:$16 sps:$4 sm:$0xff]  }
 0x279   :  { %v11418_v40 = vpack.c.bf16 %v1920_v28, %v1918_v3  ;;  %4698 = vmatpush1.bf16.msra.mxu1 %v9034_v59  ;;  %6252 = vmatprep.subr.bf16.mxu0 %v9039_v53  ;;  %v9049_v59 = vld [vmem:[%s12562_s16 + $0x30] ss:$8 sps:$4 sm:$0xff]   ;;  %v9057_v28 = vld [vmem:[%s12562_s16 + $0x44] ss:$8 sps:$4 sm:$0xff]  }
 0x27a   :  { %v11429_v57 = vpack.c.bf16 %v1921_v1, %v1919_v56  ;;  %v1879_v21 = vpop.f32.mrb[56].mxu0  ;;  %4699 = vmatprep.subr.bf16.mxu1 %v9042_v11  ;;  %v9052_v11 = vld [vmem:[%s12557_s11 + $0x680] ss:$16 sps:$4 sm:$0xff]   ;;  %v2441_v56 = vld [vmem:[%s12578_s23 + $0xd8] sm:$0xff] }
 0x27b   :  { %v7984_v24 = vadd.f32 %v1879_v21, %v11134_v44  ;;  %v1881_v27 = vpop.f32.mrb[57].mxu0  ;;  %v2445_v1 = vld [vmem:[%s12578_s23 + $0xf8] sm:$0xff] }
 0x27c   :  { %v7985_v30 = vadd.f32 %v1881_v27, %v11137_v16  ;;  %v1883_v32 = vpop.f32.mrb[58].mxu0  ;;  %4625 = vmatmul.mubr.bf16.gmra.mrb[116].mxu1 %v11073_v41  ;;  %6253 = vmatpush1.bf16.msra.mxu0 %v9037_v22  ;;  %v9051_v41 = vld [vmem:[%s12562_s16 + $0x34] ss:$8 sps:$4 sm:$0xff]  }
 0x27d   :  { %v7986_v48 = vadd.f32 %v1883_v32, %v11134_v44  ;;  %v1885_v6 = vpop.f32.mrb[59].mxu0  ;;  %4700 = vmatpush1.bf16.msra.mxu1 %v9040_v45  ;;  %6254 = vmatprep.subr.bf16.mxu0 %v9045_v52  ;;  %v1922_v9 = vmax.f32 %v7984_v24, 0.0  ;;  %v9060_v52 = vld [vmem:[%s12557_s11 + $0x6a4] ss:$16 sps:$4 sm:$0xff]   ;;  %v11484_v24 = vcombine.low %v2433_v19, %v2437_v8 }
 0x27e   :  { %v7987_v26 = vadd.f32 %v1885_v6, %v11137_v16  ;;  %4701 = vmatprep.subr.bf16.mxu1 %v9048_v12  ;;  %4634 = vmatprep.mubr.bf16.mxu1 %v11079_v15  ;;  %v1923_v53 = vmax.f32 %v7985_v30, 0.0  ;;  %v2196_v15 = vld [vmem:[%s12556_s10] sm:$0x3]  ;;  %v9063_v8 = vld [vmem:[%s12562_s16 + $0x54] ss:$8 sps:$4 sm:$0xff]  }
 0x27f   :  { %v1924_v42 = vmax.f32 %v7986_v48, 0.0  ;;  %5190 = vmatmul.mubr.bf16.gmra.mrb[68].mxu0 %v11435_v0  ;;  %v11489_v32 = vrot.slane %v2196_v15, %v10034_v61  ;;  %v11494_v48 = vcombine.high %v2441_v56, %v2445_v1  ;;  %v11498_v19 = vrot.slane %v2196_v15, %v10042_v63 }
 0x280   :  { %v1925_v35 = vmax.f32 %v7987_v26, 0.0  ;;  %6255 = vmatpush1.bf16.msra.mxu0 %v9043_v23  ;;  %5199 = vmatprep.mubr.bf16.mxu0 %v11442_v47  ;;  %v9055_v23 = vld [vmem:[%s12562_s16 + $0x40] ss:$8 sps:$4 sm:$0xff]  }
 0x281   :  { %v11467_v3 = vpack.c.bf16 %v1924_v42, %v1922_v9  ;;  %4702 = vmatpush1.bf16.msra.mxu1 %v9046_v17  ;;  %6256 = vmatprep.subr.bf16.mxu0 %v9051_v41  ;;  %v9061_v42 = vld [vmem:[%s12562_s16 + $0x50] ss:$8 sps:$4 sm:$0xff]  }
 0x282   :  { %v11478_v22 = vpack.c.bf16 %v1925_v35, %v1923_v53  ;;  %v1889_v45 = vpop.f32.mrb[60].mxu0  ;;  %4703 = vmatprep.subr.bf16.mxu1 %v9054_v58 }
 0x283   :  { %v7988_v21 = vadd.f32 %v1889_v45, %v11134_v44  ;;  %v1891_v12 = vpop.f32.mrb[61].mxu0  ;;  %v9069_v45 = vld [vmem:[%s12562_s16 + $0x64] ss:$8 sps:$4 sm:$0xff]  }
 0x284   :  { %v7989_v27 = vadd.f32 %v1891_v12, %v11137_v16  ;;  %v1893_v30 = vpop.f32.mrb[62].mxu0  ;;  %4635 = vmatmul.mubr.bf16.gmra.mrb[120].mxu1 %v11111_v20  ;;  %6257 = vmatpush1.bf16.msra.mxu0 %v9049_v59  ;;  %v9058_v20 = vld [vmem:[%s12557_s11 + $0x6a0] ss:$16 sps:$4 sm:$0xff]  }
 0x285   :  { %v7990_v6 = vadd.f32 %v1893_v30, %v11134_v44  ;;  %v1895_v17 = vpop.f32.mrb[63].mxu0  ;;  %4704 = vmatpush1.bf16.msra.mxu1 %v9052_v11  ;;  %6258 = vmatprep.subr.bf16.mxu0 %v9057_v28  ;;  %v9066_v44 = vld [vmem:[%s12557_s11 + $0x6c4] ss:$16 sps:$4 sm:$0xff]   ;;  %v1926_v26 = vmax.f32 %v7988_v21, 0.0  ;;  %v2453_v21 = vld [vmem:[%s12578_s23 + $0x138] sm:$0xff] }
 0x286   :  { %v7991_v41 = vadd.f32 %v1895_v17, %v11137_v16  ;;  %4705 = vmatprep.subr.bf16.mxu1 %v9060_v52  ;;  %4644 = vmatprep.mubr.bf16.mxu1 %v11120_v37  ;;  %v1927_v59 = vmax.f32 %v7989_v27, 0.0  ;;  %v9064_v37 = vld [vmem:[%s12557_s11 + $0x6c0] ss:$16 sps:$4 sm:$0xff]   ;;  %v2449_v52 = vld [vmem:[%s12578_s23 + $0x118] sm:$0xff]  ;;  %v11539_v17 = vcombine.low %v2441_v56, %v2445_v1 }
 0x287   :  { %v1928_v58 = vmax.f32 %v7990_v6, 0.0  ;;  %v2287_v9 = vpop.f32.mrb[80].mxu1  ;;  %5200 = vmatmul.mubr.bf16.gmra.mrb[72].mxu0 %v11484_v24  ;;  %v9070_v56 = vld [vmem:[%s12557_s11 + $0x6e0] ss:$16 sps:$4 sm:$0xff]   ;;  %v9075_v1 = vld [vmem:[%s12562_s16 + $0x74] ss:$8 sps:$4 sm:$0xff]  }
 0x288   :  { %v1929_v53 = vmax.f32 %v7991_v41, 0.0  ;;  %v2288_v16 = vadd.f32 %v2287_v9, %v11489_v32  ;;  %v2289_v35 = vpop.f32.mrb[81].mxu1  ;;  %6259 = vmatpush1.bf16.msra.mxu0 %v9055_v23  ;;  %5209 = vmatprep.mubr.bf16.mxu0 %v11494_v48  ;;  %v9072_v23 = vld [vmem:[%s12557_s11 + $0x6e4] ss:$16 sps:$4 sm:$0xff]   ;;  %v9067_v41 = vld [vmem:[%s12562_s16 + $0x60] ss:$8 sps:$4 sm:$0xff]  }
 0x289   :  { %v11520_v11 = vpack.c.bf16 %v1928_v58, %v1926_v26  ;;  %v2290_v15 = vadd.f32 %v2289_v35, %v11498_v19  ;;  %v2291_v28 = vpop.f32.mrb[82].mxu1  ;;  %4706 = vmatpush1.bf16.msra.mxu1 %v9058_v20  ;;  %6260 = vmatprep.subr.bf16.mxu0 %v9063_v8  ;;  %v11545_v26 = vcombine.high %v2449_v52, %v2453_v21  ;;  %v9078_v9 = vld [vmem:[%s12557_s11 + $0x704] ss:$16 sps:$4 sm:$0xff]   ;;  %v9073_v35 = vld [vmem:[%s12562_s16 + $0x70] ss:$8 sps:$4 sm:$0xff]  }
 0x28a   :  { %v11532_v12 = vpack.c.bf16 %v1929_v53, %v1927_v59  ;;  %v2292_v27 = vadd.f32 %v2291_v28, %v11489_v32  ;;  %v2293_v30 = vpop.f32.mrb[83].mxu1  ;;  %4707 = vmatprep.subr.bf16.mxu1 %v9066_v44  ;;  %v2366_v20 = vmax.f32 %v2288_v16, 0.0  ;;  %v9081_v28 = vld [vmem:[%s12562_s16 + $0x84] ss:$8 sps:$4 sm:$0xff]  }
 0x28b   :  { %v2294_v6 = vadd.f32 %v2293_v30, %v11498_v19  ;;  %v2367_v44 = vmax.f32 %v2290_v15, 0.0 }
 0x28c   :  { %v2368_v8 = vmax.f32 %v2292_v27, 0.0  ;;  %4645 = vmatmul.mubr.bf16.gmra.mrb[124].mxu1 %v11159_v25  ;;  %6261 = vmatpush1.bf16.msra.mxu0 %v9061_v42  ;;  %v2461_v27 = vld [vmem:[%s12578_s23 + $0x178] sm:$0xff] }
 0x28d   :  { %v2369_v58 = vmax.f32 %v2294_v6, 0.0  ;;  %4708 = vmatpush1.bf16.msra.mxu1 %v9064_v37  ;;  %6262 = vmatprep.subr.bf16.mxu0 %v9069_v45  ;;  %v2457_v45 = vld [vmem:[%s12578_s23 + $0x158] sm:$0xff]  ;;  %v9084_v6 = vld [vmem:[%s12557_s11 + $0x724] ss:$16 sps:$4 sm:$0xff]  }
 0x28e   :  { %v11553_v25 = vpack.c.bf16 %v2368_v8, %v2366_v20  ;;  %4709 = vmatprep.subr.bf16.mxu1 %v9072_v23  ;;  %4654 = vmatprep.mubr.bf16.mxu1 %v11166_v18  ;;  %v9076_v18 = vld [vmem:[%s12557_s11 + $0x700] ss:$16 sps:$4 sm:$0xff]   ;;  %v11585_v8 = vcombine.low %v2449_v52, %v2453_v21  ;;  %v9087_v21 = vld [vmem:[%s12562_s16 + $0x94] ss:$8 sps:$4 sm:$0xff]  }
 0x28f   :  { %v11559_v42 = vpack.c.bf16 %v2369_v58, %v2367_v44  ;;  %v2297_v59 = vpop.f32.mrb[84].mxu1  ;;  %5210 = vmatmul.mubr.bf16.gmra.mrb[76].mxu0 %v11539_v17  ;;  %v9079_v58 = vld [vmem:[%s12562_s16 + $0x80] ss:$8 sps:$4 sm:$0xff]  }
 0x290   :  { %v2298_v53 = vadd.f32 %v2297_v59, %v11489_v32  ;;  %v2299_v16 = vpop.f32.mrb[85].mxu1  ;;  %6263 = vmatpush1.bf16.msra.mxu0 %v9067_v41  ;;  %5219 = vmatprep.mubr.bf16.mxu0 %v11545_v26  ;;  %v9082_v52 = vld [vmem:[%s12557_s11 + $0x720] ss:$16 sps:$4 sm:$0xff]   ;;  %v9090_v59 = vld [vmem:[%s12557_s11 + $0x744] ss:$16 sps:$4 sm:$0xff]  }
 0x291   :  { %v2300_v37 = vadd.f32 %v2299_v16, %v11498_v19  ;;  %v2301_v15 = vpop.f32.mrb[86].mxu1  ;;  %4710 = vmatpush1.bf16.msra.mxu1 %v9070_v56  ;;  %6264 = vmatprep.subr.bf16.mxu0 %v9075_v1  ;;  %v11591_v56 = vcombine.high %v2457_v45, %v2461_v27 }
 0x292   :  { %v2302_v30 = vadd.f32 %v2301_v15, %v11489_v32  ;;  %v2303_v23 = vpop.f32.mrb[87].mxu1  ;;  %4711 = vmatprep.subr.bf16.mxu1 %v9078_v9  ;;  %v2370_v41 = vmax.f32 %v2298_v53, 0.0 }
 0x293   :  { %v2304_v20 = vadd.f32 %v2303_v23, %v11498_v19  ;;  %v2371_v1 = vmax.f32 %v2300_v37, 0.0  ;;  %v9085_v37 = vld [vmem:[%s12562_s16 + $0x90] ss:$8 sps:$4 sm:$0xff]  }
 0x294   :  { %v2372_v44 = vmax.f32 %v2302_v30, 0.0  ;;  %4655 = vmatmul.mubr.bf16.gmra.mrb[128].mxu1 %v11205_v13  ;;  %6265 = vmatpush1.bf16.msra.mxu0 %v9073_v35  ;;  %v9093_v30 = vld [vmem:[%s12562_s16 + $0xa4] ss:$8 sps:$4 sm:$0xff]   ;;  %v2465_v23 = vld [vmem:[%s12578_s23 + $0x198] sm:$0xff] }
 0x295   :  { %v2373_v9 = vmax.f32 %v2304_v20, 0.0  ;;  %4712 = vmatpush1.bf16.msra.mxu1 %v9076_v18  ;;  %6266 = vmatprep.subr.bf16.mxu0 %v9081_v28 }
 0x296   :  { %v11599_v13 = vpack.c.bf16 %v2372_v44, %v2370_v41  ;;  %4713 = vmatprep.subr.bf16.mxu1 %v9084_v6  ;;  %4664 = vmatprep.mubr.bf16.mxu1 %v11212_v31  ;;  %v9088_v31 = vld [vmem:[%s12557_s11 + $0x740] ss:$16 sps:$4 sm:$0xff]   ;;  %v2469_v6 = vld [vmem:[%s12578_s23 + $0x1b8] sm:$0xff]  ;;  %v9096_v44 = vld [vmem:[%s12557_s11 + $0x764] ss:$16 sps:$4 sm:$0xff]  }
 0x297   :  { %v11605_v53 = vpack.c.bf16 %v2373_v9, %v2371_v1  ;;  %v2307_v16 = vpop.f32.mrb[88].mxu1  ;;  %5220 = vmatmul.mubr.bf16.gmra.mrb[80].mxu0 %v11585_v8  ;;  %v11631_v1 = vcombine.low %v2457_v45, %v2461_v27  ;;  %v9094_v45 = vld [vmem:[%s12557_s11 + $0x760] ss:$16 sps:$4 sm:$0xff]   ;;  %v9099_v27 = vld [vmem:[%s12562_s16 + $0xb4] ss:$8 sps:$4 sm:$0xff]  }
 0x298   :  { %v2308_v35 = vadd.f32 %v2307_v16, %v11489_v32  ;;  %v2309_v18 = vpop.f32.mrb[89].mxu1  ;;  %6267 = vmatpush1.bf16.msra.mxu0 %v9079_v58  ;;  %5229 = vmatprep.mubr.bf16.mxu0 %v11591_v56  ;;  %v11637_v16 = vcombine.high %v2465_v23, %v2469_v6 }
 0x299   :  { %v2310_v15 = vadd.f32 %v2309_v18, %v11498_v19  ;;  %v2311_v28 = vpop.f32.mrb[90].mxu1  ;;  %4714 = vmatpush1.bf16.msra.mxu1 %v9082_v52  ;;  %6268 = vmatprep.subr.bf16.mxu0 %v9087_v21  ;;  %v9091_v21 = vld [vmem:[%s12562_s16 + $0xa0] ss:$8 sps:$4 sm:$0xff]  }
 0x29a   :  { %v2312_v20 = vadd.f32 %v2311_v28, %v11489_v32  ;;  %v2313_v41 = vpop.f32.mrb[91].mxu1  ;;  %4715 = vmatprep.subr.bf16.mxu1 %v9090_v59  ;;  %v2374_v9 = vmax.f32 %v2308_v35, 0.0  ;;  %v9102_v35 = vld [vmem:[%s12557_s11 + $0x784] ss:$16 sps:$4 sm:$0xff]  }
 0x29b   :  { %v2314_v58 = vadd.f32 %v2313_v41, %v11498_v19  ;;  %v2375_v59 = vmax.f32 %v2310_v15, 0.0 }
 0x29c   :  { %v2376_v52 = vmax.f32 %v2312_v20, 0.0  ;;  %4665 = vmatmul.mubr.bf16.gmra.mrb[132].mxu1 %v11251_v33  ;;  %6269 = vmatpush1.bf16.msra.mxu0 %v9085_v37 }
 0x29d   :  { %v2377_v18 = vmax.f32 %v2314_v58, 0.0  ;;  %4716 = vmatpush1.bf16.msra.mxu1 %v9088_v31  ;;  %6270 = vmatprep.subr.bf16.mxu0 %v9093_v30  ;;  %v9097_v30 = vld [vmem:[%s12562_s16 + $0xb0] ss:$8 sps:$4 sm:$0xff]  }
 0x29e   :  { %v11645_v33 = vpack.c.bf16 %v2376_v52, %v2374_v9  ;;  %4717 = vmatprep.subr.bf16.mxu1 %v9096_v44  ;;  %4674 = vmatprep.mubr.bf16.mxu1 %v11258_v51  ;;  %v9100_v51 = vld [vmem:[%s12557_s11 + $0x780] ss:$16 sps:$4 sm:$0xff]   ;;  %v9105_v44 = vld [vmem:[%s12562_s16 + $0xc4] ss:$8 sps:$4 sm:$0xff]   ;;  %v2473_v58 = vld [vmem:[%s12578_s23 + $0x1d8] sm:$0xff] }
 0x29f   :  { %v11651_v37 = vpack.c.bf16 %v2377_v18, %v2375_v59  ;;  %v2317_v31 = vpop.f32.mrb[92].mxu1  ;;  %5230 = vmatmul.mubr.bf16.gmra.mrb[84].mxu0 %v11631_v1  ;;  %v2477_v9 = vld [vmem:[%s12578_s23 + $0x1f8] sm:$0xff]  ;;  %v9108_v59 = vld [vmem:[%s12557_s11 + $0x7a4] ss:$16 sps:$4 sm:$0xff]  }
 0x2a0   :  { %v2318_v15 = vadd.f32 %v2317_v31, %v11489_v32  ;;  %v2319_v28 = vpop.f32.mrb[93].mxu1  ;;  %6271 = vmatpush1.bf16.msra.mxu0 %v9091_v21  ;;  %5239 = vmatprep.mubr.bf16.mxu0 %v11637_v16 }
 0x2a1   :  { %v2320_v20 = vadd.f32 %v2319_v28, %v11498_v19  ;;  %v2321_v41 = vpop.f32.mrb[94].mxu1  ;;  %4718 = vmatpush1.bf16.msra.mxu1 %v9094_v45  ;;  %6272 = vmatprep.subr.bf16.mxu0 %v9099_v27  ;;  %v11677_v45 = vcombine.low %v2465_v23, %v2469_v6  ;;  %v9103_v28 = vld [vmem:[%s12562_s16 + $0xc0] ss:$8 sps:$4 sm:$0xff]   ;;  %v9111_v6 = vld [vmem:[%s12562_s16 + $0xd4] ss:$8 sps:$4 sm:$0xff]  }
 0x2a2   :  { %v2322_v52 = vadd.f32 %v2321_v41, %v11489_v32  ;;  %v2323_v21 = vpop.f32.mrb[95].mxu1  ;;  %4719 = vmatprep.subr.bf16.mxu1 %v9102_v35  ;;  %v2378_v27 = vmax.f32 %v2318_v15, 0.0  ;;  %v11683_v41 = vcombine.high %v2473_v58, %v2477_v9  ;;  %v9106_v23 = vld [vmem:[%s12557_s11 + $0x7a0] ss:$16 sps:$4 sm:$0xff]   ;;  %v9114_v15 = vld [vmem:[%s12557_s11 + $0x7c4] ss:$16 sps:$4 sm:$0xff]  }
 0x2a3   :  { %v2324_v18 = vadd.f32 %v2323_v21, %v11498_v19  ;;  %v2379_v35 = vmax.f32 %v2320_v20, 0.0 }
 0x2a4   :  { %v2380_v31 = vmax.f32 %v2322_v52, 0.0  ;;  %4675 = vmatmul.mubr.bf16.gmra.mrb[136].mxu1 %v11297_v38  ;;  %6273 = vmatpush1.bf16.msra.mxu0 %v9097_v30  ;;  %v9109_v52 = vld [vmem:[%s12562_s16 + $0xd0] ss:$8 sps:$4 sm:$0xff]  }
 0x2a5   :  { %v2381_v36 = vmax.f32 %v2324_v18, 0.0  ;;  %4720 = vmatpush1.bf16.msra.mxu1 %v9100_v51  ;;  %6274 = vmatprep.subr.bf16.mxu0 %v9105_v44 }
 0x2a6   :  { %v11691_v38 = vpack.c.bf16 %v2380_v31, %v2378_v27  ;;  %4721 = vmatprep.subr.bf16.mxu1 %v9108_v59  ;;  %4684 = vmatprep.mubr.bf16.mxu1 %v11304_v62  ;;  %v9117_v59 = vld [vmem:[%s12562_s16 + $0xe4] ss:$8 sps:$4 sm:$0xff]  }
 0x2a7   :  { %v11697_v30 = vpack.c.bf16 %v2381_v36, %v2379_v35  ;;  %v2327_v51 = vpop.f32.mrb[96].mxu1  ;;  %5240 = vmatmul.mubr.bf16.gmra.mrb[88].mxu0 %v11677_v45  ;;  %v9112_v36 = vld [vmem:[%s12557_s11 + $0x7c0] ss:$16 sps:$4 sm:$0xff]   ;;  %v9120_v31 = vld [vmem:[%s12557_s11 + $0x7e4] ss:$16 sps:$4 sm:$0xff]   ;;  %v11717_v35 = vcombine.low %v2473_v58, %v2477_v9 }
 0x2a8   :  { %v2328_v20 = vadd.f32 %v2327_v51, %v11489_v32  ;;  %v2329_v44 = vpop.f32.mrb[97].mxu1  ;;  %6275 = vmatpush1.bf16.msra.mxu0 %v9103_v28  ;;  %5249 = vmatprep.mubr.bf16.mxu0 %v11683_v41  ;;  %v9115_v51 = vld [vmem:[%s12562_s16 + $0xe0] ss:$8 sps:$4 sm:$0xff]   ;;  %v9123_v58 = vld [vmem:[%s12562_s16 + $0xf4] ss:$8 sps:$4 sm:$0xff]  }
 0x2a9   :  { %v2330_v62 = vadd.f32 %v2329_v44, %v11498_v19  ;;  %v2331_v21 = vpop.f32.mrb[98].mxu1  ;;  %4722 = vmatpush1.bf16.msra.mxu1 %v9106_v23  ;;  %6276 = vmatprep.subr.bf16.mxu0 %v9111_v6 }
 0x2aa   :  { %v2332_v18 = vadd.f32 %v2331_v21, %v11489_v32  ;;  %v2333_v27 = vpop.f32.mrb[99].mxu1  ;;  %4723 = vmatprep.subr.bf16.mxu1 %v9114_v15  ;;  %v2382_v23 = vmax.f32 %v2328_v20, 0.0  ;;  %v9118_v15 = vld [vmem:[%s12557_s11 + $0x7e0] ss:$16 sps:$4 sm:$0xff]  }
 0x2ab   :  { %v2334_v28 = vadd.f32 %v2333_v27, %v11498_v19  ;;  %v2383_v44 = vmax.f32 %v2330_v62, 0.0 }
 0x2ac   :  { %v2384_v6 = vmax.f32 %v2332_v18, 0.0  ;;  %4685 = vmatmul.mubr.bf16.gmra.mrb[140].mxu1 %v11343_v60  ;;  %6277 = vmatpush1.bf16.msra.mxu0 %v9109_v52 }
 0x2ad   :  { %v2385_v21 = vmax.f32 %v2334_v28, 0.0  ;;  %4724 = vmatpush1.bf16.msra.mxu1 %v9112_v36  ;;  %6278 = vmatprep.subr.bf16.mxu0 %v9117_v59  ;;  %v9121_v36 = vld [vmem:[%s12562_s16 + $0xf0] ss:$8 sps:$4 sm:$0xff]  }
 0x2ae   :  { %v11729_v9 = vpack.c.bf16 %v2384_v6, %v2382_v23  ;;  %4725 = vmatprep.subr.bf16.mxu1 %v9120_v31  ;;  %4727 = vmatprep.mubr.bf16.mxu1 %v11350_v5  ;;  %v9126_v5 = vld [vmem:[%s12561_s15 + $0x4] ss:$8 sps:$4 sm:$0xff]   ;;  %v9124_v6 = vld [vmem:[%s12561_s15] ss:$8 sps:$4 sm:$0xff]  }
 0x2af   :  { %v11732_v60 = vpack.c.bf16 %v2385_v21, %v2383_v44  ;;  %v2337_v20 = vpop.f32.mrb[100].mxu1  ;;  %5250 = vmatmul.mubr.bf16.gmra.mrb[92].mxu0 %v11717_v35  ;;  %v9129_v21 = vld [vmem:[%s12561_s15 + $0x14] ss:$8 sps:$4 sm:$0xff]  }
 0x2b0   :  { %v2338_v52 = vadd.f32 %v2337_v20, %v11489_v32  ;;  %v2339_v62 = vpop.f32.mrb[101].mxu1  ;;  %6279 = vmatpush1.bf16.msra.mxu0 %v9115_v51  ;;  %6282 = vmatprep.mubr.bf16.mxu0 %v11559_v42 }
 0x2b1   :  { %v2340_v59 = vadd.f32 %v2339_v62, %v11498_v19  ;;  %v2341_v18 = vpop.f32.mrb[102].mxu1  ;;  %4726 = vmatpush1.bf16.msra.mxu1 %v9118_v15  ;;  %6280 = vmatprep.subr.bf16.mxu0 %v9123_v58 }
 0x2b2   :  { %v2342_v27 = vadd.f32 %v2341_v18, %v11489_v32  ;;  %v2343_v31 = vpop.f32.mrb[103].mxu1  ;;  %v2386_v23 = vmax.f32 %v2338_v52, 0.0 }
 0x2b3   :  { %v2344_v28 = vadd.f32 %v2343_v31, %v11498_v19  ;;  %v2387_v51 = vmax.f32 %v2340_v59, 0.0  ;;  %v9132_v59 = vld [vmem:[%s12561_s15 + $0x24] ss:$8 sps:$4 sm:$0xff]   ;;  %v9130_v31 = vld [vmem:[%s12561_s15 + $0x20] ss:$8 sps:$4 sm:$0xff]  }
 0x2b4   :  { %v2388_v42 = vmax.f32 %v2342_v27, 0.0  ;;  %4728 = vmatmul.mubr.bf16.vlgmr.msra.gmra.mrb[112].mxu1 %v11389_v4  ;;  %6281 = vmatpush1.bf16.msra.mxu0 %v9121_v36 }
 0x2b5   :  { %v2389_v44 = vmax.f32 %v2344_v28, 0.0  ;;  %6523 = vmatprep.subr.bf16.mxu0 %v9126_v5  ;;  %4737 = vmatprep.mubr.bf16.mxu1 %v11396_v49  ;;  %v9127_v49 = vld [vmem:[%s12561_s15 + $0x10] ss:$8 sps:$4 sm:$0xff]  }
 0x2b6   :  { %v11754_v15 = vpack.c.bf16 %v2388_v42, %v2386_v23  ;;  %v9135_v42 = vld [vmem:[%s12561_s15 + $0x34] ss:$8 sps:$4 sm:$0xff]  }
 0x2b7   :  { %v11756_v58 = vpack.c.bf16 %v2389_v44, %v2387_v51  ;;  %v2347_v20 = vpop.f32.mrb[104].mxu1  ;;  %6283 = vmatmul.mubr.bf16.vlgmr.msra.gmra.mrb[96].mxu0 %v11553_v25 }
 0x2b8   :  { %v2348_v4 = vadd.f32 %v2347_v20, %v11489_v32  ;;  %v2349_v52 = vpop.f32.mrb[105].mxu1  ;;  %6292 = vmatprep.mubr.bf16.mxu0 %v11605_v53  ;;  %6524 = vmatpush1.bf16.msra.mxu0 %v9124_v6 }
 0x2b9   :  { %v2350_v62 = vadd.f32 %v2349_v52, %v11498_v19  ;;  %v2351_v36 = vpop.f32.mrb[106].mxu1  ;;  %6525 = vmatprep.subr.bf16.mxu0 %v9129_v21  ;;  %v9138_v52 = vld [vmem:[%s12561_s15 + $0x44] ss:$8 sps:$4 sm:$0xff]  }
 0x2ba   :  { %v2352_v25 = vadd.f32 %v2351_v36, %v11489_v32  ;;  %v2353_v18 = vpop.f32.mrb[107].mxu1  ;;  %v2390_v27 = vmax.f32 %v2348_v4, 0.0 }
 0x2bb   :  { %v2354_v5 = vadd.f32 %v2353_v18, %v11498_v19  ;;  %v2391_v28 = vmax.f32 %v2350_v62, 0.0 }
 0x2bc   :  { %v2392_v53 = vmax.f32 %v2352_v25, 0.0  ;;  %4738 = vmatmul.mubr.bf16.gmra.mrb[116].mxu1 %v11435_v0  ;;  %6526 = vmatpush1.bf16.msra.mxu0 %v9127_v49 }
 0x2bd   :  { %v2393_v23 = vmax.f32 %v2354_v5, 0.0  ;;  %6527 = vmatprep.subr.bf16.mxu0 %v9132_v59  ;;  %4747 = vmatprep.mubr.bf16.mxu1 %v11442_v47  ;;  %v9133_v47 = vld [vmem:[%s12561_s15 + $0x30] ss:$8 sps:$4 sm:$0xff]   ;;  %v9136_v59 = vld [vmem:[%s12561_s15 + $0x40] ss:$8 sps:$4 sm:$0xff]  }
 0x2be   :  { %v11778_v6 = vpack.c.bf16 %v2392_v53, %v2390_v27  ;;  %v9142_v27 = vld [vmem:[%s12561_s15 + $0x60] ss:$8 sps:$4 sm:$0xff]   ;;  %v9177_v53 = vld [vmem:[%s12559_s13 + $0x14] ss:$8 sps:$4 sm:$0xff]  }
 0x2bf   :  { %v11780_v51 = vpack.c.bf16 %v2393_v23, %v2391_v28  ;;  %v2357_v44 = vpop.f32.mrb[108].mxu1  ;;  %6293 = vmatmul.mubr.bf16.gmra.mrb[100].mxu0 %v11599_v13  ;;  %v9151_v28 = vld [vmem:[%s12561_s15 + $0x90] ss:$8 sps:$4 sm:$0xff]   ;;  %v9156_v23 = vld [vmem:[%s12561_s15 + $0xa4] ss:$8 sps:$4 sm:$0xff]  }
 0x2c0   :  { %v2358_v0 = vadd.f32 %v2357_v44, %v11489_v32  ;;  %v2359_v21 = vpop.f32.mrb[109].mxu1  ;;  %6302 = vmatprep.mubr.bf16.mxu0 %v11651_v37  ;;  %6528 = vmatpush1.bf16.msra.mxu0 %v9130_v31  ;;  %v9153_v31 = vld [vmem:[%s12561_s15 + $0x94] ss:$8 sps:$4 sm:$0xff]  }
 0x2c1   :  { %v2360_v20 = vadd.f32 %v2359_v21, %v11498_v19  ;;  %v2361_v4 = vpop.f32.mrb[110].mxu1  ;;  %6529 = vmatprep.subr.bf16.mxu0 %v9135_v42  ;;  %v9183_v42 = vld [vmem:[%s12559_s13 + $0x34] ss:$8 sps:$4 sm:$0xff]   ;;  %v9162_v21 = vld [vmem:[%s12561_s15 + $0xc4] ss:$8 sps:$4 sm:$0xff]  }
 0x2c2   :  { %v2362_v13 = vadd.f32 %v2361_v4, %v11489_v32  ;;  %v2363_v49 = vpop.f32.mrb[111].mxu1  ;;  %v2394_v36 = vmax.f32 %v2358_v0, 0.0  ;;  %v9141_v32 = vld [vmem:[%s12561_s15 + $0x54] ss:$8 sps:$4 sm:$0xff]   ;;  %v9157_v0 = vld [vmem:[%s12561_s15 + $0xb0] ss:$8 sps:$4 sm:$0xff]  }
 0x2c3   :  { %v2364_v62 = vadd.f32 %v2363_v49, %v11498_v19  ;;  %v2395_v25 = vmax.f32 %v2360_v20, 0.0  ;;  %v9159_v44 = vld [vmem:[%s12561_s15 + $0xb4] ss:$8 sps:$4 sm:$0xff]   ;;  %v9163_v4 = vld [vmem:[%s12561_s15 + $0xd0] ss:$8 sps:$4 sm:$0xff]  }
 0x2c4   :  { %v2396_v37 = vmax.f32 %v2362_v13, 0.0  ;;  %4748 = vmatmul.mubr.bf16.gmra.mrb[120].mxu1 %v11484_v24  ;;  %6530 = vmatpush1.bf16.msra.mxu0 %v9133_v47  ;;  %v9139_v24 = vld [vmem:[%s12561_s15 + $0x50] ss:$8 sps:$4 sm:$0xff]   ;;  %v9189_v47 = vld [vmem:[%s12559_s13 + $0x54] ss:$8 sps:$4 sm:$0xff]  }
 0x2c5   :  { %v2397_v18 = vmax.f32 %v2364_v62, 0.0  ;;  %6531 = vmatprep.subr.bf16.mxu0 %v9138_v52  ;;  %4757 = vmatprep.mubr.bf16.mxu1 %v11494_v48  ;;  %v9144_v48 = vld [vmem:[%s12561_s15 + $0x64] ss:$8 sps:$4 sm:$0xff]   ;;  %v9165_v20 = vld [vmem:[%s12561_s15 + $0xd4] ss:$8 sps:$4 sm:$0xff]  }
 0x2c6   :  { %v11802_v5 = vpack.c.bf16 %v2396_v37, %v2394_v36  ;;  %v9168_v52 = vld [vmem:[%s12561_s15 + $0xe4] ss:$8 sps:$4 sm:$0xff]   ;;  %v9166_v13 = vld [vmem:[%s12561_s15 + $0xe0] ss:$8 sps:$4 sm:$0xff]   ;;  %v9195_v49 = vld [vmem:[%s12559_s13 + $0x74] ss:$8 sps:$4 sm:$0xff]  }
 0x2c7   :  { %v11804_v19 = vpack.c.bf16 %v2397_v18, %v2395_v25  ;;  %6303 = vmatmul.mubr.bf16.gmra.mrb[104].mxu0 %v11645_v33  ;;  %v9147_v33 = vld [vmem:[%s12561_s15 + $0x74] ss:$8 sps:$4 sm:$0xff]   ;;  %v9193_v36 = vld [vmem:[%s12559_s13 + $0x70] ss:$8 sps:$4 sm:$0xff]   ;;  %v9198_v37 = vld [vmem:[%s12559_s13 + $0x84] ss:$8 sps:$4 sm:$0xff]  }
 0x2c8   :  { %6312 = vmatprep.mubr.bf16.mxu0 %v11697_v30  ;;  %6532 = vmatpush1.bf16.msra.mxu0 %v9136_v59  ;;  %v9174_v30 = vld [vmem:[%s12559_s13 + $0x4] ss:$8 sps:$4 sm:$0xff]   ;;  %v9171_v62 = vld [vmem:[%s12561_s15 + $0xf4] ss:$8 sps:$4 sm:$0xff]   ;;  %v9196_v59 = vld [vmem:[%s12559_s13 + $0x80] ss:$8 sps:$4 sm:$0xff]  }
 0x2c9   :  { %6533 = vmatprep.subr.bf16.mxu0 %v9141_v32  ;;  %5752 = vmatprep.subr.bf16.mxu1 %v9174_v30  ;;  %v9199_v25 = vld [vmem:[%s12559_s13 + $0x90] ss:$8 sps:$4 sm:$0xff]   ;;  %v9204_v18 = vld [vmem:[%s12559_s13 + $0xa4] ss:$8 sps:$4 sm:$0xff]   ;;  %v9202_v32 = vld [vmem:[%s12559_s13 + $0xa0] ss:$8 sps:$4 sm:$0xff]  }
 0x2cc   :  { %4758 = vmatmul.mubr.bf16.gmra.mrb[124].mxu1 %v11539_v17  ;;  %6534 = vmatpush1.bf16.msra.mxu0 %v9139_v24  ;;  %v9145_v17 = vld [vmem:[%s12561_s15 + $0x70] ss:$8 sps:$4 sm:$0xff]   ;;  %v9213_v24 = vld [vmem:[%s12559_s13 + $0xd4] ss:$8 sps:$4 sm:$0xff]  }
 0x2cd   :  { %6535 = vmatprep.subr.bf16.mxu0 %v9144_v48  ;;  %4767 = vmatprep.mubr.bf16.mxu1 %v11545_v26  ;;  %v9150_v26 = vld [vmem:[%s12561_s15 + $0x84] ss:$8 sps:$4 sm:$0xff]   ;;  %v9214_v48 = vld [vmem:[%s12559_s13 + $0xe0] ss:$8 sps:$4 sm:$0xff]  }
 0x2cf   :  { %6313 = vmatmul.mubr.bf16.gmra.mrb[108].mxu0 %v11691_v38  ;;  %v9172_v38 = vld [vmem:[%s12559_s13] ss:$8 sps:$4 sm:$0xff]  }
 0x2d0   :  { %6322 = vmatprep.mubr.bf16.mxu0 %v11732_v60  ;;  %6536 = vmatpush1.bf16.msra.mxu0 %v9142_v27  ;;  %v9148_v60 = vld [vmem:[%s12561_s15 + $0x80] ss:$8 sps:$4 sm:$0xff]   ;;  %v9219_v27 = vld [vmem:[%s12559_s13 + $0xf4] ss:$8 sps:$4 sm:$0xff]  }
 0x2d1   :  { %6537 = vmatprep.subr.bf16.mxu0 %v9147_v33  ;;  %5753 = vmatpush1.bf16.msra.mxu1 %v9172_v38 }
 0x2d2   :  { %5754 = vmatprep.subr.bf16.mxu1 %v9177_v53 }
 0x2d4   :  { %4768 = vmatmul.mubr.bf16.gmra.mrb[128].mxu1 %v11585_v8  ;;  %6538 = vmatpush1.bf16.msra.mxu0 %v9145_v17  ;;  %v9175_v8 = vld [vmem:[%s12559_s13 + $0x10] ss:$8 sps:$4 sm:$0xff]  }
 0x2d5   :  { %6539 = vmatprep.subr.bf16.mxu0 %v9150_v26  ;;  %4777 = vmatprep.mubr.bf16.mxu1 %v11591_v56  ;;  %v9180_v56 = vld [vmem:[%s12559_s13 + $0x24] ss:$8 sps:$4 sm:$0xff]  }
 0x2d6   :  { %5755 = vmatpush1.bf16.msra.mxu1 %v9175_v8 }
 0x2d7   :  { %6323 = vmatmul.mubr.bf16.gmra.mrb[112].mxu0 %v11729_v9  ;;  %v9178_v9 = vld [vmem:[%s12559_s13 + $0x20] ss:$8 sps:$4 sm:$0xff]   ;;  %5756 = vmatprep.subr.bf16.mxu1 %v9180_v56 }
 0x2d8   :  { %6332 = vmatprep.mubr.bf16.mxu0 %v11756_v58  ;;  %6540 = vmatpush1.bf16.msra.mxu0 %v9148_v60  ;;  %v9154_v58 = vld [vmem:[%s12561_s15 + $0xa0] ss:$8 sps:$4 sm:$0xff]  }
 0x2d9   :  { %6541 = vmatprep.subr.bf16.mxu0 %v9153_v31 }
 0x2da   :  { %5757 = vmatpush1.bf16.msra.mxu1 %v9178_v9 }
 0x2db   :  { %5758 = vmatprep.subr.bf16.mxu1 %v9183_v42 }
 0x2dc   :  { %4778 = vmatmul.mubr.bf16.gmra.mrb[132].mxu1 %v11631_v1  ;;  %6542 = vmatpush1.bf16.msra.mxu0 %v9151_v28  ;;  %v9181_v1 = vld [vmem:[%s12559_s13 + $0x30] ss:$8 sps:$4 sm:$0xff]  }
 0x2dd   :  { %6543 = vmatprep.subr.bf16.mxu0 %v9156_v23  ;;  %4787 = vmatprep.mubr.bf16.mxu1 %v11637_v16  ;;  %v9186_v16 = vld [vmem:[%s12559_s13 + $0x44] ss:$8 sps:$4 sm:$0xff]  }
 0x2de   :  { %5759 = vmatpush1.bf16.msra.mxu1 %v9181_v1 }
 0x2df   :  { %6333 = vmatmul.mubr.bf16.gmra.mrb[116].mxu0 %v11754_v15  ;;  %v9184_v15 = vld [vmem:[%s12559_s13 + $0x40] ss:$8 sps:$4 sm:$0xff]   ;;  %5760 = vmatprep.subr.bf16.mxu1 %v9186_v16 }
 0x2e0   :  { %6342 = vmatprep.mubr.bf16.mxu0 %v11780_v51  ;;  %6544 = vmatpush1.bf16.msra.mxu0 %v9154_v58  ;;  %v9160_v51 = vld [vmem:[%s12561_s15 + $0xc0] ss:$8 sps:$4 sm:$0xff]  }
 0x2e1   :  { %6545 = vmatprep.subr.bf16.mxu0 %v9159_v44 }
 0x2e2   :  { %5761 = vmatpush1.bf16.msra.mxu1 %v9184_v15 }
 0x2e3   :  { %5762 = vmatprep.subr.bf16.mxu1 %v9189_v47 }
 0x2e4   :  { %4788 = vmatmul.mubr.bf16.gmra.mrb[136].mxu1 %v11677_v45  ;;  %6546 = vmatpush1.bf16.msra.mxu0 %v9157_v0  ;;  %v9187_v45 = vld [vmem:[%s12559_s13 + $0x50] ss:$8 sps:$4 sm:$0xff]  }
 0x2e5   :  { %6547 = vmatprep.subr.bf16.mxu0 %v9162_v21  ;;  %4797 = vmatprep.mubr.bf16.mxu1 %v11683_v41  ;;  %v9192_v41 = vld [vmem:[%s12559_s13 + $0x64] ss:$8 sps:$4 sm:$0xff]  }
 0x2e6   :  { %5763 = vmatpush1.bf16.msra.mxu1 %v9187_v45 }
 0x2e7   :  { %6343 = vmatmul.mubr.bf16.gmra.mrb[120].mxu0 %v11778_v6  ;;  %v9190_v6 = vld [vmem:[%s12559_s13 + $0x60] ss:$8 sps:$4 sm:$0xff]   ;;  %5764 = vmatprep.subr.bf16.mxu1 %v9192_v41 }
 0x2e8   :  { %6352 = vmatprep.mubr.bf16.mxu0 %v11804_v19  ;;  %6548 = vmatpush1.bf16.msra.mxu0 %v9160_v51  ;;  %v9208_v19 = vld [vmem:[%s12559_s13 + $0xc0] ss:$8 sps:$4 sm:$0xff]  }
 0x2e9   :  { %6549 = vmatprep.subr.bf16.mxu0 %v9165_v20 }
 0x2ea   :  { %5765 = vmatpush1.bf16.msra.mxu1 %v9190_v6 }
 0x2eb   :  { %5766 = vmatprep.subr.bf16.mxu1 %v9195_v49 }
 0x2ec   :  { %4798 = vmatmul.mubr.bf16.gmra.mrb[140].mxu1 %v11717_v35  ;;  %6550 = vmatpush1.bf16.msra.mxu0 %v9163_v4  ;;  %v9169_v35 = vld [vmem:[%s12561_s15 + $0xf0] ss:$8 sps:$4 sm:$0xff]  }
 0x2ed   :  { %6551 = vmatprep.subr.bf16.mxu0 %v9168_v52 }
 0x2ee   :  { %5767 = vmatpush1.bf16.msra.mxu1 %v9193_v36 }
 0x2ef   :  { %6353 = vmatmul.mubr.bf16.gmra.mrb[124].mxu0 %v11802_v5  ;;  %5768 = vmatprep.subr.bf16.mxu1 %v9198_v37  ;;  %v9207_v5 = vld [vmem:[%s12559_s13 + $0xb4] ss:$8 sps:$4 sm:$0xff]  }
 0x2f0   :  { %6552 = vmatpush1.bf16.msra.mxu0 %v9166_v13  ;;  %6555 = vmatprep.mubr.bf16.mxu0 %v11199_v10  ;;  %v9201_v10 = vld [vmem:[%s12559_s13 + $0x94] ss:$8 sps:$4 sm:$0xff]  }
 0x2f1   :  { %6553 = vmatprep.subr.bf16.mxu0 %v9171_v62 }
 0x2f2   :  { %5769 = vmatpush1.bf16.msra.mxu1 %v9196_v59 }
 0x2f3   :  { %5770 = vmatprep.subr.bf16.mxu1 %v9201_v10 }
 0x2f4   :  { %6554 = vmatpush1.bf16.msra.mxu0 %v9169_v35 }
 0x2f6   :  { %5771 = vmatpush1.bf16.msra.mxu1 %v9199_v25 }
 0x2f7   :  { %6556 = vmatmul.mubr.bf16.vlgmr.msra.gmra.mrb[96].mxu0 %v11188_v46  ;;  %5772 = vmatprep.subr.bf16.mxu1 %v9204_v18  ;;  %v9205_v46 = vld [vmem:[%s12559_s13 + $0xb0] ss:$8 sps:$4 sm:$0xff]  }
 0x2f8   :  { %6565 = vmatprep.mubr.bf16.mxu0 %v11245_v29  ;;  %v9210_v29 = vld [vmem:[%s12559_s13 + $0xc4] ss:$8 sps:$4 sm:$0xff]  }
 0x2fa   :  { %5773 = vmatpush1.bf16.msra.mxu1 %v9202_v32 }
 0x2fb   :  { %5774 = vmatprep.subr.bf16.mxu1 %v9207_v5 }
 0x2fe   :  { %5775 = vmatpush1.bf16.msra.mxu1 %v9205_v46 }
 0x2ff   :  { %6566 = vmatmul.mubr.bf16.gmra.mrb[100].mxu0 %v11234_v34  ;;  %5776 = vmatprep.subr.bf16.mxu1 %v9210_v29  ;;  %v9211_v34 = vld [vmem:[%s12559_s13 + $0xd0] ss:$8 sps:$4 sm:$0xff]  }
 0x300   :  { %6575 = vmatprep.mubr.bf16.mxu0 %v11291_v54  ;;  %v9216_v54 = vld [vmem:[%s12559_s13 + $0xe4] ss:$8 sps:$4 sm:$0xff]  }
 0x302   :  { %5777 = vmatpush1.bf16.msra.mxu1 %v9208_v19 }
 0x303   :  { %5778 = vmatprep.subr.bf16.mxu1 %v9213_v24 }
 0x306   :  { %5779 = vmatpush1.bf16.msra.mxu1 %v9211_v34 }
 0x307   :  { %6576 = vmatmul.mubr.bf16.gmra.mrb[104].mxu0 %v11280_v50  ;;  %5780 = vmatprep.subr.bf16.mxu1 %v9216_v54  ;;  %v9217_v50 = vld [vmem:[%s12559_s13 + $0xf0] ss:$8 sps:$4 sm:$0xff]  }
 0x308   :  { %6585 = vmatprep.mubr.bf16.mxu0 %v11337_v7  ;;  %v9222_v7 = vld [vmem:[%s12559_s13 + $0x104] ss:$8 sps:$4 sm:$0xff]  }
 0x30a   :  { %5781 = vmatpush1.bf16.msra.mxu1 %v9214_v48 }
 0x30b   :  { %5782 = vmatprep.subr.bf16.mxu1 %v9219_v27 }
 0x30e   :  { %5783 = vmatpush1.bf16.msra.mxu1 %v9217_v50 }
 0x30f   :  { %6586 = vmatmul.mubr.bf16.gmra.mrb[108].mxu0 %v11326_v43  ;;  %5865 = vmatprep.subr.bf16.mxu1 %v9222_v7  ;;  %v12007_v43 = vld [vmem:[%s12558_s12] sm:$0xf] }
 0x310   :  { %6595 = vmatprep.mubr.bf16.mxu0 %v11383_v39  ;;  %v12579_v39 = vsub.s32 3, %v10021_v55 }
 0x317   :  { %6596 = vmatmul.mubr.bf16.gmra.mrb[112].mxu0 %v11372_v2  ;;  %v12012_v2 = vrot.slane %v12007_v43, %v184_v14 }
 0x318   :  { %6605 = vmatprep.mubr.bf16.mxu0 %v11429_v57 }
 0x31f   :  { %6606 = vmatmul.mubr.bf16.gmra.mrb[116].mxu0 %v11418_v40  ;;  %v12017_v40 = vrot.slane %v12007_v43, %v12579_v39 }
 0x320   :  { %6615 = vmatprep.mubr.bf16.mxu0 %v11478_v22 }
 0x327   :  { %6616 = vmatmul.mubr.bf16.gmra.mrb[120].mxu0 %v11467_v3 }
 0x328   :  { %6625 = vmatprep.mubr.bf16.mxu0 %v11532_v12 }
 0x32f   :  { %6626 = vmatmul.mubr.bf16.gmra.mrb[124].mxu0 %v11520_v11 }
 0x34a   :  { %v5181_v57 = vpop.f32.mrb[64].mxu0 }
 0x34b   :  { %v8024_v3 = vadd.f32 %v5181_v57, %v12012_v2  ;;  %v5183_v22 = vpop.f32.mrb[65].mxu0 }
 0x34c   :  { %v8025_v11 = vadd.f32 %v5183_v22, %v12017_v40  ;;  %v5185_v12 = vpop.f32.mrb[66].mxu0 }
 0x34d   :  { %v8026_v33 = vadd.f32 %v5185_v12, %v12012_v2  ;;  %v5187_v17 = vpop.f32.mrb[67].mxu0  ;;  %v5262_v26 = vmax.f32 %v8024_v3, 0.0 }
 0x34e   :  { %v8027_v30 = vadd.f32 %v5187_v17, %v12017_v40  ;;  %v5263_v38 = vmax.f32 %v8025_v11, 0.0 }
 0x34f   :  { %v5266_v14 = vmax.f32 %v8026_v33, 0.0 }
 0x350   :  { %v5267_v60 = vmax.f32 %v8027_v30, 0.0 }
 0x351   :  { %v12023_v55 = vpack.c.bf16 %v5266_v14, %v5262_v26 }
 0x352   :  { %v12025_v53 = vpack.c.bf16 %v5267_v60, %v5263_v38  ;;  %v5191_v31 = vpop.f32.mrb[68].mxu0 }
 0x353   :  { %v8028_v8 = vadd.f32 %v5191_v31, %v12012_v2  ;;  %v5193_v28 = vpop.f32.mrb[69].mxu0 }
 0x354   :  { %v8029_v56 = vadd.f32 %v5193_v28, %v12017_v40  ;;  %v5195_v23 = vpop.f32.mrb[70].mxu0 }
 0x355   :  { %v8030_v9 = vadd.f32 %v5195_v23, %v12012_v2  ;;  %v5197_v58 = vpop.f32.mrb[71].mxu0  ;;  %v5270_v44 = vmax.f32 %v8028_v8, 0.0 }
 0x356   :  { %v8031_v42 = vadd.f32 %v5197_v58, %v12017_v40  ;;  %v5271_v0 = vmax.f32 %v8029_v56, 0.0 }
 0x357   :  { %v5274_v1 = vmax.f32 %v8030_v9, 0.0 }
 0x358   :  { %v5275_v16 = vmax.f32 %v8031_v42, 0.0 }
 0x359   :  { %v12031_v21 = vpack.c.bf16 %v5274_v1, %v5270_v44 }
 0x35a   :  { %v12033_v15 = vpack.c.bf16 %v5275_v16, %v5271_v0  ;;  %v5201_v51 = vpop.f32.mrb[72].mxu0 }
 0x35b   :  { %v8032_v47 = vadd.f32 %v5201_v51, %v12012_v2  ;;  %v5203_v20 = vpop.f32.mrb[73].mxu0 }
 0x35c   :  { %v8033_v45 = vadd.f32 %v5203_v20, %v12017_v40  ;;  %v5205_v4 = vpop.f32.mrb[74].mxu0 }
 0x35d   :  { %v8034_v41 = vadd.f32 %v5205_v4, %v12012_v2  ;;  %v5207_v52 = vpop.f32.mrb[75].mxu0  ;;  %v5278_v13 = vmax.f32 %v8032_v47, 0.0 }
 0x35e   :  { %v8035_v6 = vadd.f32 %v5207_v52, %v12017_v40  ;;  %v5279_v62 = vmax.f32 %v8033_v45, 0.0 }
 0x35f   :  { %v5282_v49 = vmax.f32 %v8034_v41, 0.0 }
 0x360   :  { %v5283_v36 = vmax.f32 %v8035_v6, 0.0 }
 0x361   :  { %v12039_v35 = vpack.c.bf16 %v5282_v49, %v5278_v13 }
 0x362   :  { %v12041_v37 = vpack.c.bf16 %v5283_v36, %v5279_v62  ;;  %v5211_v59 = vpop.f32.mrb[76].mxu0 }
 0x363   :  { %v8036_v10 = vadd.f32 %v5211_v59, %v12012_v2  ;;  %v5213_v25 = vpop.f32.mrb[77].mxu0 }
 0x364   :  { %v8037_v18 = vadd.f32 %v5213_v25, %v12017_v40  ;;  %v5215_v32 = vpop.f32.mrb[78].mxu0 }
 0x365   :  { %v8038_v5 = vadd.f32 %v5215_v32, %v12012_v2  ;;  %v5217_v46 = vpop.f32.mrb[79].mxu0  ;;  %v5286_v19 = vmax.f32 %v8036_v10, 0.0 }
 0x366   :  { %v8039_v29 = vadd.f32 %v5217_v46, %v12017_v40  ;;  %v5287_v34 = vmax.f32 %v8037_v18, 0.0 }
 0x367   :  { %v5290_v24 = vmax.f32 %v8038_v5, 0.0 }
 0x368   :  { %v5291_v54 = vmax.f32 %v8039_v29, 0.0 }
 0x369   :  { %v12047_v48 = vpack.c.bf16 %v5290_v24, %v5286_v19  ;;  %v12079_v19 = vrot.slane %v12007_v43, %v10034_v61 }
 0x36a   :  { %v12049_v27 = vpack.c.bf16 %v5291_v54, %v5287_v34  ;;  %v5221_v50 = vpop.f32.mrb[80].mxu0  ;;  %v12084_v54 = vrot.slane %v12007_v43, %v10042_v63 }
 0x36b   :  { %v8040_v7 = vadd.f32 %v5221_v50, %v12012_v2  ;;  %v5223_v39 = vpop.f32.mrb[81].mxu0 }
 0x36c   :  { %v8041_v57 = vadd.f32 %v5223_v39, %v12017_v40  ;;  %v5225_v3 = vpop.f32.mrb[82].mxu0 }
 0x36d   :  { %v8042_v22 = vadd.f32 %v5225_v3, %v12012_v2  ;;  %v5227_v11 = vpop.f32.mrb[83].mxu0  ;;  %v5294_v33 = vmax.f32 %v8040_v7, 0.0 }
 0x36e   :  { %v8043_v12 = vadd.f32 %v5227_v11, %v12017_v40  ;;  %v5295_v30 = vmax.f32 %v8041_v57, 0.0 }
 0x36f   :  { %v5298_v17 = vmax.f32 %v8042_v22, 0.0 }
 0x370   :  { %v5299_v26 = vmax.f32 %v8043_v12, 0.0 }
 0x371   :  { %v12055_v14 = vpack.c.bf16 %v5298_v17, %v5294_v33 }
 0x372   :  { %v12057_v38 = vpack.c.bf16 %v5299_v26, %v5295_v30  ;;  %v5231_v60 = vpop.f32.mrb[84].mxu0 }
 0x373   :  { %v8044_v31 = vadd.f32 %v5231_v60, %v12012_v2  ;;  %v5233_v8 = vpop.f32.mrb[85].mxu0  ;;  %v12102_v60 = vld [vmem:[%s12563_s17 + $0x4] ss:$8 sps:$4 sm:$0xff]  }
 0x374   :  { %v8045_v28 = vadd.f32 %v5233_v8, %v12017_v40  ;;  %v5235_v56 = vpop.f32.mrb[86].mxu0  ;;  %v12108_v8 = vld [vmem:[%s12563_s17 + $0x14] ss:$8 sps:$4 sm:$0xff]   ;;  %6828 = vmatprep.subr.bf16.mxu0 %v12102_v60 }
 0x375   :  { %v8046_v23 = vadd.f32 %v5235_v56, %v12012_v2  ;;  %v5237_v9 = vpop.f32.mrb[87].mxu0  ;;  %v5302_v42 = vmax.f32 %v8044_v31, 0.0 }
 0x376   :  { %v8047_v58 = vadd.f32 %v5237_v9, %v12017_v40  ;;  %v5303_v1 = vmax.f32 %v8045_v28, 0.0 }
 0x377   :  { %v5306_v44 = vmax.f32 %v8046_v23, 0.0 }
 0x378   :  { %v5307_v0 = vmax.f32 %v8047_v58, 0.0  ;;  %v12115_v58 = vld [vmem:[%s12563_s17 + $0x10] ss:$8 sps:$4 sm:$0xff]  }
 0x379   :  { %v12063_v16 = vpack.c.bf16 %v5306_v44, %v5302_v42  ;;  %v12121_v44 = vld [vmem:[%s12563_s17 + $0x24] ss:$8 sps:$4 sm:$0xff]  }
 0x37a   :  { %v12065_v51 = vpack.c.bf16 %v5307_v0, %v5303_v1  ;;  %v5241_v47 = vpop.f32.mrb[88].mxu0 }
 0x37b   :  { %v8048_v20 = vadd.f32 %v5241_v47, %v12012_v2  ;;  %v5243_v45 = vpop.f32.mrb[89].mxu0  ;;  %v9220_v47 = vld [vmem:[%s12559_s13 + $0x100] ss:$8 sps:$4 sm:$0xff]  }
 0x37c   :  { %v8049_v4 = vadd.f32 %v5243_v45, %v12017_v40  ;;  %v5245_v41 = vpop.f32.mrb[90].mxu0 }
 0x37d   :  { %v8050_v52 = vadd.f32 %v5245_v41, %v12012_v2  ;;  %v5247_v6 = vpop.f32.mrb[91].mxu0  ;;  %v5310_v49 = vmax.f32 %v8048_v20, 0.0 }
 0x37e   :  { %v8051_v13 = vadd.f32 %v5247_v6, %v12017_v40  ;;  %v5311_v36 = vmax.f32 %v8049_v4, 0.0  ;;  %v9225_v4 = vld [vmem:[%s12559_s13 + $0x114] ss:$8 sps:$4 sm:$0xff]   ;;  %v12135_v6 = vld [vmem:[%s12563_s17 + $0x20] ss:$8 sps:$4 sm:$0xff]  }
 0x37f   :  { %v5314_v62 = vmax.f32 %v8050_v52, 0.0 }
 0x380   :  { %v5315_v59 = vmax.f32 %v8051_v13, 0.0 }
 0x381   :  { %v12071_v10 = vpack.c.bf16 %v5314_v62, %v5310_v49  ;;  %v12142_v62 = vld [vmem:[%s12563_s17 + $0x34] ss:$8 sps:$4 sm:$0xff]  }
 0x382   :  { %v12073_v25 = vpack.c.bf16 %v5315_v59, %v5311_v36  ;;  %v5251_v18 = vpop.f32.mrb[92].mxu0  ;;  %v9223_v59 = vld [vmem:[%s12559_s13 + $0x110] ss:$8 sps:$4 sm:$0xff]  }
 0x383   :  { %v8052_v32 = vadd.f32 %v5251_v18, %v12012_v2  ;;  %v5253_v5 = vpop.f32.mrb[93].mxu0 }
 0x384   :  { %v8053_v46 = vadd.f32 %v5253_v5, %v12017_v40  ;;  %v5255_v29 = vpop.f32.mrb[94].mxu0  ;;  %v9228_v5 = vld [vmem:[%s12559_s13 + $0x124] ss:$8 sps:$4 sm:$0xff]  }
 0x385   :  { %v8054_v24 = vadd.f32 %v5255_v29, %v12012_v2  ;;  %v5257_v34 = vpop.f32.mrb[95].mxu0  ;;  %v5318_v7 = vmax.f32 %v8052_v32, 0.0 }
 0x386   :  { %v8055_v50 = vadd.f32 %v5257_v34, %v12017_v40  ;;  %v5319_v3 = vmax.f32 %v8053_v46, 0.0  ;;  %v12097_v40 = vld [vmem:[%s12563_s17] ss:$8 sps:$4 sm:$0xff]  }
 0x387   :  { %v5322_v39 = vmax.f32 %v8054_v24, 0.0  ;;  %v4729_v57 = vpop.f32.mrb[112].mxu1  ;;  %6829 = vmatpush1.bf16.msra.mxu0 %v12097_v40  ;;  %v12155_v24 = vld [vmem:[%s12563_s17 + $0x30] ss:$8 sps:$4 sm:$0xff]  }
 0x388   :  { %v5323_v22 = vmax.f32 %v8055_v50, 0.0  ;;  %v7992_v11 = vadd.f32 %v4729_v57, %v12079_v19  ;;  %v4731_v12 = vpop.f32.mrb[113].mxu1  ;;  %6830 = vmatprep.subr.bf16.mxu0 %v12108_v8  ;;  %v12161_v50 = vld [vmem:[%s12563_s17 + $0x44] ss:$8 sps:$4 sm:$0xff]   ;;  %v9226_v57 = vld [vmem:[%s12559_s13 + $0x120] ss:$8 sps:$4 sm:$0xff]  }
 0x389   :  { %v12088_v33 = vpack.c.bf16 %v5322_v39, %v5318_v7  ;;  %v7993_v17 = vadd.f32 %v4731_v12, %v12084_v54  ;;  %v4733_v2 = vpop.f32.mrb[114].mxu1 }
 0x38a   :  { %v12091_v30 = vpack.c.bf16 %v5323_v22, %v5319_v3  ;;  %v7994_v43 = vadd.f32 %v4733_v2, %v12079_v19  ;;  %v4735_v26 = vpop.f32.mrb[115].mxu1  ;;  %v5260_v28 = vmax.f32 %v7992_v11, 0.0  ;;  %v9231_v11 = vld [vmem:[%s12559_s13 + $0x134] ss:$8 sps:$4 sm:$0xff]   ;;  %v12175_v2 = vld [vmem:[%s12563_s17 + $0x40] ss:$8 sps:$4 sm:$0xff]  }
 0x38b   :  { %v7995_v31 = vadd.f32 %v4735_v26, %v12084_v54  ;;  %v5261_v23 = vmax.f32 %v7993_v17, 0.0  ;;  %6831 = vmatpush1.bf16.msra.mxu0 %v12115_v58 }
 0x38c   :  { %v5264_v56 = vmax.f32 %v7994_v43, 0.0  ;;  %6832 = vmatprep.subr.bf16.mxu0 %v12121_v44 }
 0x38d   :  { %v5265_v9 = vmax.f32 %v7995_v31, 0.0  ;;  %v12182_v31 = vld [vmem:[%s12563_s17 + $0x54] ss:$8 sps:$4 sm:$0xff]  }
 0x38e   :  { %v5324_v42 = vpack.c.bf16 %v5264_v56, %v5260_v28  ;;  %v9229_v56 = vld [vmem:[%s12559_s13 + $0x130] ss:$8 sps:$4 sm:$0xff]  }
 0x38f   :  { %v5325_v1 = vpack.c.bf16 %v5265_v9, %v5261_v23  ;;  %v4739_v0 = vpop.f32.mrb[116].mxu1  ;;  %6833 = vmatpush1.bf16.msra.mxu0 %v12135_v6 }
 0x390   :  { %v7996_v20 = vadd.f32 %v4739_v0, %v12079_v19  ;;  %v4741_v45 = vpop.f32.mrb[117].mxu1  ;;  %6834 = vmatprep.subr.bf16.mxu0 %v12142_v62 }
 0x391   :  { %v7997_v41 = vadd.f32 %v4741_v45, %v12084_v54  ;;  %v4743_v52 = vpop.f32.mrb[118].mxu1  ;;  %5784 = vmatprep.mubr.bf16.mxu1 %v5325_v1  ;;  %v12201_v45 = vld [vmem:[%s12563_s17 + $0x64] ss:$8 sps:$4 sm:$0xff]  }
 0x392   :  { %v7998_v13 = vadd.f32 %v4743_v52, %v12079_v19  ;;  %v4745_v49 = vpop.f32.mrb[119].mxu1  ;;  %5785 = vmatmul.mubr.bf16.vlgmr.msra.gmra.mrb[144].mxu1 %v5324_v42  ;;  %v5268_v18 = vmax.f32 %v7996_v20, 0.0  ;;  %v9234_v42 = vld [vmem:[%s12559_s13 + $0x144] ss:$8 sps:$4 sm:$0xff]   ;;  %v9232_v52 = vld [vmem:[%s12559_s13 + $0x140] ss:$8 sps:$4 sm:$0xff]  }
 0x393   :  { %v7999_v36 = vadd.f32 %v4745_v49, %v12084_v54  ;;  %5866 = vmatpush1.bf16.msra.mxu1 %v9220_v47  ;;  %v5269_v46 = vmax.f32 %v7997_v41, 0.0  ;;  %6835 = vmatpush1.bf16.msra.mxu0 %v12155_v24  ;;  %v12195_v47 = vld [vmem:[%s12563_s17 + $0x50] ss:$8 sps:$4 sm:$0xff]  }
 0x394   :  { %v5272_v32 = vmax.f32 %v7998_v13, 0.0  ;;  %5867 = vmatprep.subr.bf16.mxu1 %v9225_v4  ;;  %6836 = vmatprep.subr.bf16.mxu0 %v12161_v50 }
 0x395   :  { %v5273_v29 = vmax.f32 %v7999_v36, 0.0  ;;  %v9237_v36 = vld [vmem:[%s12559_s13 + $0x154] ss:$8 sps:$4 sm:$0xff]  }
 0x396   :  { %v5328_v34 = vpack.c.bf16 %v5272_v32, %v5268_v18  ;;  %v12215_v32 = vld [vmem:[%s12563_s17 + $0x60] ss:$8 sps:$4 sm:$0xff]  }
 0x397   :  { %v5329_v7 = vpack.c.bf16 %v5273_v29, %v5269_v46  ;;  %v4749_v39 = vpop.f32.mrb[120].mxu1  ;;  %5868 = vmatpush1.bf16.msra.mxu1 %v9223_v59  ;;  %6837 = vmatpush1.bf16.msra.mxu0 %v12175_v2  ;;  %v12222_v29 = vld [vmem:[%s12563_s17 + $0x74] ss:$8 sps:$4 sm:$0xff]  }
 0x398   :  { %v8000_v3 = vadd.f32 %v4749_v39, %v12079_v19  ;;  %v4751_v22 = vpop.f32.mrb[121].mxu1  ;;  %5869 = vmatprep.subr.bf16.mxu1 %v9228_v5  ;;  %6838 = vmatprep.subr.bf16.mxu0 %v12182_v31 }
 0x399   :  { %v8001_v12 = vadd.f32 %v4751_v22, %v12084_v54  ;;  %v4753_v17 = vpop.f32.mrb[122].mxu1  ;;  %5794 = vmatprep.mubr.bf16.mxu1 %v5329_v7  ;;  %v9235_v7 = vld [vmem:[%s12559_s13 + $0x150] ss:$8 sps:$4 sm:$0xff]  }
 0x39a   :  { %v8002_v43 = vadd.f32 %v4753_v17, %v12079_v19  ;;  %v4755_v26 = vpop.f32.mrb[123].mxu1  ;;  %5795 = vmatmul.mubr.bf16.gmra.mrb[148].mxu1 %v5328_v34  ;;  %v5276_v23 = vmax.f32 %v8000_v3, 0.0  ;;  %v9240_v3 = vld [vmem:[%s12559_s13 + $0x164] ss:$8 sps:$4 sm:$0xff]  }
 0x39b   :  { %v8003_v28 = vadd.f32 %v4755_v26, %v12084_v54  ;;  %5870 = vmatpush1.bf16.msra.mxu1 %v9226_v57  ;;  %v5277_v1 = vmax.f32 %v8001_v12, 0.0  ;;  %6839 = vmatpush1.bf16.msra.mxu0 %v12195_v47  ;;  %v12235_v12 = vld [vmem:[%s12563_s17 + $0x70] ss:$8 sps:$4 sm:$0xff]  }
 0x39c   :  { %v5280_v9 = vmax.f32 %v8002_v43, 0.0  ;;  %5871 = vmatprep.subr.bf16.mxu1 %v9231_v11  ;;  %6840 = vmatprep.subr.bf16.mxu0 %v12201_v45  ;;  %v12241_v43 = vld [vmem:[%s12563_s17 + $0x84] ss:$8 sps:$4 sm:$0xff]  }
 0x39d   :  { %v5281_v0 = vmax.f32 %v8003_v28, 0.0 }
 0x39e   :  { %v5332_v20 = vpack.c.bf16 %v5280_v9, %v5276_v23 }
 0x39f   :  { %v5333_v4 = vpack.c.bf16 %v5281_v0, %v5277_v1  ;;  %v4759_v41 = vpop.f32.mrb[124].mxu1  ;;  %5872 = vmatpush1.bf16.msra.mxu1 %v9229_v56  ;;  %6841 = vmatpush1.bf16.msra.mxu0 %v12215_v32  ;;  %v9238_v56 = vld [vmem:[%s12559_s13 + $0x160] ss:$8 sps:$4 sm:$0xff]  }
 0x3a0   :  { %v8004_v13 = vadd.f32 %v4759_v41, %v12079_v19  ;;  %v4761_v49 = vpop.f32.mrb[125].mxu1  ;;  %5873 = vmatprep.subr.bf16.mxu1 %v9234_v42  ;;  %6842 = vmatprep.subr.bf16.mxu0 %v12222_v29  ;;  %v9243_v42 = vld [vmem:[%s12559_s13 + $0x174] ss:$8 sps:$4 sm:$0xff]  }
 0x3a1   :  { %v8005_v59 = vadd.f32 %v4761_v49, %v12084_v54  ;;  %v4763_v18 = vpop.f32.mrb[126].mxu1  ;;  %5804 = vmatprep.mubr.bf16.mxu1 %v5333_v4  ;;  %v9241_v49 = vld [vmem:[%s12559_s13 + $0x170] ss:$8 sps:$4 sm:$0xff]  }
 0x3a2   :  { %v8006_v5 = vadd.f32 %v4763_v18, %v12079_v19  ;;  %v4765_v46 = vpop.f32.mrb[127].mxu1  ;;  %5805 = vmatmul.mubr.bf16.gmra.mrb[152].mxu1 %v5332_v20  ;;  %v5284_v39 = vmax.f32 %v8004_v13, 0.0  ;;  %v12255_v20 = vld [vmem:[%s12563_s17 + $0x80] ss:$8 sps:$4 sm:$0xff]   ;;  %v9246_v18 = vld [vmem:[%s12559_s13 + $0x184] ss:$8 sps:$4 sm:$0xff]  }
 0x3a3   :  { %v8007_v34 = vadd.f32 %v4765_v46, %v12084_v54  ;;  %5874 = vmatpush1.bf16.msra.mxu1 %v9232_v52  ;;  %v5285_v22 = vmax.f32 %v8005_v59, 0.0  ;;  %6843 = vmatpush1.bf16.msra.mxu0 %v12235_v12  ;;  %v12262_v52 = vld [vmem:[%s12563_s17 + $0x94] ss:$8 sps:$4 sm:$0xff]  }
 0x3a4   :  { %v5288_v57 = vmax.f32 %v8006_v5, 0.0  ;;  %5875 = vmatprep.subr.bf16.mxu1 %v9237_v36  ;;  %6844 = vmatprep.subr.bf16.mxu0 %v12241_v43 }
 0x3a5   :  { %v5289_v11 = vmax.f32 %v8007_v34, 0.0  ;;  %v12275_v34 = vld [vmem:[%s12563_s17 + $0x90] ss:$8 sps:$4 sm:$0xff]  }
 0x3a6   :  { %v5336_v17 = vpack.c.bf16 %v5288_v57, %v5284_v39  ;;  %v12281_v39 = vld [vmem:[%s12563_s17 + $0xa4] ss:$8 sps:$4 sm:$0xff]  }
 0x3a7   :  { %v5337_v26 = vpack.c.bf16 %v5289_v11, %v5285_v22  ;;  %v4769_v28 = vpop.f32.mrb[128].mxu1  ;;  %5876 = vmatpush1.bf16.msra.mxu1 %v9235_v7  ;;  %6845 = vmatpush1.bf16.msra.mxu0 %v12255_v20  ;;  %v9244_v22 = vld [vmem:[%s12559_s13 + $0x180] ss:$8 sps:$4 sm:$0xff]  }
 0x3a8   :  { %v8008_v23 = vadd.f32 %v4769_v28, %v12079_v19  ;;  %v4771_v9 = vpop.f32.mrb[129].mxu1  ;;  %5877 = vmatprep.subr.bf16.mxu1 %v9240_v3  ;;  %6846 = vmatprep.subr.bf16.mxu0 %v12262_v52 }
 0x3a9   :  { %v8009_v1 = vadd.f32 %v4771_v9, %v12084_v54  ;;  %v4773_v0 = vpop.f32.mrb[130].mxu1  ;;  %5814 = vmatprep.mubr.bf16.mxu1 %v5337_v26  ;;  %v9249_v26 = vld [vmem:[%s12559_s13 + $0x194] ss:$8 sps:$4 sm:$0xff]  }
 0x3aa   :  { %v8010_v4 = vadd.f32 %v4773_v0, %v12079_v19  ;;  %v4775_v41 = vpop.f32.mrb[131].mxu1  ;;  %5815 = vmatmul.mubr.bf16.gmra.mrb[156].mxu1 %v5336_v17  ;;  %v5292_v36 = vmax.f32 %v8008_v23, 0.0  ;;  %v12295_v23 = vld [vmem:[%s12563_s17 + $0xa0] ss:$8 sps:$4 sm:$0xff]  }
 0x3ab   :  { %v8011_v13 = vadd.f32 %v4775_v41, %v12084_v54  ;;  %5878 = vmatpush1.bf16.msra.mxu1 %v9238_v56  ;;  %v5293_v5 = vmax.f32 %v8009_v1, 0.0  ;;  %6847 = vmatpush1.bf16.msra.mxu0 %v12275_v34  ;;  %v12302_v1 = vld [vmem:[%s12563_s17 + $0xb4] ss:$8 sps:$4 sm:$0xff]  }
 0x3ac   :  { %v5296_v59 = vmax.f32 %v8010_v4, 0.0  ;;  %5879 = vmatprep.subr.bf16.mxu1 %v9243_v42  ;;  %6848 = vmatprep.subr.bf16.mxu0 %v12281_v39  ;;  %v9247_v4 = vld [vmem:[%s12559_s13 + $0x190] ss:$8 sps:$4 sm:$0xff]  }
 0x3ad   :  { %v5297_v46 = vmax.f32 %v8011_v13, 0.0 }
 0x3ae   :  { %v5340_v7 = vpack.c.bf16 %v5296_v59, %v5292_v36 }
 0x3af   :  { %v5341_v57 = vpack.c.bf16 %v5297_v46, %v5293_v5  ;;  %v4779_v3 = vpop.f32.mrb[132].mxu1  ;;  %5880 = vmatpush1.bf16.msra.mxu1 %v9241_v49  ;;  %v9252_v49 = vld [vmem:[%s12559_s13 + $0x1a4] ss:$8 sps:$4 sm:$0xff]   ;;  %6849 = vmatpush1.bf16.msra.mxu0 %v12295_v23 }
 0x3b0   :  { %v8012_v11 = vadd.f32 %v4779_v3, %v12079_v19  ;;  %v4781_v17 = vpop.f32.mrb[133].mxu1  ;;  %5881 = vmatprep.subr.bf16.mxu1 %v9246_v18  ;;  %v12315_v18 = vld [vmem:[%s12563_s17 + $0xb0] ss:$8 sps:$4 sm:$0xff]   ;;  %6850 = vmatprep.subr.bf16.mxu0 %v12302_v1  ;;  %v12321_v46 = vld [vmem:[%s12563_s17 + $0xc4] ss:$8 sps:$4 sm:$0xff]  }
 0x3b1   :  { %v8013_v28 = vadd.f32 %v4781_v17, %v12084_v54  ;;  %v4783_v56 = vpop.f32.mrb[134].mxu1  ;;  %5824 = vmatprep.mubr.bf16.mxu1 %v5341_v57  ;;  %v9250_v3 = vld [vmem:[%s12559_s13 + $0x1a0] ss:$8 sps:$4 sm:$0xff]   ;;  %v9255_v17 = vld [vmem:[%s12559_s13 + $0x1b4] ss:$8 sps:$4 sm:$0xff]  }
 0x3b2   :  { %v8014_v9 = vadd.f32 %v4783_v56, %v12079_v19  ;;  %v4785_v42 = vpop.f32.mrb[135].mxu1  ;;  %5825 = vmatmul.mubr.bf16.gmra.mrb[160].mxu1 %v5340_v7  ;;  %v5300_v41 = vmax.f32 %v8012_v11, 0.0  ;;  %v12335_v56 = vld [vmem:[%s12563_s17 + $0xc0] ss:$8 sps:$4 sm:$0xff]  }
 0x3b3   :  { %v8015_v0 = vadd.f32 %v4785_v42, %v12084_v54  ;;  %5882 = vmatpush1.bf16.msra.mxu1 %v9244_v22  ;;  %v5301_v36 = vmax.f32 %v8013_v28, 0.0  ;;  %6851 = vmatpush1.bf16.msra.mxu0 %v12315_v18 }
 0x3b4   :  { %v5304_v13 = vmax.f32 %v8014_v9, 0.0  ;;  %5883 = vmatprep.subr.bf16.mxu1 %v9249_v26  ;;  %6852 = vmatprep.subr.bf16.mxu0 %v12321_v46 }
 0x3b5   :  { %v5305_v59 = vmax.f32 %v8015_v0, 0.0  ;;  %v12342_v0 = vld [vmem:[%s12563_s17 + $0xd4] ss:$8 sps:$4 sm:$0xff]  }
 0x3b6   :  { %v5344_v5 = vpack.c.bf16 %v5304_v13, %v5300_v41  ;;  %v9253_v41 = vld [vmem:[%s12559_s13 + $0x1b0] ss:$8 sps:$4 sm:$0xff]  }
 0x3b7   :  { %v5345_v7 = vpack.c.bf16 %v5305_v59, %v5301_v36  ;;  %v4789_v57 = vpop.f32.mrb[136].mxu1  ;;  %5884 = vmatpush1.bf16.msra.mxu1 %v9247_v4  ;;  %v9258_v36 = vld [vmem:[%s12559_s13 + $0x1c4] ss:$8 sps:$4 sm:$0xff]   ;;  %6853 = vmatpush1.bf16.msra.mxu0 %v12335_v56 }
 0x3b8   :  { %v8016_v22 = vadd.f32 %v4789_v57, %v12079_v19  ;;  %v4791_v11 = vpop.f32.mrb[137].mxu1  ;;  %5885 = vmatprep.subr.bf16.mxu1 %v9252_v49  ;;  %6854 = vmatprep.subr.bf16.mxu0 %v12342_v0 }
 0x3b9   :  { %v8017_v26 = vadd.f32 %v4791_v11, %v12084_v54  ;;  %v4793_v28 = vpop.f32.mrb[138].mxu1  ;;  %5834 = vmatprep.mubr.bf16.mxu1 %v5345_v7  ;;  %v12355_v7 = vld [vmem:[%s12563_s17 + $0xd0] ss:$8 sps:$4 sm:$0xff]   ;;  %v9256_v11 = vld [vmem:[%s12559_s13 + $0x1c0] ss:$8 sps:$4 sm:$0xff]  }
 0x3ba   :  { %v8018_v9 = vadd.f32 %v4793_v28, %v12079_v19  ;;  %v4795_v42 = vpop.f32.mrb[139].mxu1  ;;  %5835 = vmatmul.mubr.bf16.gmra.mrb[164].mxu1 %v5344_v5  ;;  %v5308_v13 = vmax.f32 %v8016_v22, 0.0  ;;  %v9261_v28 = vld [vmem:[%s12559_s13 + $0x1d4] ss:$8 sps:$4 sm:$0xff]  }
 0x3bb   :  { %v8019_v4 = vadd.f32 %v4795_v42, %v12084_v54  ;;  %5886 = vmatpush1.bf16.msra.mxu1 %v9250_v3  ;;  %v5309_v59 = vmax.f32 %v8017_v26, 0.0  ;;  %6855 = vmatpush1.bf16.msra.mxu0 %v12355_v7 }
 0x3bc   :  { %v5312_v49 = vmax.f32 %v8018_v9, 0.0  ;;  %5887 = vmatprep.subr.bf16.mxu1 %v9255_v17 }
 0x3bd   :  { %v5313_v5 = vmax.f32 %v8019_v4, 0.0 }
 0x3be   :  { %v5348_v57 = vpack.c.bf16 %v5312_v49, %v5308_v13  ;;  %v9259_v49 = vld [vmem:[%s12559_s13 + $0x1d0] ss:$8 sps:$4 sm:$0xff]  }
 0x3bf   :  { %v5349_v3 = vpack.c.bf16 %v5313_v5, %v5309_v59  ;;  %v4799_v22 = vpop.f32.mrb[140].mxu1  ;;  %5888 = vmatpush1.bf16.msra.mxu1 %v9253_v41  ;;  %v9264_v5 = vld [vmem:[%s12559_s13 + $0x1e4] ss:$8 sps:$4 sm:$0xff]  }
 0x3c0   :  { %v8020_v17 = vadd.f32 %v4799_v22, %v12079_v19  ;;  %v4801_v26 = vpop.f32.mrb[141].mxu1  ;;  %5889 = vmatprep.subr.bf16.mxu1 %v9258_v36 }
 0x3c1   :  { %v8021_v9 = vadd.f32 %v4801_v26, %v12084_v54  ;;  %v4803_v42 = vpop.f32.mrb[142].mxu1  ;;  %5844 = vmatprep.mubr.bf16.mxu1 %v5349_v3 }
 0x3c2   :  { %v8022_v4 = vadd.f32 %v4803_v42, %v12079_v19  ;;  %v4805_v41 = vpop.f32.mrb[143].mxu1  ;;  %5845 = vmatmul.mubr.bf16.gmra.mrb[168].mxu1 %v5348_v57  ;;  %v5316_v36 = vmax.f32 %v8020_v17, 0.0  ;;  %v9267_v57 = vld [vmem:[%s12559_s13 + $0x1f4] ss:$8 sps:$4 sm:$0xff]  }
 0x3c3   :  { %v8023_v13 = vadd.f32 %v4805_v41, %v12084_v54  ;;  %5890 = vmatpush1.bf16.msra.mxu1 %v9256_v11  ;;  %v5317_v3 = vmax.f32 %v8021_v9, 0.0  ;;  %v9262_v54 = vld [vmem:[%s12559_s13 + $0x1e0] ss:$8 sps:$4 sm:$0xff]   ;;  %v9265_v11 = vld [vmem:[%s12559_s13 + $0x1f0] ss:$8 sps:$4 sm:$0xff]  }
 0x3c4   :  { %v5320_v59 = vmax.f32 %v8022_v4, 0.0  ;;  %5891 = vmatprep.subr.bf16.mxu1 %v9261_v28 }
 0x3c5   :  { %v5321_v22 = vmax.f32 %v8023_v13, 0.0 }
 0x3c6   :  { %v5352_v26 = vpack.c.bf16 %v5320_v59, %v5316_v36 }
 0x3c7   :  { %v5353_v19 = vpack.c.bf16 %v5321_v22, %v5317_v3  ;;  %5892 = vmatpush1.bf16.msra.mxu1 %v9259_v49 }
 0x3c8   :  { %5893 = vmatprep.subr.bf16.mxu1 %v9264_v5 }
 0x3c9   :  { %5854 = vmatprep.mubr.bf16.mxu1 %v5353_v19 }
 0x3ca   :  { %5855 = vmatmul.mubr.bf16.gmra.mrb[172].mxu1 %v5352_v26 }
 0x3cb   :  { %5894 = vmatpush1.bf16.msra.mxu1 %v9262_v54  ;;  %5897 = vmatprep.mubr.bf16.mxu1 %v12025_v53 }
 0x3cc   :  { %5895 = vmatprep.subr.bf16.mxu1 %v9267_v57 }
 0x3cf   :  { %5896 = vmatpush1.bf16.msra.mxu1 %v9265_v11 }
 0x3d0   :  { %7832 = vmatprep.subr.bf16.mxu1 %v12102_v60 }
 0x3d2   :  { %5898 = vmatmul.mubr.bf16.vlgmr.msra.gmra.mrb[144].mxu1 %v12023_v55 }
 0x3d3   :  { %5907 = vmatprep.mubr.bf16.mxu1 %v12033_v15  ;;  %7848 = vmatpush1.bf16.msra.mxu1 %v12097_v40 }
 0x3d4   :  { %7833 = vmatprep.subr.bf16.mxu1 %v12108_v8 }
 0x3d7   :  { %7849 = vmatpush1.bf16.msra.mxu1 %v12115_v58 }
 0x3d8   :  { %7834 = vmatprep.subr.bf16.mxu1 %v12121_v44 }
 0x3da   :  { %5908 = vmatmul.mubr.bf16.gmra.mrb[148].mxu1 %v12031_v21 }
 0x3db   :  { %5917 = vmatprep.mubr.bf16.mxu1 %v12041_v37  ;;  %7850 = vmatpush1.bf16.msra.mxu1 %v12135_v6  ;;  %v9310_v37 = vld [vmem:[%s12563_s17 + $0xe0] ss:$8 sps:$4 sm:$0xff]  }
 0x3dc   :  { %7835 = vmatprep.subr.bf16.mxu1 %v12142_v62 }
 0x3df   :  { %7851 = vmatpush1.bf16.msra.mxu1 %v12155_v24 }
 0x3e0   :  { %7836 = vmatprep.subr.bf16.mxu1 %v12161_v50 }
 0x3e2   :  { %5918 = vmatmul.mubr.bf16.gmra.mrb[152].mxu1 %v12039_v35  ;;  %v9312_v35 = vld [vmem:[%s12563_s17 + $0xe4] ss:$8 sps:$4 sm:$0xff]  }
 0x3e3   :  { %5927 = vmatprep.mubr.bf16.mxu1 %v12049_v27  ;;  %7852 = vmatpush1.bf16.msra.mxu1 %v12175_v2  ;;  %v9313_v27 = vld [vmem:[%s12563_s17 + $0xf0] ss:$8 sps:$4 sm:$0xff]  }
 0x3e4   :  { %7837 = vmatprep.subr.bf16.mxu1 %v12182_v31  ;;  %6856 = vmatprep.subr.bf16.mxu0 %v9312_v35 }
 0x3e5   :  { %6857 = vmatpush1.bf16.msra.mxu0 %v9310_v37 }
 0x3e7   :  { %7853 = vmatpush1.bf16.msra.mxu1 %v12195_v47 }
 0x3e8   :  { %7838 = vmatprep.subr.bf16.mxu1 %v12201_v45 }
 0x3ea   :  { %5928 = vmatmul.mubr.bf16.gmra.mrb[156].mxu1 %v12047_v48  ;;  %v9315_v48 = vld [vmem:[%s12563_s17 + $0xf4] ss:$8 sps:$4 sm:$0xff]  }
 0x3eb   :  { %5937 = vmatprep.mubr.bf16.mxu1 %v12057_v38  ;;  %7854 = vmatpush1.bf16.msra.mxu1 %v12215_v32 }
 0x3ec   :  { %7839 = vmatprep.subr.bf16.mxu1 %v12222_v29  ;;  %6858 = vmatprep.subr.bf16.mxu0 %v9315_v48 }
 0x3ed   :  { %6859 = vmatpush1.bf16.msra.mxu0 %v9313_v27 }
 0x3ef   :  { %7855 = vmatpush1.bf16.msra.mxu1 %v12235_v12 }
 0x3f0   :  { %7840 = vmatprep.subr.bf16.mxu1 %v12241_v43 }
 0x3f2   :  { %5938 = vmatmul.mubr.bf16.gmra.mrb[160].mxu1 %v12055_v14  ;;  %v5420_v14 = vld [vmem:[%s12560_s14] sm:$0x3] }
 0x3f3   :  { %5947 = vmatprep.mubr.bf16.mxu1 %v12065_v51  ;;  %7856 = vmatpush1.bf16.msra.mxu1 %v12255_v20  ;;  %v12452_v38 = vrot.slane %v5420_v14, %v10034_v61 }
 0x3f4   :  { %7841 = vmatprep.subr.bf16.mxu1 %v12262_v52 }
 0x3f7   :  { %7857 = vmatpush1.bf16.msra.mxu1 %v12275_v34 }
 0x3f8   :  { %7842 = vmatprep.subr.bf16.mxu1 %v12281_v39 }
 0x3fa   :  { %5948 = vmatmul.mubr.bf16.gmra.mrb[164].mxu1 %v12063_v16  ;;  %v12455_v16 = vrot.slane %v5420_v14, %v10042_v63 }
 0x3fb   :  { %5957 = vmatprep.mubr.bf16.mxu1 %v12073_v25  ;;  %7858 = vmatpush1.bf16.msra.mxu1 %v12295_v23 }
 0x3fc   :  { %7843 = vmatprep.subr.bf16.mxu1 %v12302_v1 }
 0x3ff   :  { %7859 = vmatpush1.bf16.msra.mxu1 %v12315_v18 }
 0x400   :  { %7844 = vmatprep.subr.bf16.mxu1 %v12321_v46 }
 0x402   :  { %5958 = vmatmul.mubr.bf16.gmra.mrb[168].mxu1 %v12071_v10  ;;  %v12423_v55 = vpop.f32.mrb[124].mxu0 }
 0x403   :  { %5967 = vmatprep.mubr.bf16.mxu1 %v12091_v30  ;;  %v12426_v53 = vpop.f32.mrb[125].mxu0  ;;  %7860 = vmatpush1.bf16.msra.mxu1 %v12335_v56 }
 0x404   :  { %v12429_v21 = vpop.f32.mrb[126].mxu0  ;;  %7845 = vmatprep.subr.bf16.mxu1 %v12342_v0 }
 0x405   :  { %v12432_v15 = vpop.f32.mrb[127].mxu0 }
 0x407   :  { %7861 = vmatpush1.bf16.msra.mxu1 %v12355_v7 }
 0x408   :  { %7846 = vmatprep.subr.bf16.mxu1 %v9312_v35 }
 0x40a   :  { %5968 = vmatmul.mubr.bf16.gmra.mrb[172].mxu1 %v12088_v33 }
 0x40b   :  { %7862 = vmatpush1.bf16.msra.mxu1 %v9310_v37 }
 0x40c   :  { %7847 = vmatprep.subr.bf16.mxu1 %v9315_v48 }
 0x40f   :  { %7863 = vmatpush1.bf16.msra.mxu1 %v9313_v27 }
 0x4a5   :  { %v5899_v51 = vpop.f32.mrb[144].mxu1 }
 0x4a6   :  { %v8056_v10 = vadd.f32 %v5899_v51, %v12452_v38  ;;  %v5901_v25 = vpop.f32.mrb[145].mxu1 }
 0x4a7   :  { %v8057_v33 = vadd.f32 %v5901_v25, %v12455_v16  ;;  %v5903_v30 = vpop.f32.mrb[146].mxu1 }
 0x4a8   :  { %v8058_v40 = vadd.f32 %v5903_v30, %v12452_v38  ;;  %v5905_v60 = vpop.f32.mrb[147].mxu1  ;;  %v5978_v58 = vmax.f32 %v8056_v10, 0.0 }
 0x4a9   :  { %v8059_v8 = vadd.f32 %v5905_v60, %v12455_v16  ;;  %v5979_v6 = vmax.f32 %v8057_v33, 0.0 }
 0x4aa   :  { %v5980_v44 = vmax.f32 %v8058_v40, 0.0 }
 0x4ab   :  { %v5981_v62 = vmax.f32 %v8059_v8, 0.0 }
 0x4ac   :  { %v6010_v24 = vpack.c.bf16 %v5980_v44, %v5978_v58 }
 0x4ad   :  { %v6011_v50 = vpack.c.bf16 %v5981_v62, %v5979_v6  ;;  %v5909_v2 = vpop.f32.mrb[148].mxu1 }
 0x4ae   :  { %v8060_v31 = vadd.f32 %v5909_v2, %v12452_v38  ;;  %v5911_v47 = vpop.f32.mrb[149].mxu1 }
 0x4af   :  { %v8061_v45 = vadd.f32 %v5911_v47, %v12455_v16  ;;  %v5913_v32 = vpop.f32.mrb[150].mxu1  ;;  %6860 = vmatprep.mubr.bf16.mxu0 %v6011_v50 }
 0x4b0   :  { %v8062_v29 = vadd.f32 %v5913_v32, %v12452_v38  ;;  %v5915_v12 = vpop.f32.mrb[151].mxu1  ;;  %6861 = vmatmul.mubr.bf16.vlgmr.msra.gmra.mrb[96].mxu0 %v6010_v24  ;;  %v5982_v20 = vmax.f32 %v8060_v31, 0.0 }
 0x4b1   :  { %v8063_v43 = vadd.f32 %v5915_v12, %v12455_v16  ;;  %v5983_v34 = vmax.f32 %v8061_v45, 0.0 }
 0x4b2   :  { %v5984_v52 = vmax.f32 %v8062_v29, 0.0 }
 0x4b3   :  { %v5985_v39 = vmax.f32 %v8063_v43, 0.0 }
 0x4b4   :  { %v6012_v23 = vpack.c.bf16 %v5984_v52, %v5982_v20 }
 0x4b5   :  { %v6013_v1 = vpack.c.bf16 %v5985_v39, %v5983_v34  ;;  %v5919_v18 = vpop.f32.mrb[152].mxu1 }
 0x4b6   :  { %v8064_v46 = vadd.f32 %v5919_v18, %v12452_v38  ;;  %v5921_v56 = vpop.f32.mrb[153].mxu1 }
 0x4b7   :  { %v8065_v0 = vadd.f32 %v5921_v56, %v12455_v16  ;;  %v5923_v7 = vpop.f32.mrb[154].mxu1  ;;  %6870 = vmatprep.mubr.bf16.mxu0 %v6013_v1 }
 0x4b8   :  { %v8066_v17 = vadd.f32 %v5923_v7, %v12452_v38  ;;  %v5925_v28 = vpop.f32.mrb[155].mxu1  ;;  %6871 = vmatmul.mubr.bf16.gmra.mrb[100].mxu0 %v6012_v23  ;;  %v5986_v42 = vmax.f32 %v8064_v46, 0.0 }
 0x4b9   :  { %v8067_v9 = vadd.f32 %v5925_v28, %v12455_v16  ;;  %v5987_v41 = vmax.f32 %v8065_v0, 0.0 }
 0x4ba   :  { %v5988_v4 = vmax.f32 %v8066_v17, 0.0 }
 0x4bb   :  { %v5989_v13 = vmax.f32 %v8067_v9, 0.0 }
 0x4bc   :  { %v6014_v49 = vpack.c.bf16 %v5988_v4, %v5986_v42 }
 0x4bd   :  { %v6015_v36 = vpack.c.bf16 %v5989_v13, %v5987_v41  ;;  %v5929_v59 = vpop.f32.mrb[156].mxu1 }
 0x4be   :  { %v8068_v5 = vadd.f32 %v5929_v59, %v12452_v38  ;;  %v5931_v3 = vpop.f32.mrb[157].mxu1 }
 0x4bf   :  { %v8069_v22 = vadd.f32 %v5931_v3, %v12455_v16  ;;  %v5933_v26 = vpop.f32.mrb[158].mxu1  ;;  %6880 = vmatprep.mubr.bf16.mxu0 %v6015_v36 }
 0x4c0   :  { %v8070_v19 = vadd.f32 %v5933_v26, %v12452_v38  ;;  %v5935_v54 = vpop.f32.mrb[159].mxu1  ;;  %6881 = vmatmul.mubr.bf16.gmra.mrb[104].mxu0 %v6014_v49  ;;  %v5990_v11 = vmax.f32 %v8068_v5, 0.0 }
 0x4c1   :  { %v8071_v57 = vadd.f32 %v5935_v54, %v12455_v16  ;;  %v5991_v37 = vmax.f32 %v8069_v22, 0.0 }
 0x4c2   :  { %v5992_v35 = vmax.f32 %v8070_v19, 0.0 }
 0x4c3   :  { %v5993_v48 = vmax.f32 %v8071_v57, 0.0 }
 0x4c4   :  { %v6016_v27 = vpack.c.bf16 %v5992_v35, %v5990_v11 }
 0x4c5   :  { %v6017_v14 = vpack.c.bf16 %v5993_v48, %v5991_v37  ;;  %v5939_v51 = vpop.f32.mrb[160].mxu1 }
 0x4c6   :  { %v8072_v10 = vadd.f32 %v5939_v51, %v12452_v38  ;;  %v5941_v25 = vpop.f32.mrb[161].mxu1  ;;  %v6973_v51 = vld [vmem:[%s12564_s18] sm:$0x3]  ;;  %s9345_s18 = smov [#allocation2]  }
 0x4c7   :  { %v8073_v33 = vadd.f32 %v5941_v25, %v12455_v16  ;;  %v5943_v30 = vpop.f32.mrb[162].mxu1  ;;  %6890 = vmatprep.mubr.bf16.mxu0 %v6017_v14  ;;  %s7086_s15 = sshll.u32 %s9345_s18, 4  ;;  %s7087_s15 = int_to_ptr.vmem [resolvable:$true] %s7086_s15 }
 0x4c8   :  { %v8074_v40 = vadd.f32 %v5943_v30, %v12452_v38  ;;  %v5945_v60 = vpop.f32.mrb[163].mxu1  ;;  %6891 = vmatmul.mubr.bf16.gmra.mrb[108].mxu0 %v6016_v27  ;;  %v5994_v58 = vmax.f32 %v8072_v10, 0.0  ;;  %v12493_v10 = vrot.slane %v6973_v51, %v10034_v61  ;;  %s9320_s28 = scalar_lea.vmem %s7087_s15, 4096  ;;  %p9325_p1 = scmp.lt.s32.totalorder %s7087_s15, %s7087_s15 }
 0x4c9   :  { %v8075_v8 = vadd.f32 %v5945_v60, %v12455_v16  ;;  %v5995_v6 = vmax.f32 %v8073_v33, 0.0  ;;  %p9321_p0 = scmp.ne.s32.totalorder %s7087_s15, %s9320_s28  ;;  %p9326_p2 = scmp.lt.s32.totalorder %s9320_s28, %s9320_s28 }
 0x4ca   :  { %v5996_v44 = vmax.f32 %v8074_v40, 0.0 }
 0x4cb   :  { %v5997_v62 = vmax.f32 %v8075_v8, 0.0  ;;  %p9327_p3 = por %p9326_p2, %p9325_p1 }
 0x4cc   :  { %v6018_v24 = vpack.c.bf16 %v5996_v44, %v5994_v58 }
 0x4cd   :  { %v6019_v50 = vpack.c.bf16 %v5997_v62, %v5995_v6  ;;  %v5949_v2 = vpop.f32.mrb[164].mxu1  ;;  %p9328_p4 = pnand %p9327_p3, %p9321_p0 }
 0x4ce   :  { %v8076_v31 = vadd.f32 %v5949_v2, %v12452_v38  ;;  %v5951_v47 = vpop.f32.mrb[165].mxu1 }
 0x4cf   :  { %v8077_v45 = vadd.f32 %v5951_v47, %v12455_v16  ;;  %v5953_v32 = vpop.f32.mrb[166].mxu1  ;;  %6900 = vmatprep.mubr.bf16.mxu0 %v6019_v50 }
 0x4d0   :  { %v8078_v29 = vadd.f32 %v5953_v32, %v12452_v38  ;;  %v5955_v12 = vpop.f32.mrb[167].mxu1  ;;  %6901 = vmatmul.mubr.bf16.gmra.mrb[112].mxu0 %v6018_v24  ;;  %v5998_v20 = vmax.f32 %v8076_v31, 0.0 }
 0x4d1   :  { %v8079_v43 = vadd.f32 %v5955_v12, %v12455_v16  ;;  %v5999_v34 = vmax.f32 %v8077_v45, 0.0 }
 0x4d2   :  { %v6000_v52 = vmax.f32 %v8078_v29, 0.0 }
 0x4d3   :  { %v6001_v39 = vmax.f32 %v8079_v43, 0.0 }
 0x4d4   :  { %v6020_v23 = vpack.c.bf16 %v6000_v52, %v5998_v20 }
 0x4d5   :  { %v6021_v1 = vpack.c.bf16 %v6001_v39, %v5999_v34  ;;  %v5959_v18 = vpop.f32.mrb[168].mxu1 }
 0x4d6   :  { %v8080_v46 = vadd.f32 %v5959_v18, %v12452_v38  ;;  %v5961_v56 = vpop.f32.mrb[169].mxu1 }
 0x4d7   :  { %v8081_v0 = vadd.f32 %v5961_v56, %v12455_v16  ;;  %v5963_v7 = vpop.f32.mrb[170].mxu1  ;;  %6910 = vmatprep.mubr.bf16.mxu0 %v6021_v1 }
 0x4d8   :  { %v8082_v17 = vadd.f32 %v5963_v7, %v12452_v38  ;;  %v5965_v28 = vpop.f32.mrb[171].mxu1  ;;  %6911 = vmatmul.mubr.bf16.gmra.mrb[116].mxu0 %v6020_v23  ;;  %v6002_v42 = vmax.f32 %v8080_v46, 0.0 }
 0x4d9   :  { %v8083_v9 = vadd.f32 %v5965_v28, %v12455_v16  ;;  %v6003_v41 = vmax.f32 %v8081_v0, 0.0 }
 0x4da   :  { %v6004_v4 = vmax.f32 %v8082_v17, 0.0 }
 0x4db   :  { %v6005_v13 = vmax.f32 %v8083_v9, 0.0 }
 0x4dc   :  { %v6022_v49 = vpack.c.bf16 %v6004_v4, %v6002_v42 }
 0x4dd   :  { %v6023_v36 = vpack.c.bf16 %v6005_v13, %v6003_v41  ;;  %v5969_v59 = vpop.f32.mrb[172].mxu1 }
 0x4de   :  { %v8084_v5 = vadd.f32 %v5969_v59, %v12452_v38  ;;  %v5971_v3 = vpop.f32.mrb[173].mxu1 }
 0x4df   :  { %v8085_v22 = vadd.f32 %v5971_v3, %v12455_v16  ;;  %v5973_v26 = vpop.f32.mrb[174].mxu1  ;;  %6920 = vmatprep.mubr.bf16.mxu0 %v6023_v36 }
 0x4e0   :  { %v8086_v19 = vadd.f32 %v5973_v26, %v12452_v38  ;;  %v5975_v54 = vpop.f32.mrb[175].mxu1  ;;  %6921 = vmatmul.mubr.bf16.gmra.mrb[120].mxu0 %v6022_v49  ;;  %v6006_v11 = vmax.f32 %v8084_v5, 0.0  ;;  %v12496_v38 = vrot.slane %v6973_v51, %v10042_v63 }
 0x4e1   :  { %v8087_v57 = vadd.f32 %v5975_v54, %v12455_v16  ;;  %v6007_v37 = vmax.f32 %v8085_v22, 0.0 }
 0x4e2   :  { %v6008_v35 = vmax.f32 %v8086_v19, 0.0 }
 0x4e3   :  { %v6009_v48 = vmax.f32 %v8087_v57, 0.0 }
 0x4e4   :  { %v6024_v27 = vpack.c.bf16 %v6008_v35, %v6006_v11 }
 0x4e5   :  { %v6025_v14 = vpack.c.bf16 %v6009_v48, %v6007_v37 }
 0x4e7   :  { %6930 = vmatprep.mubr.bf16.mxu1 %v6025_v14 }
 0x4e8   :  { %6931 = vmatmul.mubr.bf16.vlgmr.msra.gmra.mrb[176].mxu1 %v6024_v27 }
 0x583   :  { %v6862_v25 = vpop.f32.mrb[96].mxu0 }
 0x584   :  { %v6985_v16 = vadd.f32 %v12493_v10, %v6862_v25  ;;  %v6864_v33 = vpop.f32.mrb[97].mxu0 }
 0x585   :  { %v6986_v30 = vadd.f32 %v12496_v38, %v6864_v33  ;;  %v6866_v40 = vpop.f32.mrb[98].mxu0 }
 0x586   :  { %v7017_v60 = vmax.f32 %v6985_v16, 0.0  ;;  %v6987_v8 = vadd.f32 %v12493_v10, %v6866_v40  ;;  %v6868_v58 = vpop.f32.mrb[99].mxu0 }
 0x587   :  { %v7018_v44 = vmax.f32 %v6986_v30, 0.0  ;;  %v6988_v6 = vadd.f32 %v12496_v38, %v6868_v58 }
 0x588   :  { %7049 = vst [vmem:[#allocation2] sm:$0xff] %v7017_v60  ;;  %v7019_v61 = vmax.f32 %v6987_v8, 0.0 }
 0x589   :  { %7050 = vst [vmem:[#allocation2 + $0x8] sm:$0xff] %v7018_v44  ;;  %v7020_v62 = vmax.f32 %v6988_v6, 0.0 }
 0x58a   :  { %7051 = vst [vmem:[#allocation2 + $0x10] sm:$0xff] %v7019_v61 }
 0x58b   :  { %7052 = vst [vmem:[#allocation2 + $0x18] sm:$0xff] %v7020_v62  ;;  %v6872_v63 = vpop.f32.mrb[100].mxu0 }
 0x58c   :  { %v6989_v24 = vadd.f32 %v12493_v10, %v6872_v63  ;;  %v6874_v50 = vpop.f32.mrb[101].mxu0 }
 0x58d   :  { %v6990_v2 = vadd.f32 %v12496_v38, %v6874_v50  ;;  %v6876_v31 = vpop.f32.mrb[102].mxu0 }
 0x58e   :  { %v7021_v47 = vmax.f32 %v6989_v24, 0.0  ;;  %v6991_v45 = vadd.f32 %v12493_v10, %v6876_v31  ;;  %v6878_v32 = vpop.f32.mrb[103].mxu0 }
 0x58f   :  { %v7022_v29 = vmax.f32 %v6990_v2, 0.0  ;;  %v6992_v12 = vadd.f32 %v12496_v38, %v6878_v32 }
 0x590   :  { %7053 = vst [vmem:[#allocation2 + $0x20] sm:$0xff] %v7021_v47  ;;  %v7023_v43 = vmax.f32 %v6991_v45, 0.0 }
 0x591   :  { %7054 = vst [vmem:[#allocation2 + $0x28] sm:$0xff] %v7022_v29  ;;  %v7024_v20 = vmax.f32 %v6992_v12, 0.0 }
 0x592   :  { %7055 = vst [vmem:[#allocation2 + $0x30] sm:$0xff] %v7023_v43 }
 0x593   :  { %7056 = vst [vmem:[#allocation2 + $0x38] sm:$0xff] %v7024_v20  ;;  %v6882_v52 = vpop.f32.mrb[104].mxu0 }
 0x594   :  { %v6993_v34 = vadd.f32 %v12493_v10, %v6882_v52  ;;  %v6884_v39 = vpop.f32.mrb[105].mxu0 }
 0x595   :  { %v6994_v23 = vadd.f32 %v12496_v38, %v6884_v39  ;;  %v6886_v1 = vpop.f32.mrb[106].mxu0 }
 0x596   :  { %v7025_v18 = vmax.f32 %v6993_v34, 0.0  ;;  %v6995_v46 = vadd.f32 %v12493_v10, %v6886_v1  ;;  %v6888_v56 = vpop.f32.mrb[107].mxu0 }
 0x597   :  { %v7026_v0 = vmax.f32 %v6994_v23, 0.0  ;;  %v6996_v7 = vadd.f32 %v12496_v38, %v6888_v56 }
 0x598   :  { %7057 = vst [vmem:[#allocation2 + $0x40] sm:$0xff] %v7025_v18  ;;  %v7027_v17 = vmax.f32 %v6995_v46, 0.0 }
 0x599   :  { %7058 = vst [vmem:[#allocation2 + $0x48] sm:$0xff] %v7026_v0  ;;  %v7028_v28 = vmax.f32 %v6996_v7, 0.0 }
 0x59a   :  { %7059 = vst [vmem:[#allocation2 + $0x50] sm:$0xff] %v7027_v17 }
 0x59b   :  { %7060 = vst [vmem:[#allocation2 + $0x58] sm:$0xff] %v7028_v28  ;;  %v6892_v9 = vpop.f32.mrb[108].mxu0 }
 0x59c   :  { %v6997_v42 = vadd.f32 %v12493_v10, %v6892_v9  ;;  %v6894_v4 = vpop.f32.mrb[109].mxu0 }
 0x59d   :  { %v6998_v41 = vadd.f32 %v12496_v38, %v6894_v4  ;;  %v6896_v13 = vpop.f32.mrb[110].mxu0 }
 0x59e   :  { %v7029_v49 = vmax.f32 %v6997_v42, 0.0  ;;  %v6999_v36 = vadd.f32 %v12493_v10, %v6896_v13  ;;  %v6898_v59 = vpop.f32.mrb[111].mxu0 }
 0x59f   :  { %v7030_v5 = vmax.f32 %v6998_v41, 0.0  ;;  %v7000_v3 = vadd.f32 %v12496_v38, %v6898_v59 }
 0x5a0   :  { %7061 = vst [vmem:[#allocation2 + $0x60] sm:$0xff] %v7029_v49  ;;  %v7031_v22 = vmax.f32 %v6999_v36, 0.0 }
 0x5a1   :  { %7062 = vst [vmem:[#allocation2 + $0x68] sm:$0xff] %v7030_v5  ;;  %v7032_v26 = vmax.f32 %v7000_v3, 0.0 }
 0x5a2   :  { %7063 = vst [vmem:[#allocation2 + $0x70] sm:$0xff] %v7031_v22 }
 0x5a3   :  { %7064 = vst [vmem:[#allocation2 + $0x78] sm:$0xff] %v7032_v26  ;;  %v6902_v19 = vpop.f32.mrb[112].mxu0 }
 0x5a4   :  { %v7001_v54 = vadd.f32 %v12493_v10, %v6902_v19  ;;  %v6904_v57 = vpop.f32.mrb[113].mxu0 }
 0x5a5   :  { %v7002_v11 = vadd.f32 %v12496_v38, %v6904_v57  ;;  %v6906_v35 = vpop.f32.mrb[114].mxu0 }
 0x5a6   :  { %v7033_v37 = vmax.f32 %v7001_v54, 0.0  ;;  %v7003_v48 = vadd.f32 %v12493_v10, %v6906_v35  ;;  %v6908_v27 = vpop.f32.mrb[115].mxu0 }
 0x5a7   :  { %v7034_v14 = vmax.f32 %v7002_v11, 0.0  ;;  %v7004_v51 = vadd.f32 %v12496_v38, %v6908_v27 }
 0x5a8   :  { %7065 = vst [vmem:[#allocation2 + $0x80] sm:$0xff] %v7033_v37  ;;  %v7035_v25 = vmax.f32 %v7003_v48, 0.0 }
 0x5a9   :  { %7066 = vst [vmem:[#allocation2 + $0x88] sm:$0xff] %v7034_v14  ;;  %v7036_v16 = vmax.f32 %v7004_v51, 0.0 }
 0x5aa   :  { %7067 = vst [vmem:[#allocation2 + $0x90] sm:$0xff] %v7035_v25 }
 0x5ab   :  { %7068 = vst [vmem:[#allocation2 + $0x98] sm:$0xff] %v7036_v16  ;;  %v6912_v33 = vpop.f32.mrb[116].mxu0 }
 0x5ac   :  { %v7005_v30 = vadd.f32 %v12493_v10, %v6912_v33  ;;  %v6914_v40 = vpop.f32.mrb[117].mxu0 }
 0x5ad   :  { %v7006_v60 = vadd.f32 %v12496_v38, %v6914_v40  ;;  %v6916_v8 = vpop.f32.mrb[118].mxu0 }
 0x5ae   :  { %v7037_v58 = vmax.f32 %v7005_v30, 0.0  ;;  %v7007_v44 = vadd.f32 %v12493_v10, %v6916_v8  ;;  %v6918_v6 = vpop.f32.mrb[119].mxu0 }
 0x5af   :  { %v7038_v61 = vmax.f32 %v7006_v60, 0.0  ;;  %v7008_v62 = vadd.f32 %v12496_v38, %v6918_v6 }
 0x5b0   :  { %7069 = vst [vmem:[#allocation2 + $0xa0] sm:$0xff] %v7037_v58  ;;  %v7039_v63 = vmax.f32 %v7007_v44, 0.0 }
 0x5b1   :  { %7070 = vst [vmem:[#allocation2 + $0xa8] sm:$0xff] %v7038_v61  ;;  %v7040_v24 = vmax.f32 %v7008_v62, 0.0 }
 0x5b2   :  { %7071 = vst [vmem:[#allocation2 + $0xb0] sm:$0xff] %v7039_v63 }
 0x5b3   :  { %7072 = vst [vmem:[#allocation2 + $0xb8] sm:$0xff] %v7040_v24  ;;  %v6922_v50 = vpop.f32.mrb[120].mxu0 }
 0x5b4   :  { %v7009_v2 = vadd.f32 %v12493_v10, %v6922_v50  ;;  %v6924_v31 = vpop.f32.mrb[121].mxu0 }
 0x5b5   :  { %v7010_v47 = vadd.f32 %v12496_v38, %v6924_v31  ;;  %v6926_v45 = vpop.f32.mrb[122].mxu0 }
 0x5b6   :  { %v7041_v32 = vmax.f32 %v7009_v2, 0.0  ;;  %v7011_v29 = vadd.f32 %v12493_v10, %v6926_v45  ;;  %v6928_v12 = vpop.f32.mrb[123].mxu0 }
 0x5b7   :  { %v7042_v43 = vmax.f32 %v7010_v47, 0.0  ;;  %v7012_v20 = vadd.f32 %v12496_v38, %v6928_v12 }
 0x5b8   :  { %7073 = vst [vmem:[#allocation2 + $0xc0] sm:$0xff] %v7041_v32  ;;  %v7043_v52 = vmax.f32 %v7011_v29, 0.0 }
 0x5b9   :  { %7074 = vst [vmem:[#allocation2 + $0xc8] sm:$0xff] %v7042_v43  ;;  %v7044_v34 = vmax.f32 %v7012_v20, 0.0 }
 0x5ba   :  { %7075 = vst [vmem:[#allocation2 + $0xd0] sm:$0xff] %v7043_v52 }
 0x5bb   :  { %7076 = vst [vmem:[#allocation2 + $0xd8] sm:$0xff] %v7044_v34  ;;  %v6932_v39 = vpop.f32.mrb[176].mxu1 }
 0x5bc   :  { %v8088_v23 = vadd.f32 %v6932_v39, %v12423_v55  ;;  %v6934_v1 = vpop.f32.mrb[177].mxu1 }
 0x5bd   :  { %v8089_v18 = vadd.f32 %v6934_v1, %v12426_v53  ;;  %v6936_v46 = vpop.f32.mrb[178].mxu1 }
 0x5be   :  { %v7013_v56 = vadd.f32 %v8088_v23, %v12493_v10  ;;  %v8090_v0 = vadd.f32 %v6936_v46, %v12429_v21  ;;  %v6938_v7 = vpop.f32.mrb[179].mxu1 }
 0x5bf   :  { %v7014_v17 = vadd.f32 %v8089_v18, %v12496_v38  ;;  %v8091_v28 = vadd.f32 %v6938_v7, %v12432_v15 }
 0x5c0   :  { %v7045_v9 = vmax.f32 %v7013_v56, 0.0  ;;  %v7015_v42 = vadd.f32 %v8090_v0, %v12493_v10 }
 0x5c1   :  { %v7046_v4 = vmax.f32 %v7014_v17, 0.0  ;;  %v7016_v55 = vadd.f32 %v8091_v28, %v12496_v38 }
 0x5c2   :  { %7077 = vst [vmem:[#allocation2 + $0xe0] sm:$0xff] %v7045_v9  ;;  %v7047_v53 = vmax.f32 %v7015_v42, 0.0 }
 0x5c3   :  { %7078 = vst [vmem:[#allocation2 + $0xe8] sm:$0xff] %v7046_v4  ;;  %v7048_v41 = vmax.f32 %v7016_v55, 0.0 }
 0x5c4   :  { %7079 = vst [vmem:[#allocation2 + $0xf0] sm:$0xff] %v7047_v53 }
 0x5c5   :  { %7080 = vst [vmem:[#allocation2 + $0xf8] sm:$0xff] %v7048_v41 }
 0x5c6   :  { %9331 = shalt.err (!%p9328_p4)
}
 0x5c7   :  { %s9332_s8 = scalar_lea.hbm %s12565_s19, 4096 }
 0x5c8   :  { %p9333_p5 = scmp.ne.s32.totalorder %s12565_s19, %s9332_s8  ;;  %p9336_p6 = scmp.lt.u32.totalorder %s9332_s8, %s12565_s19 }
 0x5ca   :  { %p9338_p7 = pnand %p9336_p6, %p9333_p5 }
 0x5cc   :  { %9341 = shalt.err (!%p9338_p7)
}
 0x5cd   :  { %s9346_s0 = smov 256   ;;  %s9347_s1 = smov 16  }
 0x5ce   :  { %7092 = dma.vmem_to_hbm [thread:$0]  %s7087_s15, 4096, %s12565_s19, [#allocation3], %s9346_s0, %s9346_s0, %s9347_s1  }
 0x5cf   :  { %9342 = dma.done.wait [#allocation3], 4096  }
 0x5d0   :  { %9343 = vsyncadd [#allocation3], 4294963200 }
 0x5d1   :  { %7096 = vsyncpa [#allocation3], 1 }

</bundles_post_ra>
